<compile_context>
chip_gen: v7x
topology: tpu7x:2x2x1
jax: 0.10.0
libtpu: 0.0.40
codegen_flags: <defaults>
</compile_context>

<pallas_src>
import jax
import jax.numpy as jnp
import numpy as np
from jax import lax
from jax.experimental import pallas as pl
from jax.experimental.pallas import tpu as pltpu


# ----------------------------------------------------------------------------
# Hardware / tiling helpers
# ----------------------------------------------------------------------------
def _vmem_capacity_bytes():
    try:
        cap = pltpu.get_tpu_info().vmem_capacity_bytes
        if cap and cap > 0:
            return int(cap)
    except Exception:
        pass
    return 64 << 20  # conservative (v7x per-TC VMEM)


def _num_tensorcores():
    """TensorCores a 'parallel' grid axis can shard across. Conservative: 1."""
    try:
        info = pltpu.get_tpu_info()
        for attr in ("num_cores", "core_count", "num_tensorcores",
                     "tensorcore_count", "cores_per_chip"):
            v = getattr(info, attr, None)
            if isinstance(v, int) and v >= 1:
                return v
    except Exception:
        pass
    return 1


def _vmem_limit(footprint, cap):
    return int(min(max(footprint + (8 << 20), 32 << 20), int(0.85 * cap)))


def _pick_chunk(total, preferred, align):
    """Largest chunk <= preferred dividing total, multiple of align (then 8);
    falls back to full extent (always legal for the (8,128) block rule)."""
    if total <= preferred:
        return total
    for a in (align, 8):
        for c in range(min(preferred, total), a - 1, -1):
            if total % c == 0 and c % a == 0:
                return c
    return total


def _pick_col_chunk(G, preferred):
    if G <= preferred:
        return G
    c = (min(preferred, G) // 128) * 128
    while c >= 128:
        if G % c == 0:
            return c
        c -= 128
    return G


def _gates_tiles(R, I, G, budget):
    """Row/col tiles for the parallel matmul+bias kernel, sized to budget."""
    rc_pref, cc_pref = 512, 2048
    while True:
        rc = _pick_chunk(R, rc_pref, 16)          # 16: bf16 sublane packing
        cc = _pick_col_chunk(G, cc_pref)
        # double-buffered: x (bf16) + W (bf16) + bias (f32) + out (f32)
        foot = 2 * (rc * I * 2 + I * cc * 2 + cc * 4 + rc * cc * 4)
        if foot <= budget or (rc_pref <= 64 and cc_pref <= 128):
            return rc, cc, foot
        if cc_pref > 128:
            cc_pref //= 2
        else:
            rc_pref = max(rc_pref // 2, 64)


def _pick_time_chunk(S, bc, H, budget):
    wh_bytes = H * 4 * H * 2                       # bf16, single-buffered
    fixed = wh_bytes + 6 * bc * H * 4              # hT/cT out blocks + h/c scratch
    per_t = 2 * bc * (4 * H + H + H) * 4           # gx + res + h_out, double-buffered
    avail = budget - fixed
    pref = 8 if avail <= per_t * 8 else int(avail // per_t)
    pref = max(8, min(32, (pref // 8) * 8))
    return _pick_chunk(S, pref, 8)


def _recurrent_vmem_bytes(bc, tc, H):
    wh = H * 4 * H * 2
    streams = 2 * bc * tc * (4 * H + H + H) * 4
    tails = 2 * 2 * bc * H * 4
    scratch = 2 * bc * H * 4
    return wh + streams + tails + scratch


# ----------------------------------------------------------------------------
# Kernel 1: parallel matmul + bias  (x-part of gates, and residual Linear)
#   out[r, c] = x[r, :] @ W[:, c] + bias[0, c]
# ----------------------------------------------------------------------------
def _matmul_bias_kernel(x_ref, w_ref, b_ref, out_ref):
    out_ref[...] = (
        jnp.dot(x_ref[...], w_ref[...], preferred_element_type=jnp.float32)
        + b_ref[...]
    ).astype(out_ref.dtype)


def _matmul_bias(x2d, w, bias, budget, cap):
    R, I = x2d.shape
    G = w.shape[1]
    rc, cc, foot = _gates_tiles(R, I, G, budget)
    return pl.pallas_call(
        _matmul_bias_kernel,
        out_shape=jax.ShapeDtypeStruct((R, G), jnp.float32),
        grid_spec=pltpu.PrefetchScalarGridSpec(
            num_scalar_prefetch=0,
            grid=(R // rc, G // cc),
            in_specs=[
                pl.BlockSpec((rc, I), lambda r, c: (r, 0)),
                pl.BlockSpec((I, cc), lambda r, c: (0, c)),
                pl.BlockSpec((1, cc), lambda r, c: (0, c)),
            ],
            out_specs=pl.BlockSpec((rc, cc), lambda r, c: (r, c)),
        ),
        compiler_params=pltpu.CompilerParams(
            dimension_semantics=("parallel", "parallel"),
            vmem_limit_bytes=_vmem_limit(foot, cap)),
    )(x2d, w, bias)


# ----------------------------------------------------------------------------
# Kernel 2: the serial recurrence.
#   gx_ref  : (BB, T, 4H) f32  = x@Wx + b          (gate order i, f, o, c_hat)
#   res_ref : (BB, T, H)  f32  = residual (x@Wr + br, or x itself when I == H)
#   wh_ref  : (H, 4H)     bf16 (single-buffered: constant index_map)
# ----------------------------------------------------------------------------
def _lstm_recurrent_kernel(gx_ref, res_ref, wh_ref, h_ref, hT_ref, cT_ref,
                           h_scr, c_scr):
    nt = pl.program_id(1)
    H = h_scr.shape[-1]
    T = gx_ref.shape[1]

    @pl.when(nt == 0)
    def _():                                   # reset state per batch block
        h_scr[...] = jnp.zeros_like(h_scr)
        c_scr[...] = jnp.zeros_like(c_scr)

    wh = wh_ref[...]                           # (H, 4H) bf16, loaded once

    # Static unrolled time loop; per-step loads keep vreg live ranges short.
    for t in range(T):
        gx_t = gx_ref[:, t, :]                 # (BB, 4H) f32
        x_res = res_ref[:, t, :]               # (BB, H)  f32
        h_prev = h_scr[...]
        c_prev = c_scr[...]

        gates = gx_t + jnp.dot(h_prev.astype(wh.dtype), wh,
                               preferred_element_type=jnp.float32)

        i_t = jax.nn.sigmoid(gates[:, 0 * H:1 * H])
        f_t = jax.nn.sigmoid(gates[:, 1 * H:2 * H])
        o_t = jax.nn.sigmoid(gates[:, 2 * H:3 * H])
        c_hat = jnp.tanh(gates[:, 3 * H:4 * H])

        c_t = f_t * c_prev + i_t * c_hat
        h_t = o_t * jnp.tanh(c_t) + x_res

        h_scr[...] = h_t
        c_scr[...] = c_t
        h_ref[:, t, :] = h_t.astype(h_ref.dtype)

    # Final states: resident output blocks, written once on the last chunk.
    @pl.when(nt == pl.num_programs(1) - 1)
    def _():
        hT_ref[...] = h_scr[...].astype(hT_ref.dtype)
        cT_ref[...] = c_scr[...].astype(cT_ref.dtype)


def _wh_spec(H):
    # Wh's index_map is constant -> single-buffer it (biggest VMEM saver).
    try:
        return pl.BlockSpec((H, 4 * H), lambda nb, nt: (0, 0),
                            pipeline_mode=pl.Buffered(1))
    except Exception:   # older jax without pipeline_mode kwarg
        return pl.BlockSpec((H, 4 * H), lambda nb, nt: (0, 0))


# ----------------------------------------------------------------------------
# Wrapper
# ----------------------------------------------------------------------------
def lstm_with_residual(x, params):
    """x: (batch, seq, input) float32.  Returns (h, (h_T, c_T)) like the
    PyTorch LSTMWithResidual.forward (zero initial state)."""
    wx, wh, b, wr, br = params
    B, S, I = x.shape
    H = wh.shape[0]

    cap = _vmem_capacity_bytes()
    budget = int(0.6 * cap)

    # ---- hoisted, fully parallel x-dependent matmuls ----
    x_bf = x.astype(jnp.bfloat16)
    x2d = x_bf.reshape(B * S, I)
    gx = _matmul_bias(x2d, wx, b, budget, cap).reshape(B, S, 4 * H)
    if wr is None:                              # identity residual (I == H)
        res = x
    else:
        res = _matmul_bias(x2d, wr, br, budget, cap).reshape(B, S, H)

    # ---- batch / time tiling for the serial recurrence ----
    batch_chunk = B
    if (_num_tensorcores() >= 2 and B >= 32 and B % 2 == 0
            and (B // 2) % 16 == 0):            # split only with >=2 TCs, bf16-aligned
        batch_chunk = B // 2
    time_chunk = _pick_time_chunk(S, batch_chunk, H, budget)
    foot = _recurrent_vmem_bytes(batch_chunk, time_chunk, H)

    h, h_T, c_T = pl.pallas_call(
        _lstm_recurrent_kernel,
        out_shape=(
            jax.ShapeDtypeStruct((B, S, H), jnp.float32),
            jax.ShapeDtypeStruct((B, H), jnp.float32),
            jax.ShapeDtypeStruct((B, H), jnp.float32),
        ),
        grid_spec=pltpu.PrefetchScalarGridSpec(
            num_scalar_prefetch=0,
            grid=(B // batch_chunk, S // time_chunk),
            in_specs=[
                pl.BlockSpec((batch_chunk, time_chunk, 4 * H),
                             lambda nb, nt: (nb, nt, 0)),        # gate x-part
                pl.BlockSpec((batch_chunk, time_chunk, H),
                             lambda nb, nt: (nb, nt, 0)),        # residual
                _wh_spec(H),                                     # Wh (recurrent)
            ],
            out_specs=[
                pl.BlockSpec((batch_chunk, time_chunk, H),
                             lambda nb, nt: (nb, nt, 0)),        # h per step
                pl.BlockSpec((batch_chunk, H), lambda nb, nt: (nb, 0)),  # h_T
                pl.BlockSpec((batch_chunk, H), lambda nb, nt: (nb, 0)),  # c_T
            ],
            scratch_shapes=[
                pltpu.VMEM((batch_chunk, H), jnp.float32),       # h state
                pltpu.VMEM((batch_chunk, H), jnp.float32),       # c state
            ],
        ),
        compiler_params=pltpu.CompilerParams(
            dimension_semantics=("parallel", "arbitrary"),
            vmem_limit_bytes=_vmem_limit(foot, cap)),
    )(gx, res, wh)

    return h, (h_T, c_T)


# ----------------------------------------------------------------------------
# Parameters & pure-JAX reference
# ----------------------------------------------------------------------------
def init_params(key, input_size, hidden_size, weight_dtype=jnp.bfloat16):
    """Fused parameters mirroring the PyTorch module's shapes: the 4 gate
    Linear(I+H, H) layers as Wx:(I,4H), Wh:(H,4H), b:(1,4H) in order
    [i, f, o, c_hat]; residual Linear(I, H) as Wr:(I,H), br:(1,H) (None when
    I == H, matching the identity path)."""
    I, H = input_size, hidden_size
    k = jax.random.split(key, 5)
    scale = 1.0 / np.sqrt(I + H)
    wx = jax.random.uniform(k[0], (I, 4 * H), jnp.float32, -scale, scale).astype(weight_dtype)
    wh = jax.random.uniform(k[1], (H, 4 * H), jnp.float32, -scale, scale).astype(weight_dtype)
    b = jax.random.uniform(k[2], (1, 4 * H), jnp.float32, -scale, scale)
    if I == H:
        wr, br = None, None
    else:
        scale_r = 1.0 / np.sqrt(I)
        wr = jax.random.uniform(k[3], (I, H), jnp.float32, -scale_r, scale_r).astype(weight_dtype)
        br = jax.random.uniform(k[4], (1, H), jnp.float32, -scale_r, scale_r)
    return wx, wh, b, wr, br


def lstm_reference(x, params):
    """Pure-JAX reference matching the PyTorch forward, mirroring the kernel's
    bf16 weight/activation quantisation (f32 accumulation)."""
    wx, wh, b, wr, br = params
    H = wh.shape[0]
    f32 = jnp.float32
    hi = lax.Precision.HIGHEST
    xq = x.astype(jnp.bfloat16).astype(f32)
    wx32, wh32 = wx.astype(f32), wh.astype(f32)

    def step(carry, xs):
        x_t, xq_t = xs
        h_prev, c_prev = carry
        hq = h_prev.astype(jnp.bfloat16).astype(f32)
        gates = (jnp.dot(xq_t, wx32, precision=hi) + b
                 + jnp.dot(hq, wh32, precision=hi))
        i_t = jax.nn.sigmoid(gates[:, 0 * H:1 * H])
        f_t = jax.nn.sigmoid(gates[:, 1 * H:2 * H])
        o_t = jax.nn.sigmoid(gates[:, 2 * H:3 * H])
        c_hat = jnp.tanh(gates[:, 3 * H:4 * H])
        c_t = f_t * c_prev + i_t * c_hat
        if wr is None:
            x_res = x_t
        else:
            x_res = jnp.dot(xq_t, wr.astype(f32), precision=hi) + br
        h_t = o_t * jnp.tanh(c_t) + x_res
        return (h_t, c_t), h_t

    B = x.shape[0]
    init = (jnp.zeros((B, H), f32), jnp.zeros((B, H), f32))
    xs = (jnp.transpose(x, (1, 0, 2)), jnp.transpose(xq, (1, 0, 2)))
    (h_T, c_T), hs = lax.scan(step, init, xs)
    return jnp.transpose(hs, (1, 0, 2)), (h_T, c_T)


if __name__ == "__main__":
    key = jax.random.PRNGKey(0)
    kx, kp, kx2, kp2 = jax.random.split(key, 4)
    fwd = jax.jit(lstm_with_residual)

    # Path 1: input_size != hidden_size -> residual Linear path.
    B, S, I, H = 8, 8, 16, 32
    x = jax.random.normal(kx, (B, S, I), jnp.float32)
    params = init_params(kp, I, H)
    h, (h_T, c_T) = fwd(x, params)
    jax.block_until_ready((h, h_T, c_T))
    h_ref, (hT_ref, cT_ref) = lstm_reference(x, params)
    np.testing.assert_allclose(np.asarray(h), np.asarray(h_ref), rtol=2e-4, atol=2e-4)
    np.testing.assert_allclose(np.asarray(h_T), np.asarray(hT_ref), rtol=2e-4, atol=2e-4)
    np.testing.assert_allclose(np.asarray(c_T), np.asarray(cT_ref), rtol=2e-4, atol=2e-4)

    # Path 2: input_size == hidden_size -> identity residual path.
    B2, S2, I2, H2 = 4, 8, 32, 32
    x2 = jax.random.normal(kx2, (B2, S2, I2), jnp.float32)
    params2 = init_params(kp2, I2, H2)
    h2, (h2_T, c2_T) = fwd(x2, params2)
    jax.block_until_ready((h2, h2_T, c2_T))
    h2_ref, (h2T_ref, c2T_ref) = lstm_reference(x2, params2)
    np.testing.assert_allclose(np.asarray(h2), np.asarray(h2_ref), rtol=2e-4, atol=2e-4)
    np.testing.assert_allclose(np.asarray(h2_T), np.asarray(h2T_ref), rtol=2e-4, atol=2e-4)
    np.testing.assert_allclose(np.asarray(c2_T), np.asarray(c2T_ref), rtol=2e-4, atol=2e-4)

    print("KERNEL_OK")
</pallas_src>

<mosaic_0001>
module attributes {stable_mosaic.version = 11 : i64} {
  func.func @_matmul_bias_kernel(%arg0: i32, %arg1: i32, %arg2: memref<64x16xbf16, #tpu.memory_space<vmem>>, %arg3: memref<16x32xbf16, #tpu.memory_space<vmem>>, %arg4: memref<1x32xf32, #tpu.memory_space<vmem>>, %arg5: memref<64x32xf32, #tpu.memory_space<vmem>>) attributes {dimension_semantics = [#tpu.dimension_semantics<parallel>, #tpu.dimension_semantics<parallel>], iteration_bounds = array<i64: 1, 1>, scalar_prefetch = 0 : i64, scratch_operands = 0 : i64, tpu.core_type = #tpu.core_type<tc>, window_params = [{transform_indices = @transform_0, window_bounds = array<i64: 64, 16>}, {transform_indices = @transform_1, window_bounds = array<i64: 16, 32>}, {transform_indices = @transform_2, window_bounds = array<i64: 1, 32>}, {transform_indices = @transform_3, window_bounds = array<i64: 64, 32>}]} {
    %c0 = arith.constant 0 : index
    %c0_0 = arith.constant 0 : index
    %0 = vector.load %arg2[%c0, %c0_0] : memref<64x16xbf16, #tpu.memory_space<vmem>>, vector<64x16xbf16>
    %c0_1 = arith.constant 0 : index
    %c0_2 = arith.constant 0 : index
    %1 = vector.load %arg3[%c0_1, %c0_2] : memref<16x32xbf16, #tpu.memory_space<vmem>>, vector<16x32xbf16>
    %cst = arith.constant dense<0.000000e+00> : vector<64x32xf32>
    %2 = tpu.matmul %0, %1, %cst {dimension_numbers = #tpu.dot_dimension_numbers<[1], [0], [0], [1], [0, 0, 1, 1], [], []>} : vector<64x16xbf16>, vector<16x32xbf16>, vector<64x32xf32> -> vector<64x32xf32>
    %c0_3 = arith.constant 0 : index
    %c0_4 = arith.constant 0 : index
    %3 = vector.load %arg4[%c0_3, %c0_4] : memref<1x32xf32, #tpu.memory_space<vmem>>, vector<1x32xf32>
    %4 = vector.broadcast %3 : vector<1x32xf32> to vector<64x32xf32>
    %5 = arith.addf %2, %4 : vector<64x32xf32>
    %c0_5 = arith.constant 0 : index
    %c0_6 = arith.constant 0 : index
    %6 = vector.load %arg5[%c0_5, %c0_6] : memref<64x32xf32, #tpu.memory_space<vmem>>, vector<64x32xf32>
    tpu.vector_store %arg5[%c0_5, %c0_6], %5 {strides = array<i32>} : memref<64x32xf32, #tpu.memory_space<vmem>>, vector<64x32xf32>,
    return
  }
  func.func @transform_0(%arg0: i32, %arg1: i32) -> (i32, i32) {
    %c0_i32 = arith.constant 0 : i32
    %c0_i32_0 = arith.constant 0 : i32
    return %arg0, %c0_i32 : i32, i32
  }
  func.func @transform_1(%arg0: i32, %arg1: i32) -> (i32, i32) {
    %c0_i32 = arith.constant 0 : i32
    %c0_i32_0 = arith.constant 0 : i32
    return %c0_i32, %arg1 : i32, i32
  }
  func.func @transform_2(%arg0: i32, %arg1: i32) -> (i32, i32) {
    %c0_i32 = arith.constant 0 : i32
    %c0_i32_0 = arith.constant 0 : i32
    return %c0_i32, %arg1 : i32, i32
  }
  func.func @transform_3(%arg0: i32, %arg1: i32) -> (i32, i32) {
    %c0_i32 = arith.constant 0 : i32
    return %arg0, %arg1 : i32, i32
  }
}

module attributes {stable_mosaic.version = 11 : i64} {
  func.func @_matmul_bias_kernel(%arg0: i32, %arg1: i32, %arg2: memref<64x16xbf16, #tpu.memory_space<vmem>>, %arg3: memref<16x128xbf16, #tpu.memory_space<vmem>>, %arg4: memref<1x128xf32, #tpu.memory_space<vmem>>, %arg5: memref<64x128xf32, #tpu.memory_space<vmem>>) attributes {dimension_semantics = [#tpu.dimension_semantics<parallel>, #tpu.dimension_semantics<parallel>], iteration_bounds = array<i64: 1, 1>, scalar_prefetch = 0 : i64, scratch_operands = 0 : i64, tpu.core_type = #tpu.core_type<tc>, window_params = [{transform_indices = @transform_0, window_bounds = array<i64: 64, 16>}, {transform_indices = @transform_1, window_bounds = array<i64: 16, 128>}, {transform_indices = @transform_2, window_bounds = array<i64: 1, 128>}, {transform_indices = @transform_3, window_bounds = array<i64: 64, 128>}]} {
    %c0 = arith.constant 0 : index
    %c0_0 = arith.constant 0 : index
    %0 = vector.load %arg2[%c0, %c0_0] : memref<64x16xbf16, #tpu.memory_space<vmem>>, vector<64x16xbf16>
    %c0_1 = arith.constant 0 : index
    %c0_2 = arith.constant 0 : index
    %1 = vector.load %arg3[%c0_1, %c0_2] : memref<16x128xbf16, #tpu.memory_space<vmem>>, vector<16x128xbf16>
    %cst = arith.constant dense<0.000000e+00> : vector<64x128xf32>
    %2 = tpu.matmul %0, %1, %cst {dimension_numbers = #tpu.dot_dimension_numbers<[1], [0], [0], [1], [0, 0, 1, 1], [], []>} : vector<64x16xbf16>, vector<16x128xbf16>, vector<64x128xf32> -> vector<64x128xf32>
    %c0_3 = arith.constant 0 : index
    %c0_4 = arith.constant 0 : index
    %3 = vector.load %arg4[%c0_3, %c0_4] : memref<1x128xf32, #tpu.memory_space<vmem>>, vector<1x128xf32>
    %4 = vector.broadcast %3 : vector<1x128xf32> to vector<64x128xf32>
    %5 = arith.addf %2, %4 : vector<64x128xf32>
    %c0_5 = arith.constant 0 : index
    %c0_6 = arith.constant 0 : index
    %6 = vector.load %arg5[%c0_5, %c0_6] : memref<64x128xf32, #tpu.memory_space<vmem>>, vector<64x128xf32>
    tpu.vector_store %arg5[%c0_5, %c0_6], %5 {strides = array<i32>} : memref<64x128xf32, #tpu.memory_space<vmem>>, vector<64x128xf32>,
    return
  }
  func.func @transform_0(%arg0: i32, %arg1: i32) -> (i32, i32) {
    %c0_i32 = arith.constant 0 : i32
    %c0_i32_0 = arith.constant 0 : i32
    return %arg0, %c0_i32 : i32, i32
  }
  func.func @transform_1(%arg0: i32, %arg1: i32) -> (i32, i32) {
    %c0_i32 = arith.constant 0 : i32
    %c0_i32_0 = arith.constant 0 : i32
    return %c0_i32, %arg1 : i32, i32
  }
  func.func @transform_2(%arg0: i32, %arg1: i32) -> (i32, i32) {
    %c0_i32 = arith.constant 0 : i32
    %c0_i32_0 = arith.constant 0 : i32
    return %c0_i32, %arg1 : i32, i32
  }
  func.func @transform_3(%arg0: i32, %arg1: i32) -> (i32, i32) {
    %c0_i32 = arith.constant 0 : i32
    return %arg0, %arg1 : i32, i32
  }
}

module attributes {stable_mosaic.version = 11 : i64} {
  func.func @_lstm_recurrent_kernel(%arg0: i32, %arg1: i32, %arg2: memref<8x8x128xf32, #tpu.memory_space<vmem>>, %arg3: memref<8x8x32xf32, #tpu.memory_space<vmem>>, %arg4: memref<32x128xbf16, #tpu.memory_space<vmem>>, %arg5: memref<8x8x32xf32, #tpu.memory_space<vmem>>, %arg6: memref<8x32xf32, #tpu.memory_space<vmem>>, %arg7: memref<8x32xf32, #tpu.memory_space<vmem>>, %arg8: memref<8x32xf32, #tpu.memory_space<vmem>>, %arg9: memref<8x32xf32, #tpu.memory_space<vmem>>) attributes {dimension_semantics = [#tpu.dimension_semantics<parallel>, #tpu.dimension_semantics<arbitrary>], iteration_bounds = array<i64: 1, 1>, scalar_prefetch = 0 : i64, scratch_operands = 2 : i64, tpu.core_type = #tpu.core_type<tc>, window_params = [{transform_indices = @transform_0, window_bounds = array<i64: 8, 8, 128>}, {transform_indices = @transform_1, window_bounds = array<i64: 8, 8, 32>}, {pipeline_mode = #tpu.pipeline_mode<synchronous>, transform_indices = @transform_2, window_bounds = array<i64: 32, 128>}, {transform_indices = @transform_3, window_bounds = array<i64: 8, 8, 32>}, {transform_indices = @transform_4, window_bounds = array<i64: 8, 32>}, {transform_indices = @transform_5, window_bounds = array<i64: 8, 32>}]} {
    %c0_i32 = arith.constant 0 : i32
    %0 = arith.cmpi eq, %arg1, %c0_i32 : i32
    %1 = arith.extui %0 : i1 to i32
    %c0_i32_0 = arith.constant 0 : i32
    %2 = arith.cmpi ne, %1, %c0_i32_0 : i32
    scf.if %2 {
      %cst_164 = arith.constant 0.000000e+00 : f32
      %327 = vector.broadcast %cst_164 : f32 to vector<8x32xf32>
      %c0_165 = arith.constant 0 : index
      %c0_166 = arith.constant 0 : index
      %328 = vector.load %arg8[%c0_165, %c0_166] : memref<8x32xf32, #tpu.memory_space<vmem>>, vector<8x32xf32>
      tpu.vector_store %arg8[%c0_165, %c0_166], %327 {strides = array<i32>} : memref<8x32xf32, #tpu.memory_space<vmem>>, vector<8x32xf32>,
      %cst_167 = arith.constant 0.000000e+00 : f32
      %329 = vector.broadcast %cst_167 : f32 to vector<8x32xf32>
      %c0_168 = arith.constant 0 : index
      %c0_169 = arith.constant 0 : index
      %330 = vector.load %arg9[%c0_168, %c0_169] : memref<8x32xf32, #tpu.memory_space<vmem>>, vector<8x32xf32>
      tpu.vector_store %arg9[%c0_168, %c0_169], %329 {strides = array<i32>} : memref<8x32xf32, #tpu.memory_space<vmem>>, vector<8x32xf32>,
    } else {
    }
    %c0 = arith.constant 0 : index
    %c0_1 = arith.constant 0 : index
    %3 = vector.load %arg4[%c0, %c0_1] : memref<32x128xbf16, #tpu.memory_space<vmem>>, vector<32x128xbf16>
    %c0_2 = arith.constant 0 : index
    %c0_3 = arith.constant 0 : index
    %c0_4 = arith.constant 0 : index
    %4 = vector.load %arg2[%c0_2, %c0_3, %c0_4] : memref<8x8x128xf32, #tpu.memory_space<vmem>>, vector<8x1x128xf32>
    %5 = vector.shape_cast %4 : vector<8x1x128xf32> to vector<8x128xf32>
    %c0_5 = arith.constant 0 : index
    %c0_6 = arith.constant 0 : index
    %c0_7 = arith.constant 0 : index
    %6 = vector.load %arg3[%c0_5, %c0_6, %c0_7] : memref<8x8x32xf32, #tpu.memory_space<vmem>>, vector<8x1x32xf32>
    %7 = vector.shape_cast %6 : vector<8x1x32xf32> to vector<8x32xf32>
    %c0_8 = arith.constant 0 : index
    %c0_9 = arith.constant 0 : index
    %8 = vector.load %arg8[%c0_8, %c0_9] : memref<8x32xf32, #tpu.memory_space<vmem>>, vector<8x32xf32>
    %c0_10 = arith.constant 0 : index
    %c0_11 = arith.constant 0 : index
    %9 = vector.load %arg9[%c0_10, %c0_11] : memref<8x32xf32, #tpu.memory_space<vmem>>, vector<8x32xf32>
    %10 = arith.truncf %8 : vector<8x32xf32> to vector<8x32xbf16>
    %cst = arith.constant dense<0.000000e+00> : vector<8x128xf32>
    %11 = tpu.matmul %10, %3, %cst {dimension_numbers = #tpu.dot_dimension_numbers<[1], [0], [0], [1], [0, 0, 1, 1], [], []>} : vector<8x32xbf16>, vector<32x128xbf16>, vector<8x128xf32> -> vector<8x128xf32>
    %12 = arith.addf %5, %11 : vector<8x128xf32>
    %13 = vector.extract_strided_slice %12 {offsets = [0, 0], sizes = [8, 32], strides = [1, 1]} : vector<8x128xf32> to vector<8x32xf32>
    %14 = arith.negf %13 : vector<8x32xf32>
    %15 = math.exp %14 : vector<8x32xf32>
    %cst_12 = arith.constant 1.000000e+00 : f32
    %16 = vector.broadcast %cst_12 : f32 to vector<8x32xf32>
    %17 = arith.addf %16, %15 : vector<8x32xf32>
    %18 = arith.divf %16, %17 : vector<8x32xf32>
    %19 = vector.extract_strided_slice %12 {offsets = [0, 32], sizes = [8, 32], strides = [1, 1]} : vector<8x128xf32> to vector<8x32xf32>
    %20 = arith.negf %19 : vector<8x32xf32>
    %21 = math.exp %20 : vector<8x32xf32>
    %cst_13 = arith.constant 1.000000e+00 : f32
    %22 = vector.broadcast %cst_13 : f32 to vector<8x32xf32>
    %23 = arith.addf %22, %21 : vector<8x32xf32>
    %24 = arith.divf %22, %23 : vector<8x32xf32>
    %25 = vector.extract_strided_slice %12 {offsets = [0, 64], sizes = [8, 32], strides = [1, 1]} : vector<8x128xf32> to vector<8x32xf32>
    %26 = arith.negf %25 : vector<8x32xf32>
    %27 = math.exp %26 : vector<8x32xf32>
    %cst_14 = arith.constant 1.000000e+00 : f32
    %28 = vector.broadcast %cst_14 : f32 to vector<8x32xf32>
    %29 = arith.addf %28, %27 : vector<8x32xf32>
    %30 = arith.divf %28, %29 : vector<8x32xf32>
    %31 = vector.extract_strided_slice %12 {offsets = [0, 96], sizes = [8, 32], strides = [1, 1]} : vector<8x128xf32> to vector<8x32xf32>
    %32 = math.tanh %31 : vector<8x32xf32>
    %33 = arith.mulf %24, %9 : vector<8x32xf32>
    %34 = arith.mulf %18, %32 : vector<8x32xf32>
    %35 = arith.addf %33, %34 : vector<8x32xf32>
    %36 = math.tanh %35 : vector<8x32xf32>
    %37 = arith.mulf %30, %36 : vector<8x32xf32>
    %38 = arith.addf %37, %7 : vector<8x32xf32>
    %c0_15 = arith.constant 0 : index
    %c0_16 = arith.constant 0 : index
    %39 = vector.load %arg8[%c0_15, %c0_16] : memref<8x32xf32, #tpu.memory_space<vmem>>, vector<8x32xf32>
    tpu.vector_store %arg8[%c0_15, %c0_16], %38 {strides = array<i32>} : memref<8x32xf32, #tpu.memory_space<vmem>>, vector<8x32xf32>,
    %c0_17 = arith.constant 0 : index
    %c0_18 = arith.constant 0 : index
    %40 = vector.load %arg9[%c0_17, %c0_18] : memref<8x32xf32, #tpu.memory_space<vmem>>, vector<8x32xf32>
    tpu.vector_store %arg9[%c0_17, %c0_18], %35 {strides = array<i32>} : memref<8x32xf32, #tpu.memory_space<vmem>>, vector<8x32xf32>,
    %c0_19 = arith.constant 0 : index
    %c0_20 = arith.constant 0 : index
    %c0_21 = arith.constant 0 : index
    %41 = vector.load %arg5[%c0_19, %c0_20, %c0_21] : memref<8x8x32xf32, #tpu.memory_space<vmem>>, vector<8x1x32xf32>
    %42 = vector.shape_cast %41 : vector<8x1x32xf32> to vector<8x32xf32>
    %43 = vector.shape_cast %38 : vector<8x32xf32> to vector<8x1x32xf32>
    tpu.vector_store %arg5[%c0_19, %c0_20, %c0_21], %43 {strides = array<i32>} : memref<8x8x32xf32, #tpu.memory_space<vmem>>, vector<8x1x32xf32>,
    %c0_22 = arith.constant 0 : index
    %c1 = arith.constant 1 : index
    %c0_23 = arith.constant 0 : index
    %44 = vector.load %arg2[%c0_22, %c1, %c0_23] : memref<8x8x128xf32, #tpu.memory_space<vmem>>, vector<8x1x128xf32>
    %45 = vector.shape_cast %44 : vector<8x1x128xf32> to vector<8x128xf32>
    %c0_24 = arith.constant 0 : index
    %c1_25 = arith.constant 1 : index
    %c0_26 = arith.constant 0 : index
    %46 = vector.load %arg3[%c0_24, %c1_25, %c0_26] : memref<8x8x32xf32, #tpu.memory_space<vmem>>, vector<8x1x32xf32>
    %47 = vector.shape_cast %46 : vector<8x1x32xf32> to vector<8x32xf32>
    %c0_27 = arith.constant 0 : index
    %c0_28 = arith.constant 0 : index
    %48 = vector.load %arg8[%c0_27, %c0_28] : memref<8x32xf32, #tpu.memory_space<vmem>>, vector<8x32xf32>
    %c0_29 = arith.constant 0 : index
    %c0_30 = arith.constant 0 : index
    %49 = vector.load %arg9[%c0_29, %c0_30] : memref<8x32xf32, #tpu.memory_space<vmem>>, vector<8x32xf32>
    %50 = arith.truncf %48 : vector<8x32xf32> to vector<8x32xbf16>
    %cst_31 = arith.constant dense<0.000000e+00> : vector<8x128xf32>
    %51 = tpu.matmul %50, %3, %cst_31 {dimension_numbers = #tpu.dot_dimension_numbers<[1], [0], [0], [1], [0, 0, 1, 1], [], []>} : vector<8x32xbf16>, vector<32x128xbf16>, vector<8x128xf32> -> vector<8x128xf32>
    %52 = arith.addf %45, %51 : vector<8x128xf32>
    %53 = vector.extract_strided_slice %52 {offsets = [0, 0], sizes = [8, 32], strides = [1, 1]} : vector<8x128xf32> to vector<8x32xf32>
    %54 = arith.negf %53 : vector<8x32xf32>
    %55 = math.exp %54 : vector<8x32xf32>
    %cst_32 = arith.constant 1.000000e+00 : f32
    %56 = vector.broadcast %cst_32 : f32 to vector<8x32xf32>
    %57 = arith.addf %56, %55 : vector<8x32xf32>
    %58 = arith.divf %56, %57 : vector<8x32xf32>
    %59 = vector.extract_strided_slice %52 {offsets = [0, 32], sizes = [8, 32], strides = [1, 1]} : vector<8x128xf32> to vector<8x32xf32>
    %60 = arith.negf %59 : vector<8x32xf32>
    %61 = math.exp %60 : vector<8x32xf32>
    %cst_33 = arith.constant 1.000000e+00 : f32
    %62 = vector.broadcast %cst_33 : f32 to vector<8x32xf32>
    %63 = arith.addf %62, %61 : vector<8x32xf32>
    %64 = arith.divf %62, %63 : vector<8x32xf32>
    %65 = vector.extract_strided_slice %52 {offsets = [0, 64], sizes = [8, 32], strides = [1, 1]} : vector<8x128xf32> to vector<8x32xf32>
    %66 = arith.negf %65 : vector<8x32xf32>
    %67 = math.exp %66 : vector<8x32xf32>
    %cst_34 = arith.constant 1.000000e+00 : f32
    %68 = vector.broadcast %cst_34 : f32 to vector<8x32xf32>
    %69 = arith.addf %68, %67 : vector<8x32xf32>
    %70 = arith.divf %68, %69 : vector<8x32xf32>
    %71 = vector.extract_strided_slice %52 {offsets = [0, 96], sizes = [8, 32], strides = [1, 1]} : vector<8x128xf32> to vector<8x32xf32>
    %72 = math.tanh %71 : vector<8x32xf32>
    %73 = arith.mulf %64, %49 : vector<8x32xf32>
    %74 = arith.mulf %58, %72 : vector<8x32xf32>
    %75 = arith.addf %73, %74 : vector<8x32xf32>
    %76 = math.tanh %75 : vector<8x32xf32>
    %77 = arith.mulf %70, %76 : vector<8x32xf32>
    %78 = arith.addf %77, %47 : vector<8x32xf32>
    %c0_35 = arith.constant 0 : index
    %c0_36 = arith.constant 0 : index
    %79 = vector.load %arg8[%c0_35, %c0_36] : memref<8x32xf32, #tpu.memory_space<vmem>>, vector<8x32xf32>
    tpu.vector_store %arg8[%c0_35, %c0_36], %78 {strides = array<i32>} : memref<8x32xf32, #tpu.memory_space<vmem>>, vector<8x32xf32>,
    %c0_37 = arith.constant 0 : index
    %c0_38 = arith.constant 0 : index
    %80 = vector.load %arg9[%c0_37, %c0_38] : memref<8x32xf32, #tpu.memory_space<vmem>>, vector<8x32xf32>
    tpu.vector_store %arg9[%c0_37, %c0_38], %75 {strides = array<i32>} : memref<8x32xf32, #tpu.memory_space<vmem>>, vector<8x32xf32>,
    %c0_39 = arith.constant 0 : index
    %c1_40 = arith.constant 1 : index
    %c0_41 = arith.constant 0 : index
    %81 = vector.load %arg5[%c0_39, %c1_40, %c0_41] : memref<8x8x32xf32, #tpu.memory_space<vmem>>, vector<8x1x32xf32>
    %82 = vector.shape_cast %81 : vector<8x1x32xf32> to vector<8x32xf32>
    %83 = vector.shape_cast %78 : vector<8x32xf32> to vector<8x1x32xf32>
    tpu.vector_store %arg5[%c0_39, %c1_40, %c0_41], %83 {strides = array<i32>} : memref<8x8x32xf32, #tpu.memory_space<vmem>>, vector<8x1x32xf32>,
    %c0_42 = arith.constant 0 : index
    %c2 = arith.constant 2 : index
    %c0_43 = arith.constant 0 : index
    %84 = vector.load %arg2[%c0_42, %c2, %c0_43] : memref<8x8x128xf32, #tpu.memory_space<vmem>>, vector<8x1x128xf32>
    %85 = vector.shape_cast %84 : vector<8x1x128xf32> to vector<8x128xf32>
    %c0_44 = arith.constant 0 : index
    %c2_45 = arith.constant 2 : index
    %c0_46 = arith.constant 0 : index
    %86 = vector.load %arg3[%c0_44, %c2_45, %c0_46] : memref<8x8x32xf32, #tpu.memory_space<vmem>>, vector<8x1x32xf32>
    %87 = vector.shape_cast %86 : vector<8x1x32xf32> to vector<8x32xf32>
    %c0_47 = arith.constant 0 : index
    %c0_48 = arith.constant 0 : index
    %88 = vector.load %arg8[%c0_47, %c0_48] : memref<8x32xf32, #tpu.memory_space<vmem>>, vector<8x32xf32>
    %c0_49 = arith.constant 0 : index
    %c0_50 = arith.constant 0 : index
    %89 = vector.load %arg9[%c0_49, %c0_50] : memref<8x32xf32, #tpu.memory_space<vmem>>, vector<8x32xf32>
    %90 = arith.truncf %88 : vector<8x32xf32> to vector<8x32xbf16>
    %cst_51 = arith.constant dense<0.000000e+00> : vector<8x128xf32>
    %91 = tpu.matmul %90, %3, %cst_51 {dimension_numbers = #tpu.dot_dimension_numbers<[1], [0], [0], [1], [0, 0, 1, 1], [], []>} : vector<8x32xbf16>, vector<32x128xbf16>, vector<8x128xf32> -> vector<8x128xf32>
    %92 = arith.addf %85, %91 : vector<8x128xf32>
    %93 = vector.extract_strided_slice %92 {offsets = [0, 0], sizes = [8, 32], strides = [1, 1]} : vector<8x128xf32> to vector<8x32xf32>
    %94 = arith.negf %93 : vector<8x32xf32>
    %95 = math.exp %94 : vector<8x32xf32>
    %cst_52 = arith.constant 1.000000e+00 : f32
    %96 = vector.broadcast %cst_52 : f32 to vector<8x32xf32>
    %97 = arith.addf %96, %95 : vector<8x32xf32>
    %98 = arith.divf %96, %97 : vector<8x32xf32>
    %99 = vector.extract_strided_slice %92 {offsets = [0, 32], sizes = [8, 32], strides = [1, 1]} : vector<8x128xf32> to vector<8x32xf32>
    %100 = arith.negf %99 : vector<8x32xf32>
    %101 = math.exp %100 : vector<8x32xf32>
    %cst_53 = arith.constant 1.000000e+00 : f32
    %102 = vector.broadcast %cst_53 : f32 to vector<8x32xf32>
    %103 = arith.addf %102, %101 : vector<8x32xf32>
    %104 = arith.divf %102, %103 : vector<8x32xf32>
    %105 = vector.extract_strided_slice %92 {offsets = [0, 64], sizes = [8, 32], strides = [1, 1]} : vector<8x128xf32> to vector<8x32xf32>
    %106 = arith.negf %105 : vector<8x32xf32>
    %107 = math.exp %106 : vector<8x32xf32>
    %cst_54 = arith.constant 1.000000e+00 : f32
    %108 = vector.broadcast %cst_54 : f32 to vector<8x32xf32>
    %109 = arith.addf %108, %107 : vector<8x32xf32>
    %110 = arith.divf %108, %109 : vector<8x32xf32>
    %111 = vector.extract_strided_slice %92 {offsets = [0, 96], sizes = [8, 32], strides = [1, 1]} : vector<8x128xf32> to vector<8x32xf32>
    %112 = math.tanh %111 : vector<8x32xf32>
    %113 = arith.mulf %104, %89 : vector<8x32xf32>
    %114 = arith.mulf %98, %112 : vector<8x32xf32>
    %115 = arith.addf %113, %114 : vector<8x32xf32>
    %116 = math.tanh %115 : vector<8x32xf32>
    %117 = arith.mulf %110, %116 : vector<8x32xf32>
    %118 = arith.addf %117, %87 : vector<8x32xf32>
    %c0_55 = arith.constant 0 : index
    %c0_56 = arith.constant 0 : index
    %119 = vector.load %arg8[%c0_55, %c0_56] : memref<8x32xf32, #tpu.memory_space<vmem>>, vector<8x32xf32>
    tpu.vector_store %arg8[%c0_55, %c0_56], %118 {strides = array<i32>} : memref<8x32xf32, #tpu.memory_space<vmem>>, vector<8x32xf32>,
    %c0_57 = arith.constant 0 : index
    %c0_58 = arith.constant 0 : index
    %120 = vector.load %arg9[%c0_57, %c0_58] : memref<8x32xf32, #tpu.memory_space<vmem>>, vector<8x32xf32>
    tpu.vector_store %arg9[%c0_57, %c0_58], %115 {strides = array<i32>} : memref<8x32xf32, #tpu.memory_space<vmem>>, vector<8x32xf32>,
    %c0_59 = arith.constant 0 : index
    %c2_60 = arith.constant 2 : index
    %c0_61 = arith.constant 0 : index
    %121 = vector.load %arg5[%c0_59, %c2_60, %c0_61] : memref<8x8x32xf32, #tpu.memory_space<vmem>>, vector<8x1x32xf32>
    %122 = vector.shape_cast %121 : vector<8x1x32xf32> to vector<8x32xf32>
    %123 = vector.shape_cast %118 : vector<8x32xf32> to vector<8x1x32xf32>
    tpu.vector_store %arg5[%c0_59, %c2_60, %c0_61], %123 {strides = array<i32>} : memref<8x8x32xf32, #tpu.memory_space<vmem>>, vector<8x1x32xf32>,
    %c0_62 = arith.constant 0 : index
    %c3 = arith.constant 3 : index
    %c0_63 = arith.constant 0 : index
    %124 = vector.load %arg2[%c0_62, %c3, %c0_63] : memref<8x8x128xf32, #tpu.memory_space<vmem>>, vector<8x1x128xf32>
    %125 = vector.shape_cast %124 : vector<8x1x128xf32> to vector<8x128xf32>
    %c0_64 = arith.constant 0 : index
    %c3_65 = arith.constant 3 : index
    %c0_66 = arith.constant 0 : index
    %126 = vector.load %arg3[%c0_64, %c3_65, %c0_66] : memref<8x8x32xf32, #tpu.memory_space<vmem>>, vector<8x1x32xf32>
    %127 = vector.shape_cast %126 : vector<8x1x32xf32> to vector<8x32xf32>
    %c0_67 = arith.constant 0 : index
    %c0_68 = arith.constant 0 : index
    %128 = vector.load %arg8[%c0_67, %c0_68] : memref<8x32xf32, #tpu.memory_space<vmem>>, vector<8x32xf32>
    %c0_69 = arith.constant 0 : index
    %c0_70 = arith.constant 0 : index
    %129 = vector.load %arg9[%c0_69, %c0_70] : memref<8x32xf32, #tpu.memory_space<vmem>>, vector<8x32xf32>
    %130 = arith.truncf %128 : vector<8x32xf32> to vector<8x32xbf16>
    %cst_71 = arith.constant dense<0.000000e+00> : vector<8x128xf32>
    %131 = tpu.matmul %130, %3, %cst_71 {dimension_numbers = #tpu.dot_dimension_numbers<[1], [0], [0], [1], [0, 0, 1, 1], [], []>} : vector<8x32xbf16>, vector<32x128xbf16>, vector<8x128xf32> -> vector<8x128xf32>
    %132 = arith.addf %125, %131 : vector<8x128xf32>
    %133 = vector.extract_strided_slice %132 {offsets = [0, 0], sizes = [8, 32], strides = [1, 1]} : vector<8x128xf32> to vector<8x32xf32>
    %134 = arith.negf %133 : vector<8x32xf32>
    %135 = math.exp %134 : vector<8x32xf32>
    %cst_72 = arith.constant 1.000000e+00 : f32
    %136 = vector.broadcast %cst_72 : f32 to vector<8x32xf32>
    %137 = arith.addf %136, %135 : vector<8x32xf32>
    %138 = arith.divf %136, %137 : vector<8x32xf32>
    %139 = vector.extract_strided_slice %132 {offsets = [0, 32], sizes = [8, 32], strides = [1, 1]} : vector<8x128xf32> to vector<8x32xf32>
    %140 = arith.negf %139 : vector<8x32xf32>
    %141 = math.exp %140 : vector<8x32xf32>
    %cst_73 = arith.constant 1.000000e+00 : f32
    %142 = vector.broadcast %cst_73 : f32 to vector<8x32xf32>
    %143 = arith.addf %142, %141 : vector<8x32xf32>
    %144 = arith.divf %142, %143 : vector<8x32xf32>
    %145 = vector.extract_strided_slice %132 {offsets = [0, 64], sizes = [8, 32], strides = [1, 1]} : vector<8x128xf32> to vector<8x32xf32>
    %146 = arith.negf %145 : vector<8x32xf32>
    %147 = math.exp %146 : vector<8x32xf32>
    %cst_74 = arith.constant 1.000000e+00 : f32
    %148 = vector.broadcast %cst_74 : f32 to vector<8x32xf32>
    %149 = arith.addf %148, %147 : vector<8x32xf32>
    %150 = arith.divf %148, %149 : vector<8x32xf32>
    %151 = vector.extract_strided_slice %132 {offsets = [0, 96], sizes = [8, 32], strides = [1, 1]} : vector<8x128xf32> to vector<8x32xf32>
    %152 = math.tanh %151 : vector<8x32xf32>
    %153 = arith.mulf %144, %129 : vector<8x32xf32>
    %154 = arith.mulf %138, %152 : vector<8x32xf32>
    %155 = arith.addf %153, %154 : vector<8x32xf32>
    %156 = math.tanh %155 : vector<8x32xf32>
    %157 = arith.mulf %150, %156 : vector<8x32xf32>
    %158 = arith.addf %157, %127 : vector<8x32xf32>
    %c0_75 = arith.constant 0 : index
    %c0_76 = arith.constant 0 : index
    %159 = vector.load %arg8[%c0_75, %c0_76] : memref<8x32xf32, #tpu.memory_space<vmem>>, vector<8x32xf32>
    tpu.vector_store %arg8[%c0_75, %c0_76], %158 {strides = array<i32>} : memref<8x32xf32, #tpu.memory_space<vmem>>, vector<8x32xf32>,
    %c0_77 = arith.constant 0 : index
    %c0_78 = arith.constant 0 : index
    %160 = vector.load %arg9[%c0_77, %c0_78] : memref<8x32xf32, #tpu.memory_space<vmem>>, vector<8x32xf32>
    tpu.vector_store %arg9[%c0_77, %c0_78], %155 {strides = array<i32>} : memref<8x32xf32, #tpu.memory_space<vmem>>, vector<8x32xf32>,
    %c0_79 = arith.constant 0 : index
    %c3_80 = arith.constant 3 : index
    %c0_81 = arith.constant 0 : index
    %161 = vector.load %arg5[%c0_79, %c3_80, %c0_81] : memref<8x8x32xf32, #tpu.memory_space<vmem>>, vector<8x1x32xf32>
    %162 = vector.shape_cast %161 : vector<8x1x32xf32> to vector<8x32xf32>
    %163 = vector.shape_cast %158 : vector<8x32xf32> to vector<8x1x32xf32>
    tpu.vector_store %arg5[%c0_79, %c3_80, %c0_81], %163 {strides = array<i32>} : memref<8x8x32xf32, #tpu.memory_space<vmem>>, vector<8x1x32xf32>,
    %c0_82 = arith.constant 0 : index
    %c4 = arith.constant 4 : index
    %c0_83 = arith.constant 0 : index
    %164 = vector.load %arg2[%c0_82, %c4, %c0_83] : memref<8x8x128xf32, #tpu.memory_space<vmem>>, vector<8x1x128xf32>
    %165 = vector.shape_cast %164 : vector<8x1x128xf32> to vector<8x128xf32>
    %c0_84 = arith.constant 0 : index
    %c4_85 = arith.constant 4 : index
    %c0_86 = arith.constant 0 : index
    %166 = vector.load %arg3[%c0_84, %c4_85, %c0_86] : memref<8x8x32xf32, #tpu.memory_space<vmem>>, vector<8x1x32xf32>
    %167 = vector.shape_cast %166 : vector<8x1x32xf32> to vector<8x32xf32>
    %c0_87 = arith.constant 0 : index
    %c0_88 = arith.constant 0 : index
    %168 = vector.load %arg8[%c0_87, %c0_88] : memref<8x32xf32, #tpu.memory_space<vmem>>, vector<8x32xf32>
    %c0_89 = arith.constant 0 : index
    %c0_90 = arith.constant 0 : index
    %169 = vector.load %arg9[%c0_89, %c0_90] : memref<8x32xf32, #tpu.memory_space<vmem>>, vector<8x32xf32>
    %170 = arith.truncf %168 : vector<8x32xf32> to vector<8x32xbf16>
    %cst_91 = arith.constant dense<0.000000e+00> : vector<8x128xf32>
    %171 = tpu.matmul %170, %3, %cst_91 {dimension_numbers = #tpu.dot_dimension_numbers<[1], [0], [0], [1], [0, 0, 1, 1], [], []>} : vector<8x32xbf16>, vector<32x128xbf16>, vector<8x128xf32> -> vector<8x128xf32>
    %172 = arith.addf %165, %171 : vector<8x128xf32>
    %173 = vector.extract_strided_slice %172 {offsets = [0, 0], sizes = [8, 32], strides = [1, 1]} : vector<8x128xf32> to vector<8x32xf32>
    %174 = arith.negf %173 : vector<8x32xf32>
    %175 = math.exp %174 : vector<8x32xf32>
    %cst_92 = arith.constant 1.000000e+00 : f32
    %176 = vector.broadcast %cst_92 : f32 to vector<8x32xf32>
    %177 = arith.addf %176, %175 : vector<8x32xf32>
    %178 = arith.divf %176, %177 : vector<8x32xf32>
    %179 = vector.extract_strided_slice %172 {offsets = [0, 32], sizes = [8, 32], strides = [1, 1]} : vector<8x128xf32> to vector<8x32xf32>
    %180 = arith.negf %179 : vector<8x32xf32>
    %181 = math.exp %180 : vector<8x32xf32>
    %cst_93 = arith.constant 1.000000e+00 : f32
    %182 = vector.broadcast %cst_93 : f32 to vector<8x32xf32>
    %183 = arith.addf %182, %181 : vector<8x32xf32>
    %184 = arith.divf %182, %183 : vector<8x32xf32>
    %185 = vector.extract_strided_slice %172 {offsets = [0, 64], sizes = [8, 32], strides = [1, 1]} : vector<8x128xf32> to vector<8x32xf32>
    %186 = arith.negf %185 : vector<8x32xf32>
    %187 = math.exp %186 : vector<8x32xf32>
    %cst_94 = arith.constant 1.000000e+00 : f32
    %188 = vector.broadcast %cst_94 : f32 to vector<8x32xf32>
    %189 = arith.addf %188, %187 : vector<8x32xf32>
    %190 = arith.divf %188, %189 : vector<8x32xf32>
    %191 = vector.extract_strided_slice %172 {offsets = [0, 96], sizes = [8, 32], strides = [1, 1]} : vector<8x128xf32> to vector<8x32xf32>
    %192 = math.tanh %191 : vector<8x32xf32>
    %193 = arith.mulf %184, %169 : vector<8x32xf32>
    %194 = arith.mulf %178, %192 : vector<8x32xf32>
    %195 = arith.addf %193, %194 : vector<8x32xf32>
    %196 = math.tanh %195 : vector<8x32xf32>
    %197 = arith.mulf %190, %196 : vector<8x32xf32>
    %198 = arith.addf %197, %167 : vector<8x32xf32>
    %c0_95 = arith.constant 0 : index
    %c0_96 = arith.constant 0 : index
    %199 = vector.load %arg8[%c0_95, %c0_96] : memref<8x32xf32, #tpu.memory_space<vmem>>, vector<8x32xf32>
    tpu.vector_store %arg8[%c0_95, %c0_96], %198 {strides = array<i32>} : memref<8x32xf32, #tpu.memory_space<vmem>>, vector<8x32xf32>,
    %c0_97 = arith.constant 0 : index
    %c0_98 = arith.constant 0 : index
    %200 = vector.load %arg9[%c0_97, %c0_98] : memref<8x32xf32, #tpu.memory_space<vmem>>, vector<8x32xf32>
    tpu.vector_store %arg9[%c0_97, %c0_98], %195 {strides = array<i32>} : memref<8x32xf32, #tpu.memory_space<vmem>>, vector<8x32xf32>,
    %c0_99 = arith.constant 0 : index
    %c4_100 = arith.constant 4 : index
    %c0_101 = arith.constant 0 : index
    %201 = vector.load %arg5[%c0_99, %c4_100, %c0_101] : memref<8x8x32xf32, #tpu.memory_space<vmem>>, vector<8x1x32xf32>
    %202 = vector.shape_cast %201 : vector<8x1x32xf32> to vector<8x32xf32>
    %203 = vector.shape_cast %198 : vector<8x32xf32> to vector<8x1x32xf32>
    tpu.vector_store %arg5[%c0_99, %c4_100, %c0_101], %203 {strides = array<i32>} : memref<8x8x32xf32, #tpu.memory_space<vmem>>, vector<8x1x32xf32>,
    %c0_102 = arith.constant 0 : index
    %c5 = arith.constant 5 : index
    %c0_103 = arith.constant 0 : index
    %204 = vector.load %arg2[%c0_102, %c5, %c0_103] : memref<8x8x128xf32, #tpu.memory_space<vmem>>, vector<8x1x128xf32>
    %205 = vector.shape_cast %204 : vector<8x1x128xf32> to vector<8x128xf32>
    %c0_104 = arith.constant 0 : index
    %c5_105 = arith.constant 5 : index
    %c0_106 = arith.constant 0 : index
    %206 = vector.load %arg3[%c0_104, %c5_105, %c0_106] : memref<8x8x32xf32, #tpu.memory_space<vmem>>, vector<8x1x32xf32>
    %207 = vector.shape_cast %206 : vector<8x1x32xf32> to vector<8x32xf32>
    %c0_107 = arith.constant 0 : index
    %c0_108 = arith.constant 0 : index
    %208 = vector.load %arg8[%c0_107, %c0_108] : memref<8x32xf32, #tpu.memory_space<vmem>>, vector<8x32xf32>
    %c0_109 = arith.constant 0 : index
    %c0_110 = arith.constant 0 : index
    %209 = vector.load %arg9[%c0_109, %c0_110] : memref<8x32xf32, #tpu.memory_space<vmem>>, vector<8x32xf32>
    %210 = arith.truncf %208 : vector<8x32xf32> to vector<8x32xbf16>
    %cst_111 = arith.constant dense<0.000000e+00> : vector<8x128xf32>
    %211 = tpu.matmul %210, %3, %cst_111 {dimension_numbers = #tpu.dot_dimension_numbers<[1], [0], [0], [1], [0, 0, 1, 1], [], []>} : vector<8x32xbf16>, vector<32x128xbf16>, vector<8x128xf32> -> vector<8x128xf32>
    %212 = arith.addf %205, %211 : vector<8x128xf32>
    %213 = vector.extract_strided_slice %212 {offsets = [0, 0], sizes = [8, 32], strides = [1, 1]} : vector<8x128xf32> to vector<8x32xf32>
    %214 = arith.negf %213 : vector<8x32xf32>
    %215 = math.exp %214 : vector<8x32xf32>
    %cst_112 = arith.constant 1.000000e+00 : f32
    %216 = vector.broadcast %cst_112 : f32 to vector<8x32xf32>
    %217 = arith.addf %216, %215 : vector<8x32xf32>
    %218 = arith.divf %216, %217 : vector<8x32xf32>
    %219 = vector.extract_strided_slice %212 {offsets = [0, 32], sizes = [8, 32], strides = [1, 1]} : vector<8x128xf32> to vector<8x32xf32>
    %220 = arith.negf %219 : vector<8x32xf32>
    %221 = math.exp %220 : vector<8x32xf32>
    %cst_113 = arith.constant 1.000000e+00 : f32
    %222 = vector.broadcast %cst_113 : f32 to vector<8x32xf32>
    %223 = arith.addf %222, %221 : vector<8x32xf32>
    %224 = arith.divf %222, %223 : vector<8x32xf32>
    %225 = vector.extract_strided_slice %212 {offsets = [0, 64], sizes = [8, 32], strides = [1, 1]} : vector<8x128xf32> to vector<8x32xf32>
    %226 = arith.negf %225 : vector<8x32xf32>
    %227 = math.exp %226 : vector<8x32xf32>
    %cst_114 = arith.constant 1.000000e+00 : f32
    %228 = vector.broadcast %cst_114 : f32 to vector<8x32xf32>
    %229 = arith.addf %228, %227 : vector<8x32xf32>
    %230 = arith.divf %228, %229 : vector<8x32xf32>
    %231 = vector.extract_strided_slice %212 {offsets = [0, 96], sizes = [8, 32], strides = [1, 1]} : vector<8x128xf32> to vector<8x32xf32>
    %232 = math.tanh %231 : vector<8x32xf32>
    %233 = arith.mulf %224, %209 : vector<8x32xf32>
    %234 = arith.mulf %218, %232 : vector<8x32xf32>
    %235 = arith.addf %233, %234 : vector<8x32xf32>
    %236 = math.tanh %235 : vector<8x32xf32>
    %237 = arith.mulf %230, %236 : vector<8x32xf32>
    %238 = arith.addf %237, %207 : vector<8x32xf32>
    %c0_115 = arith.constant 0 : index
    %c0_116 = arith.constant 0 : index
    %239 = vector.load %arg8[%c0_115, %c0_116] : memref<8x32xf32, #tpu.memory_space<vmem>>, vector<8x32xf32>
    tpu.vector_store %arg8[%c0_115, %c0_116], %238 {strides = array<i32>} : memref<8x32xf32, #tpu.memory_space<vmem>>, vector<8x32xf32>,
    %c0_117 = arith.constant 0 : index
    %c0_118 = arith.constant 0 : index
    %240 = vector.load %arg9[%c0_117, %c0_118] : memref<8x32xf32, #tpu.memory_space<vmem>>, vector<8x32xf32>
    tpu.vector_store %arg9[%c0_117, %c0_118], %235 {strides = array<i32>} : memref<8x32xf32, #tpu.memory_space<vmem>>, vector<8x32xf32>,
    %c0_119 = arith.constant 0 : index
    %c5_120 = arith.constant 5 : index
    %c0_121 = arith.constant 0 : index
    %241 = vector.load %arg5[%c0_119, %c5_120, %c0_121] : memref<8x8x32xf32, #tpu.memory_space<vmem>>, vector<8x1x32xf32>
    %242 = vector.shape_cast %241 : vector<8x1x32xf32> to vector<8x32xf32>
    %243 = vector.shape_cast %238 : vector<8x32xf32> to vector<8x1x32xf32>
    tpu.vector_store %arg5[%c0_119, %c5_120, %c0_121], %243 {strides = array<i32>} : memref<8x8x32xf32, #tpu.memory_space<vmem>>, vector<8x1x32xf32>,
    %c0_122 = arith.constant 0 : index
    %c6 = arith.constant 6 : index
    %c0_123 = arith.constant 0 : index
    %244 = vector.load %arg2[%c0_122, %c6, %c0_123] : memref<8x8x128xf32, #tpu.memory_space<vmem>>, vector<8x1x128xf32>
    %245 = vector.shape_cast %244 : vector<8x1x128xf32> to vector<8x128xf32>
    %c0_124 = arith.constant 0 : index
    %c6_125 = arith.constant 6 : index
    %c0_126 = arith.constant 0 : index
    %246 = vector.load %arg3[%c0_124, %c6_125, %c0_126] : memref<8x8x32xf32, #tpu.memory_space<vmem>>, vector<8x1x32xf32>
    %247 = vector.shape_cast %246 : vector<8x1x32xf32> to vector<8x32xf32>
    %c0_127 = arith.constant 0 : index
    %c0_128 = arith.constant 0 : index
    %248 = vector.load %arg8[%c0_127, %c0_128] : memref<8x32xf32, #tpu.memory_space<vmem>>, vector<8x32xf32>
    %c0_129 = arith.constant 0 : index
    %c0_130 = arith.constant 0 : index
    %249 = vector.load %arg9[%c0_129, %c0_130] : memref<8x32xf32, #tpu.memory_space<vmem>>, vector<8x32xf32>
    %250 = arith.truncf %248 : vector<8x32xf32> to vector<8x32xbf16>
    %cst_131 = arith.constant dense<0.000000e+00> : vector<8x128xf32>
    %251 = tpu.matmul %250, %3, %cst_131 {dimension_numbers = #tpu.dot_dimension_numbers<[1], [0], [0], [1], [0, 0, 1, 1], [], []>} : vector<8x32xbf16>, vector<32x128xbf16>, vector<8x128xf32> -> vector<8x128xf32>
    %252 = arith.addf %245, %251 : vector<8x128xf32>
    %253 = vector.extract_strided_slice %252 {offsets = [0, 0], sizes = [8, 32], strides = [1, 1]} : vector<8x128xf32> to vector<8x32xf32>
    %254 = arith.negf %253 : vector<8x32xf32>
    %255 = math.exp %254 : vector<8x32xf32>
    %cst_132 = arith.constant 1.000000e+00 : f32
    %256 = vector.broadcast %cst_132 : f32 to vector<8x32xf32>
    %257 = arith.addf %256, %255 : vector<8x32xf32>
    %258 = arith.divf %256, %257 : vector<8x32xf32>
    %259 = vector.extract_strided_slice %252 {offsets = [0, 32], sizes = [8, 32], strides = [1, 1]} : vector<8x128xf32> to vector<8x32xf32>
    %260 = arith.negf %259 : vector<8x32xf32>
    %261 = math.exp %260 : vector<8x32xf32>
    %cst_133 = arith.constant 1.000000e+00 : f32
    %262 = vector.broadcast %cst_133 : f32 to vector<8x32xf32>
    %263 = arith.addf %262, %261 : vector<8x32xf32>
    %264 = arith.divf %262, %263 : vector<8x32xf32>
    %265 = vector.extract_strided_slice %252 {offsets = [0, 64], sizes = [8, 32], strides = [1, 1]} : vector<8x128xf32> to vector<8x32xf32>
    %266 = arith.negf %265 : vector<8x32xf32>
    %267 = math.exp %266 : vector<8x32xf32>
    %cst_134 = arith.constant 1.000000e+00 : f32
    %268 = vector.broadcast %cst_134 : f32 to vector<8x32xf32>
    %269 = arith.addf %268, %267 : vector<8x32xf32>
    %270 = arith.divf %268, %269 : vector<8x32xf32>
    %271 = vector.extract_strided_slice %252 {offsets = [0, 96], sizes = [8, 32], strides = [1, 1]} : vector<8x128xf32> to vector<8x32xf32>
    %272 = math.tanh %271 : vector<8x32xf32>
    %273 = arith.mulf %264, %249 : vector<8x32xf32>
    %274 = arith.mulf %258, %272 : vector<8x32xf32>
    %275 = arith.addf %273, %274 : vector<8x32xf32>
    %276 = math.tanh %275 : vector<8x32xf32>
    %277 = arith.mulf %270, %276 : vector<8x32xf32>
    %278 = arith.addf %277, %247 : vector<8x32xf32>
    %c0_135 = arith.constant 0 : index
    %c0_136 = arith.constant 0 : index
    %279 = vector.load %arg8[%c0_135, %c0_136] : memref<8x32xf32, #tpu.memory_space<vmem>>, vector<8x32xf32>
    tpu.vector_store %arg8[%c0_135, %c0_136], %278 {strides = array<i32>} : memref<8x32xf32, #tpu.memory_space<vmem>>, vector<8x32xf32>,
    %c0_137 = arith.constant 0 : index
    %c0_138 = arith.constant 0 : index
    %280 = vector.load %arg9[%c0_137, %c0_138] : memref<8x32xf32, #tpu.memory_space<vmem>>, vector<8x32xf32>
    tpu.vector_store %arg9[%c0_137, %c0_138], %275 {strides = array<i32>} : memref<8x32xf32, #tpu.memory_space<vmem>>, vector<8x32xf32>,
    %c0_139 = arith.constant 0 : index
    %c6_140 = arith.constant 6 : index
    %c0_141 = arith.constant 0 : index
    %281 = vector.load %arg5[%c0_139, %c6_140, %c0_141] : memref<8x8x32xf32, #tpu.memory_space<vmem>>, vector<8x1x32xf32>
    %282 = vector.shape_cast %281 : vector<8x1x32xf32> to vector<8x32xf32>
    %283 = vector.shape_cast %278 : vector<8x32xf32> to vector<8x1x32xf32>
    tpu.vector_store %arg5[%c0_139, %c6_140, %c0_141], %283 {strides = array<i32>} : memref<8x8x32xf32, #tpu.memory_space<vmem>>, vector<8x1x32xf32>,
    %c0_142 = arith.constant 0 : index
    %c7 = arith.constant 7 : index
    %c0_143 = arith.constant 0 : index
    %284 = vector.load %arg2[%c0_142, %c7, %c0_143] : memref<8x8x128xf32, #tpu.memory_space<vmem>>, vector<8x1x128xf32>
    %285 = vector.shape_cast %284 : vector<8x1x128xf32> to vector<8x128xf32>
    %c0_144 = arith.constant 0 : index
    %c7_145 = arith.constant 7 : index
    %c0_146 = arith.constant 0 : index
    %286 = vector.load %arg3[%c0_144, %c7_145, %c0_146] : memref<8x8x32xf32, #tpu.memory_space<vmem>>, vector<8x1x32xf32>
    %287 = vector.shape_cast %286 : vector<8x1x32xf32> to vector<8x32xf32>
    %c0_147 = arith.constant 0 : index
    %c0_148 = arith.constant 0 : index
    %288 = vector.load %arg8[%c0_147, %c0_148] : memref<8x32xf32, #tpu.memory_space<vmem>>, vector<8x32xf32>
    %c0_149 = arith.constant 0 : index
    %c0_150 = arith.constant 0 : index
    %289 = vector.load %arg9[%c0_149, %c0_150] : memref<8x32xf32, #tpu.memory_space<vmem>>, vector<8x32xf32>
    %290 = arith.truncf %288 : vector<8x32xf32> to vector<8x32xbf16>
    %cst_151 = arith.constant dense<0.000000e+00> : vector<8x128xf32>
    %291 = tpu.matmul %290, %3, %cst_151 {dimension_numbers = #tpu.dot_dimension_numbers<[1], [0], [0], [1], [0, 0, 1, 1], [], []>} : vector<8x32xbf16>, vector<32x128xbf16>, vector<8x128xf32> -> vector<8x128xf32>
    %292 = arith.addf %285, %291 : vector<8x128xf32>
    %293 = vector.extract_strided_slice %292 {offsets = [0, 0], sizes = [8, 32], strides = [1, 1]} : vector<8x128xf32> to vector<8x32xf32>
    %294 = arith.negf %293 : vector<8x32xf32>
    %295 = math.exp %294 : vector<8x32xf32>
    %cst_152 = arith.constant 1.000000e+00 : f32
    %296 = vector.broadcast %cst_152 : f32 to vector<8x32xf32>
    %297 = arith.addf %296, %295 : vector<8x32xf32>
    %298 = arith.divf %296, %297 : vector<8x32xf32>
    %299 = vector.extract_strided_slice %292 {offsets = [0, 32], sizes = [8, 32], strides = [1, 1]} : vector<8x128xf32> to vector<8x32xf32>
    %300 = arith.negf %299 : vector<8x32xf32>
    %301 = math.exp %300 : vector<8x32xf32>
    %cst_153 = arith.constant 1.000000e+00 : f32
    %302 = vector.broadcast %cst_153 : f32 to vector<8x32xf32>
    %303 = arith.addf %302, %301 : vector<8x32xf32>
    %304 = arith.divf %302, %303 : vector<8x32xf32>
    %305 = vector.extract_strided_slice %292 {offsets = [0, 64], sizes = [8, 32], strides = [1, 1]} : vector<8x128xf32> to vector<8x32xf32>
    %306 = arith.negf %305 : vector<8x32xf32>
    %307 = math.exp %306 : vector<8x32xf32>
    %cst_154 = arith.constant 1.000000e+00 : f32
    %308 = vector.broadcast %cst_154 : f32 to vector<8x32xf32>
    %309 = arith.addf %308, %307 : vector<8x32xf32>
    %310 = arith.divf %308, %309 : vector<8x32xf32>
    %311 = vector.extract_strided_slice %292 {offsets = [0, 96], sizes = [8, 32], strides = [1, 1]} : vector<8x128xf32> to vector<8x32xf32>
    %312 = math.tanh %311 : vector<8x32xf32>
    %313 = arith.mulf %304, %289 : vector<8x32xf32>
    %314 = arith.mulf %298, %312 : vector<8x32xf32>
    %315 = arith.addf %313, %314 : vector<8x32xf32>
    %316 = math.tanh %315 : vector<8x32xf32>
    %317 = arith.mulf %310, %316 : vector<8x32xf32>
    %318 = arith.addf %317, %287 : vector<8x32xf32>
    %c0_155 = arith.constant 0 : index
    %c0_156 = arith.constant 0 : index
    %319 = vector.load %arg8[%c0_155, %c0_156] : memref<8x32xf32, #tpu.memory_space<vmem>>, vector<8x32xf32>
    tpu.vector_store %arg8[%c0_155, %c0_156], %318 {strides = array<i32>} : memref<8x32xf32, #tpu.memory_space<vmem>>, vector<8x32xf32>,
    %c0_157 = arith.constant 0 : index
    %c0_158 = arith.constant 0 : index
    %320 = vector.load %arg9[%c0_157, %c0_158] : memref<8x32xf32, #tpu.memory_space<vmem>>, vector<8x32xf32>
    tpu.vector_store %arg9[%c0_157, %c0_158], %315 {strides = array<i32>} : memref<8x32xf32, #tpu.memory_space<vmem>>, vector<8x32xf32>,
    %c0_159 = arith.constant 0 : index
    %c7_160 = arith.constant 7 : index
    %c0_161 = arith.constant 0 : index
    %321 = vector.load %arg5[%c0_159, %c7_160, %c0_161] : memref<8x8x32xf32, #tpu.memory_space<vmem>>, vector<8x1x32xf32>
    %322 = vector.shape_cast %321 : vector<8x1x32xf32> to vector<8x32xf32>
    %323 = vector.shape_cast %318 : vector<8x32xf32> to vector<8x1x32xf32>
    tpu.vector_store %arg5[%c0_159, %c7_160, %c0_161], %323 {strides = array<i32>} : memref<8x8x32xf32, #tpu.memory_space<vmem>>, vector<8x1x32xf32>,
    %c0_i32_162 = arith.constant 0 : i32
    %324 = arith.cmpi eq, %arg1, %c0_i32_162 : i32
    %325 = arith.extui %324 : i1 to i32
    %c0_i32_163 = arith.constant 0 : i32
    %326 = arith.cmpi ne, %325, %c0_i32_163 : i32
    scf.if %326 {
      %c0_164 = arith.constant 0 : index
      %c0_165 = arith.constant 0 : index
      %327 = vector.load %arg8[%c0_164, %c0_165] : memref<8x32xf32, #tpu.memory_space<vmem>>, vector<8x32xf32>
      %c0_166 = arith.constant 0 : index
      %c0_167 = arith.constant 0 : index
      %328 = vector.load %arg6[%c0_166, %c0_167] : memref<8x32xf32, #tpu.memory_space<vmem>>, vector<8x32xf32>
      tpu.vector_store %arg6[%c0_166, %c0_167], %327 {strides = array<i32>} : memref<8x32xf32, #tpu.memory_space<vmem>>, vector<8x32xf32>,
      %c0_168 = arith.constant 0 : index
      %c0_169 = arith.constant 0 : index
      %329 = vector.load %arg9[%c0_168, %c0_169] : memref<8x32xf32, #tpu.memory_space<vmem>>, vector<8x32xf32>
      %c0_170 = arith.constant 0 : index
      %c0_171 = arith.constant 0 : index
      %330 = vector.load %arg7[%c0_170, %c0_171] : memref<8x32xf32, #tpu.memory_space<vmem>>, vector<8x32xf32>
      tpu.vector_store %arg7[%c0_170, %c0_171], %329 {strides = array<i32>} : memref<8x32xf32, #tpu.memory_space<vmem>>, vector<8x32xf32>,
    } else {
    }
    return
  }
  func.func @transform_0(%arg0: i32, %arg1: i32) -> (i32, i32, i32) {
    %c0_i32 = arith.constant 0 : i32
    %c0_i32_0 = arith.constant 0 : i32
    return %arg0, %arg1, %c0_i32 : i32, i32, i32
  }
  func.func @transform_1(%arg0: i32, %arg1: i32) -> (i32, i32, i32) {
    %c0_i32 = arith.constant 0 : i32
    %c0_i32_0 = arith.constant 0 : i32
    return %arg0, %arg1, %c0_i32 : i32, i32, i32
  }
  func.func @transform_2(%arg0: i32, %arg1: i32) -> (i32, i32) {
    %c0_i32 = arith.constant 0 : i32
    %c0_i32_0 = arith.constant 0 : i32
    %c0_i32_1 = arith.constant 0 : i32
    return %c0_i32, %c0_i32_0 : i32, i32
  }
  func.func @transform_3(%arg0: i32, %arg1: i32) -> (i32, i32, i32) {
    %c0_i32 = arith.constant 0 : i32
    %c0_i32_0 = arith.constant 0 : i32
    return %arg0, %arg1, %c0_i32 : i32, i32, i32
  }
  func.func @transform_4(%arg0: i32, %arg1: i32) -> (i32, i32) {
    %c0_i32 = arith.constant 0 : i32
    %c0_i32_0 = arith.constant 0 : i32
    return %arg0, %c0_i32 : i32, i32
  }
  func.func @transform_5(%arg0: i32, %arg1: i32) -> (i32, i32) {
    %c0_i32 = arith.constant 0 : i32
    %c0_i32_0 = arith.constant 0 : i32
    return %arg0, %c0_i32 : i32, i32
  }
}

</mosaic_0001>

<bundles_post_ra>
// kernel: lstm_with_residual.4
= control target key start
LH: loop header
LB: loop body
LE: loop exit
PB: predicated region body
PF: predicated region fallthrough
CT: control target
= control target key end

     0   :  { %vm58_vm0 = vcmask 130048   ;;  %vm136_vm1 = vcmask 261120   ;;  %s251_s1 = inlined_call_operand.vmem [shape: bf16[16,32], index: 1, kind: input, shape index: {}]   ;;  %s252_s0 = inlined_call_operand.vmem [shape: bf16[64,16], index: 0, kind: input, shape index: {}]   ;;  %s253_s2 = inlined_call_operand.vmem [shape: f32[1,32], index: 2, kind: input, shape index: {}]   ;;  %s254_s3 = inlined_call_operand.vmem [shape: f32[64,32], index: 3, kind: output, shape index: {}]  }
   0x1   :  { %v176_v0 = vld [vmem:[%s251_s1] sm:$0xff]   ;;  %v178_v2 = vld [vmem:[%s252_s0 + $0x10] sm:$0xff]   ;;  %v179_v3 = vld [vmem:[%s252_s0 + $0x8] sm:$0xff]  }
   0x2   :  { %v177_v1 = vld [vmem:[%s252_s0] sm:$0xff]   ;;  %164 = vmatprep.subr.bf16.mxu0 %v176_v0  ;;  %174 = vmatprep.subr.bf16.mxu1 %v176_v0  ;;  %v180_v4 = vld [vmem:[%s252_s0 + $0x18] sm:$0xff]  }
   0x3   :  { %165 = vmatpush3.bf16.msra.mxu0 %v176_v0  ;;  %175 = vmatpush3.bf16.msra.mxu1 %v176_v0  ;;  %v149_v5 = vld [vmem:[%s253_s2] ss:$0 sm:$0xff] }
   0x4   :  { %166 = vmatprep.mubr.msk.bf16.mxu0 %vm58_vm0, %v177_v1  ;;  %170 = vmatprep.mubr.msk.bf16.mxu1 %vm58_vm0, %v178_v2 }
   0x6   :  { %167 = vmatmul.mubr.msk.bf16.vlgmr.msra.gmra.mrb[0].mxu0 %vm58_vm0, %v179_v3  ;;  %171 = vmatmul.mubr.msk.bf16.vlgmr.msra.gmra.mrb[0].mxu1 %vm58_vm0, %v180_v4 }
  0xd9   :  { %v168_v6 = vpop.f32.mrb[0].mxu0  ;;  %v172_v7 = vpop.f32.mrb[0].mxu1 }
  0xda   :  { %v114_v8 = vadd.f32 %v168_v6, %v149_v5  ;;  %v130_v9 = vadd.f32 %v172_v7, %v149_v5  ;;  %v105_v10 = vpop.f32.mrb[1].mxu0  ;;  %v121_v11 = vpop.f32.mrb[1].mxu1 }
  0xdb   :  { %v106_v12 = vadd.f32 %v149_v5, %v105_v10  ;;  %v122_v13 = vadd.f32 %v149_v5, %v121_v11  ;;  %v169_v14 = vpop.f32.mrb[2].mxu0  ;;  %v173_v15 = vpop.f32.mrb[2].mxu1 }
  0xdc   :  { %139 = vst.msk [vmem:[%s254_s3 + $0x10] sm:$0xff] %vm136_vm1, %v114_v8  ;;  %143 = vst.msk [vmem:[%s254_s3 + $0x30] sm:$0xff] %vm136_vm1, %v130_v9  ;;  %v117_v16 = vadd.f32 %v169_v14, %v149_v5  ;;  %v133_v17 = vadd.f32 %v173_v15, %v149_v5  ;;  %v108_v18 = vpop.f32.mrb[3].mxu0  ;;  %v124_v19 = vpop.f32.mrb[3].mxu1 }
  0xdd   :  { %137 = vst.msk [vmem:[%s254_s3] sm:$0xff] %vm136_vm1, %v106_v12  ;;  %141 = vst.msk [vmem:[%s254_s3 + $0x20] sm:$0xff] %vm136_vm1, %v122_v13  ;;  %v109_v20 = vadd.f32 %v149_v5, %v108_v18  ;;  %v125_v21 = vadd.f32 %v149_v5, %v124_v19 }
  0xde   :  { %140 = vst.msk [vmem:[%s254_s3 + $0x18] sm:$0xff] %vm136_vm1, %v117_v16  ;;  %144 = vst.msk [vmem:[%s254_s3 + $0x38] sm:$0xff] %vm136_vm1, %v133_v17 }
  0xdf   :  { %138 = vst.msk [vmem:[%s254_s3 + $0x8] sm:$0xff] %vm136_vm1, %v109_v20  ;;  %142 = vst.msk [vmem:[%s254_s3 + $0x28] sm:$0xff] %vm136_vm1, %v125_v21 }

// kernel: lstm_with_residual.3
= control target key start
LH: loop header
LB: loop body
LE: loop exit
PB: predicated region body
PF: predicated region fallthrough
CT: control target
= control target key end

     0   :  { %vm58_vm0 = vcmask 130048   ;;  %s242_s1 = inlined_call_operand.vmem [shape: bf16[16,128], index: 1, kind: input, shape index: {}]   ;;  %s243_s0 = inlined_call_operand.vmem [shape: bf16[64,16], index: 0, kind: input, shape index: {}]   ;;  %s244_s2 = inlined_call_operand.vmem [shape: f32[1,128], index: 2, kind: input, shape index: {}]   ;;  %s245_s3 = inlined_call_operand.vmem [shape: f32[64,128], index: 3, kind: output, shape index: {}]  }
   0x1   :  { %v175_v0 = vld [vmem:[%s242_s1] sm:$0xff]   ;;  %v177_v2 = vld [vmem:[%s243_s0 + $0x10] sm:$0xff]   ;;  %v178_v3 = vld [vmem:[%s243_s0 + $0x8] sm:$0xff]  }
   0x2   :  { %v176_v1 = vld [vmem:[%s243_s0] sm:$0xff]   ;;  %163 = vmatprep.subr.bf16.mxu0 %v175_v0  ;;  %173 = vmatprep.subr.bf16.mxu1 %v175_v0  ;;  %v179_v4 = vld [vmem:[%s243_s0 + $0x18] sm:$0xff]  }
   0x3   :  { %164 = vmatpush3.bf16.msra.mxu0 %v175_v0  ;;  %174 = vmatpush3.bf16.msra.mxu1 %v175_v0  ;;  %v148_v5 = vld [vmem:[%s244_s2] ss:$0 sm:$0xff] }
   0x4   :  { %165 = vmatprep.mubr.msk.bf16.mxu0 %vm58_vm0, %v176_v1  ;;  %169 = vmatprep.mubr.msk.bf16.mxu1 %vm58_vm0, %v177_v2 }
   0x6   :  { %166 = vmatmul.mubr.msk.bf16.vlgmr.msra.gmra.mrb[0].mxu0 %vm58_vm0, %v178_v3  ;;  %170 = vmatmul.mubr.msk.bf16.vlgmr.msra.gmra.mrb[0].mxu1 %vm58_vm0, %v179_v4 }
  0xd9   :  { %v167_v6 = vpop.f32.mrb[0].mxu0  ;;  %v171_v7 = vpop.f32.mrb[0].mxu1 }
  0xda   :  { %v114_v8 = vadd.f32 %v167_v6, %v148_v5  ;;  %v130_v9 = vadd.f32 %v171_v7, %v148_v5  ;;  %v105_v10 = vpop.f32.mrb[1].mxu0  ;;  %v121_v11 = vpop.f32.mrb[1].mxu1 }
  0xdb   :  { %v106_v12 = vadd.f32 %v148_v5, %v105_v10  ;;  %v122_v13 = vadd.f32 %v148_v5, %v121_v11  ;;  %v168_v14 = vpop.f32.mrb[2].mxu0  ;;  %v172_v15 = vpop.f32.mrb[2].mxu1 }
  0xdc   :  { %138 = vst [vmem:[%s245_s3 + $0x10] sm:$0xff] %v114_v8  ;;  %142 = vst [vmem:[%s245_s3 + $0x30] sm:$0xff] %v130_v9  ;;  %v117_v16 = vadd.f32 %v168_v14, %v148_v5  ;;  %v133_v17 = vadd.f32 %v172_v15, %v148_v5  ;;  %v108_v18 = vpop.f32.mrb[3].mxu0  ;;  %v124_v19 = vpop.f32.mrb[3].mxu1 }
  0xdd   :  { %136 = vst [vmem:[%s245_s3] sm:$0xff] %v106_v12  ;;  %140 = vst [vmem:[%s245_s3 + $0x20] sm:$0xff] %v122_v13  ;;  %v109_v20 = vadd.f32 %v148_v5, %v108_v18  ;;  %v125_v21 = vadd.f32 %v148_v5, %v124_v19 }
  0xde   :  { %139 = vst [vmem:[%s245_s3 + $0x18] sm:$0xff] %v117_v16  ;;  %143 = vst [vmem:[%s245_s3 + $0x38] sm:$0xff] %v133_v17 }
  0xdf   :  { %137 = vst [vmem:[%s245_s3 + $0x8] sm:$0xff] %v109_v20  ;;  %141 = vst [vmem:[%s245_s3 + $0x28] sm:$0xff] %v125_v21 }

// kernel: lstm_with_residual.5
= control target key start
LH: loop header
LB: loop body
LE: loop exit
PB: predicated region body
PF: predicated region fallthrough
CT: control target
= control target key end

     0   :  { %11 = vsyncpa [#allocation5], 0  ;;  %v6125_v1 = vmov 0.0   ;;  %vm4335_vm0 = vmmov 0   ;;  %vm24_vm1 = vcmask 261120   ;;  %s6119_s0 = inlined_call_operand.vmem [shape: f32[8,8,128], index: 0, kind: input, shape index: {}]   ;;  %s6120_s1 = inlined_call_operand.vmem [shape: f32[8,8,32], index: 1, kind: input, shape index: {}]   ;;  %s6121_s2 = inlined_call_operand.vmem [shape: bf16[32,128], index: 2, kind: input, shape index: {}]   ;;  %s6122_s3 = inlined_call_operand.hbm [shape: f32[8,8,32], index: 3, kind: output, shape index: {0}]   ;;  %s6123_s4 = inlined_call_operand.hbm [shape: f32[8,32], index: 4, kind: output, shape index: {1}]   ;;  %s6124_s5 = inlined_call_operand.hbm [shape: f32[8,32], index: 5, kind: output, shape index: {2}]  }
   0x1   :  { %v4377_v0 = vld [vmem:[%s6121_s2] sm:$0xff]   ;;  %3672 = vmatprep.subr.bf16.mxu0 %v6125_v1  ;;  %3680 = vmatprep.subr.bf16.mxu1 %v6125_v1  ;;  %v4385_v2 = vld [vmem:[%s6121_s2 + $0x8] sm:$0xff]   ;;  %25 = vst.msk [vmem:[#allocation2] sm:$0xff] %vm24_vm1, %v6125_v1  ;;  %26 = vst.msk [vmem:[#allocation3] sm:$0xff] %vm24_vm1, %v6125_v1 }
   0x2   :  { %3673 = vmatpush3.bf16.msra.mxu0 %v4377_v0  ;;  %3676 = vmatprep.mubr.msk.bf16.mxu0 %vm4335_vm0, %v6125_v1 }
   0x3   :  { %3674 = vmatprep.subr.bf16.mxu0 %v6125_v1  ;;  %3681 = vmatpush3.bf16.msra.mxu1 %v4377_v0 }
   0x4   :  { %3682 = vmatprep.subr.bf16.mxu1 %v6125_v1  ;;  %3684 = vmatprep.mubr.msk.bf16.mxu1 %vm4335_vm0, %v6125_v1 }
   0x5   :  { %12 = vsyncpa [#allocation7], 0  ;;  %v31_v5 = vld [vmem:[%s6119_s0] sm:$0x1]  ;;  %v34_v7 = vld [vmem:[%s6119_s0 + $0x18] sm:$0x1] }
   0x6   :  { %3675 = vmatpush3.bf16.msra.mxu0 %v4385_v2  ;;  %v36_v15 = vld [vmem:[%s6119_s0 + $0x28] sm:$0x1]  ;;  %v38_v17 = vld [vmem:[%s6119_s0 + $0x38] sm:$0x1]  ;;  %v33_v25 = vld [vmem:[%s6119_s0 + $0x10] sm:$0x1] }
   0x7   :  { %3683 = vmatpush3.bf16.msra.mxu1 %v4385_v2  ;;  %3688 = vmatprep.subr.bf16.mxu0 %v6125_v1  ;;  %v32_v20 = vld [vmem:[%s6119_s0 + $0x8] sm:$0x1]  ;;  %s4336_s9 = smov 32   ;;  %v35_v29 = vld [vmem:[%s6119_s0 + $0x20] sm:$0x1]  ;;  %s4337_s16 = smov 64  }
   0x8   :  { %3696 = vmatprep.subr.bf16.mxu1 %v6125_v1  ;;  %v47_v3 = vld [vmem:[#allocation2] sm:$0xff]  ;;  %v37_v32 = vld [vmem:[%s6119_s0 + $0x30] sm:$0x1]  ;;  %v48_v35 = vld [vmem:[#allocation3] sm:$0xff]  ;;  %vm403_vm2 = vcmask 1041409   ;;  %vm406_vm3 = vcmask 1042434  }
   0x9   :  { %v49_v4 = vpack.c.bf16 %v47_v3, %v47_v3  ;;  %v188_v38 = vrot.slane %v48_v35, 2  ;;  %v189_v40 = vrot.slane %v48_v35, 3  ;;  %v190_v42 = vrot.slane %v48_v35, 4  ;;  %s4338_s6 = smov 96   ;;  %s4341_s13 = smov [#allocation8]  }
   0xa   :  { %v187_v44 = vrot.slane %v48_v35, 1  ;;  %v191_v45 = vrot.slane %v48_v35, 5  ;;  %v192_v46 = vrot.slane %v48_v35, 6  ;;  %v193_v47 = vrot.slane %v48_v35, 7  ;;  %s3559_s14 = sshll.u32 %s4341_s13, 4  ;;  %s3560_s14 = int_to_ptr.vmem [resolvable:$true] %s3559_s14 }
   0xb   :  { %3677 = vmatmul.mubr.msk.bf16.vlgmr.msra.gmra.mrb[0].mxu0 %vm24_vm1, %v49_v4  ;;  %vm409_vm4 = vcmask 1043459   ;;  %vm412_vm5 = vcmask 1044484   ;;  %vm415_vm6 = vcmask 1045509   ;;  %vm418_vm7 = vcmask 1046534  }
   0xc   :  { %3689 = vmatpush3.bf16.msra.mxu0 %v4377_v0  ;;  %3692 = vmatprep.mubr.msk.bf16.mxu0 %vm4335_vm0, %v6125_v1  ;;  %vm421_vm8 = vcmask 1047559   ;;  %vm477_vm9 = vcmask 253952  }
   0xd   :  { %3690 = vmatprep.subr.bf16.mxu0 %v6125_v1 }
  0x10   :  { %3691 = vmatpush3.bf16.msra.mxu0 %v4385_v2 }
  0x11   :  { %3704 = vmatprep.subr.bf16.mxu0 %v6125_v1 }
  0xde   :  { %v100_v6 = vpop.f32.mrb[0].mxu0 }
  0xdf   :  { %v109_v8 = vrot.slane %v100_v6, 3  ;;  %v3678_v9 = vpop.f32.mrb[1].mxu0  ;;  %v122_v11 = vadd.f32 %v100_v6, %v31_v5  ;;  %v111_v14 = vrot.slane %v100_v6, 5  ;;  %v113_v16 = vrot.slane %v100_v6, 7 }
  0xe0   :  { %v103_v10 = vpop.f32.mrb[2].mxu0  ;;  %v107_v19 = vrot.slane %v100_v6, 1  ;;  %v108_v23 = vrot.slane %v100_v6, 2  ;;  %v110_v27 = vrot.slane %v100_v6, 4  ;;  %v112_v30 = vrot.slane %v100_v6, 6 }
  0xe1   :  { %v3679_v12 = vpop.f32.mrb[3].mxu0  ;;  %v125_v13 = vadd.f32 %v109_v8, %v34_v7  ;;  %3748 = vtanh.f32 %v122_v11  ;;  %v4421_v18 = vadd.f32 %v111_v14, %v36_v15  ;;  %v4426_v21 = vadd.f32 %v113_v16, %v38_v17 }
  0xe2   :  { %v123_v24 = vadd.f32 %v107_v19, %v32_v20  ;;  %v124_v28 = vadd.f32 %v108_v23, %v33_v25  ;;  %v126_v31 = vadd.f32 %v110_v27, %v35_v29  ;;  %v128_v34 = vadd.f32 %v112_v30, %v37_v32 }
  0xe3   :  { %3750 = vtanh.f32 %v125_v13  ;;  %v3577_v48 = vmul.f32 -1.442695, %v122_v11  ;;  %v3580_v49 = vmul.f32 -1.442695, %v125_v13  ;;  %v3582_v57 = vmul.f32 -1.442695, %v4421_v18 }
  0xe4   :  { %3752 = vtanh.f32 %v4421_v18  ;;  %v3578_v51 = vmul.f32 -1.442695, %v123_v24  ;;  %v3579_v54 = vmul.f32 -1.442695, %v124_v28  ;;  %v3581_v56 = vmul.f32 -1.442695, %v126_v31 }
  0xe5   :  { %3754 = vtanh.f32 %v4426_v21  ;;  %v3583_v58 = vmul.f32 -1.442695, %v128_v34  ;;  %v3584_v60 = vmul.f32 -1.442695, %v4426_v21 }
  0xe6   :  { %3756 = vtanh.f32 %v123_v24 }
  0xe7   :  { %3758 = vtanh.f32 %v124_v28 }
  0xe8   :  { %3760 = vtanh.f32 %v126_v31 }
  0xe9   :  { %3762 = vtanh.f32 %v128_v34  ;;  %v40_v34 = vld [vmem:[%s6120_s1 + $0x8] sm:$0x1] }
  0xea   :  { %3764 = vpow2.f32 %v3577_v48 }
  0xeb   :  { %v3749_v22 = vpop.eup %3748  ;;  %3766 = vpow2.f32 %v3580_v49 }
  0xec   :  { %234 = vrot.lane.b32.xlu1 %v3749_v22, %s4336_s9  ;;  %3768 = vpow2.f32 %v3578_v51 }
  0xed   :  { %v3751_v26 = vpop.eup %3750 }
  0xee   :  { %v3753_v33 = vpop.eup %3752 }
  0xef   :  { %v3755_v36 = vpop.eup %3754 }
  0xf0   :  { %240 = vrot.lane.b32.xlu1 %v3751_v26, %s4336_s9  ;;  %v3757_v37 = vpop.eup %3756 }
  0xf1   :  { %236 = vrot.lane.b32.xlu0 %v3757_v37, %s4336_s9  ;;  %v3759_v39 = vpop.eup %3758  ;;  %v42_v37 = vld [vmem:[%s6120_s1 + $0x18] sm:$0x1] }
  0xf2   :  { %v3761_v41 = vpop.eup %3760 }
  0xf3   :  { %v3763_v43 = vpop.eup %3762 }
  0xf4   :  { %244 = vrot.lane.b32.xlu1 %v3753_v33, %s4336_s9  ;;  %v3765_v50 = vpop.eup %3764 }
  0xf5   :  { %238 = vrot.lane.b32.xlu0 %v3759_v39, %s4336_s9  ;;  %v154_v52 = vadd.f32 1.0, %v3765_v50  ;;  %v3767_v53 = vpop.eup %3766  ;;  %v43_v39 = vld [vmem:[%s6120_s1 + $0x20] sm:$0x1] }
  0xf6   :  { %v157_v55 = vadd.f32 1.0, %v3767_v53  ;;  %v3769_v59 = vpop.eup %3768 }
  0xf7   :  { %3770 = vrcp.f32 %v154_v52  ;;  %v155_v62 = vadd.f32 1.0, %v3769_v59 }
  0xf8   :  { %248 = vrot.lane.b32.xlu1 %v3755_v36, %s4336_s9  ;;  %3772 = vpow2.f32 %v3579_v54  ;;  %v41_v36 = vld [vmem:[%s6120_s1 + $0x10] sm:$0x1] }
  0xf9   :  { %242 = vrot.lane.b32.xlu0 %v3761_v41, %s4336_s9  ;;  %3774 = vrcp.f32 %v157_v55 }
  0xfa   :  { %3776 = vpow2.f32 %v3581_v56 }
  0xfb   :  { %3778 = vpow2.f32 %v3582_v57 }
  0xfc   :  { %198 = vrot.lane.b32.xlu1 %v188_v38, %s4336_s9  ;;  %3780 = vpow2.f32 %v3583_v58  ;;  %v39_v38 = vld [vmem:[%s6120_s1] sm:$0x1] }
  0xfd   :  { %246 = vrot.lane.b32.xlu0 %v3763_v43, %s4336_s9  ;;  %3782 = vpow2.f32 %v3584_v60 }
  0xfe   :  { %3784 = vrcp.f32 %v155_v62 }
 0x100   :  { %200 = vrot.lane.b32.xlu1 %v189_v40, %s4336_s9  ;;  %v44_v40 = vld [vmem:[%s6120_s1 + $0x28] sm:$0x1] }
 0x101   :  { %196 = vrot.lane.b32.xlu0 %v187_v44, %s4336_s9  ;;  %v4457_v61 = vpop.eup %3770 }
 0x102   :  { %v3773_v3 = vpop.eup %3772 }
 0x103   :  { %v4461_v5 = vpop.eup %3774  ;;  %v156_v7 = vadd.f32 1.0, %v3773_v3 }
 0x104   :  { %202 = vrot.lane.b32.xlu1 %v190_v42, %s4336_s9  ;;  %v3777_v8 = vpop.eup %3776 }
 0x105   :  { %194 = vrot.lane.b32.xlu0 %v48_v35, %s4336_s9  ;;  %v3779_v10 = vpop.eup %3778  ;;  %3786 = vrcp.f32 %v156_v7  ;;  %v158_v11 = vadd.f32 1.0, %v3777_v8 }
 0x106   :  { %v3781_v12 = vpop.eup %3780  ;;  %v159_v13 = vadd.f32 1.0, %v3779_v10 }
 0x107   :  { %3788 = vrcp.f32 %v158_v11  ;;  %v160_v14 = vadd.f32 1.0, %v3781_v12  ;;  %v3783_v15 = vpop.eup %3782 }
 0x108   :  { %204 = vrot.lane.b32.xlu1 %v191_v45, %s4336_s9  ;;  %v4465_v16 = vpop.eup %3784  ;;  %3790 = vrcp.f32 %v159_v13  ;;  %v161_v19 = vadd.f32 1.0, %v3783_v15 }
 0x109   :  { %206 = vrot.lane.b32.xlu0 %v192_v46, %s4336_s9  ;;  %3792 = vrcp.f32 %v160_v14 }
 0x10a   :  { %3794 = vrcp.f32 %v161_v19 }
 0x10d   :  { %208 = vrot.lane.b32.xlu0 %v193_v47, %s4336_s9 }
 0x10f   :  { %v4469_v20 = vpop.eup %3786 }
 0x111   :  { %v4473_v23 = vpop.eup %3788 }
 0x112   :  { %v4476_v27 = vpop.eup %3790 }
 0x113   :  { %v4479_v28 = vpop.eup %3792 }
 0x114   :  { %v4485_v33 = vpop.eup %3794 }
 0x15e   :  { %v235_v63 = vpop.permute.xlu1 %234 }
 0x15f   :  { %v258_v4 = vmul.f32 %v4457_v61, %v235_v63 }
 0x161   :  { %274 = vrot.lane.b32.xlu0 %v258_v4, %s4336_s9 }
 0x162   :  { %v241_v6 = vpop.permute.xlu1 %240 }
 0x163   :  { %v261_v9 = vmul.f32 %v4461_v5, %v241_v6  ;;  %v237_v17 = vpop.permute.xlu0 %236 }
 0x164   :  { %v259_v18 = vmul.f32 %v4465_v16, %v237_v17 }
 0x165   :  { %280 = vrot.lane.b32.xlu1 %v261_v9, %s4336_s9 }
 0x166   :  { %276 = vrot.lane.b32.xlu0 %v259_v18, %s4336_s9  ;;  %v245_v24 = vpop.permute.xlu1 %244 }
 0x167   :  { %v239_v21 = vpop.permute.xlu0 %238  ;;  %v263_v30 = vmul.f32 %v4476_v27, %v245_v24 }
 0x168   :  { %v260_v22 = vmul.f32 %v4469_v20, %v239_v21 }
 0x16a   :  { %278 = vrot.lane.b32.xlu0 %v260_v22, %s4336_s9  ;;  %v249_v32 = vpop.permute.xlu1 %248 }
 0x16b   :  { %v243_v25 = vpop.permute.xlu0 %242  ;;  %v265_v35 = vmul.f32 %v4485_v33, %v249_v32 }
 0x16c   :  { %v262_v26 = vmul.f32 %v4473_v23, %v243_v25 }
 0x16e   :  { %282 = vrot.lane.b32.xlu1 %v262_v26, %s4336_s9  ;;  %v199_v44 = vpop.permute.xlu1 %198 }
 0x16f   :  { %v247_v29 = vpop.permute.xlu0 %246  ;;  %v220_v56 = vmul.f32 %v4469_v20, %v199_v44 }
 0x170   :  { %v264_v31 = vmul.f32 %v4479_v28, %v247_v29 }
 0x172   :  { %284 = vrot.lane.b32.xlu1 %v263_v30, %s4336_s9  ;;  %286 = vrot.lane.b32.xlu0 %v264_v31, %s4336_s9  ;;  %v201_v49 = vpop.permute.xlu1 %200 }
 0x173   :  { %v197_v41 = vpop.permute.xlu0 %196  ;;  %v221_v59 = vmul.f32 %v4461_v5, %v201_v49 }
 0x174   :  { %v219_v52 = vmul.f32 %v4465_v16, %v197_v41 }
 0x176   :  { %288 = vrot.lane.b32.xlu1 %v265_v35, %s4336_s9  ;;  %364 = vrot.lane.b32.xlu0 %v40_v34, %s4337_s16  ;;  %v203_v50 = vpop.permute.xlu1 %202 }
 0x177   :  { %v195_v42 = vpop.permute.xlu0 %194  ;;  %v222_v3 = vmul.f32 %v4473_v23, %v203_v50 }
 0x178   :  { %v218_v46 = vmul.f32 %v4457_v61, %v195_v42 }
 0x17a   :  { %366 = vrot.lane.b32.xlu0 %v41_v36, %s4337_s16  ;;  %368 = vrot.lane.b32.xlu1 %v42_v37, %s4337_s16  ;;  %v205_v53 = vpop.permute.xlu1 %204  ;;  %v46_v36 = vld [vmem:[%s6120_s1 + $0x38] sm:$0x1] }
 0x17b   :  { %v207_v43 = vpop.permute.xlu0 %206  ;;  %v223_v7 = vmul.f32 %v4476_v27, %v205_v53 }
 0x17c   :  { %v224_v4 = vmul.f32 %v4479_v28, %v207_v43 }
 0x17e   :  { %362 = vrot.lane.b32.xlu0 %v39_v38, %s4337_s16  ;;  %370 = vrot.lane.b32.xlu1 %v43_v39, %s4337_s16  ;;  %v45_v39 = vld [vmem:[%s6120_s1 + $0x30] sm:$0x1] }
 0x17f   :  { %v209_v45 = vpop.permute.xlu0 %208 }
 0x180   :  { %v225_v13 = vmul.f32 %v4485_v33, %v209_v45 }
 0x182   :  { %372 = vrot.lane.b32.xlu1 %v44_v40, %s4337_s16 }
 0x1d3   :  { %v275_v47 = vpop.permute.xlu0 %274 }
 0x1d4   :  { %v298_v48 = vadd.f32 %v275_v47, %v218_v46 }
 0x1d6   :  { %3796 = vtanh.f32 %v298_v48 }
 0x1d7   :  { %v281_v57 = vpop.permute.xlu1 %280 }
 0x1d8   :  { %v277_v54 = vpop.permute.xlu0 %276  ;;  %v301_v62 = vadd.f32 %v281_v57, %v221_v59 }
 0x1d9   :  { %v299_v55 = vadd.f32 %v277_v54, %v219_v52 }
 0x1da   :  { %v439_v29 = vrot.slane %v301_v62, 5 }
 0x1db   :  { %3798 = vtanh.f32 %v299_v55  ;;  %v435_v19 = vrot.slane %v299_v55, 7 }
 0x1dc   :  { %v279_v58 = vpop.permute.xlu0 %278 }
 0x1dd   :  { %v300_v60 = vadd.f32 %v279_v58, %v220_v56  ;;  %v436_v24 = vsel %vm403_vm2, %v435_v19, %v298_v48 }
 0x1df   :  { %3800 = vtanh.f32 %v300_v60  ;;  %v437_v21 = vrot.slane %v300_v60, 6 }
 0x1e0   :  { %v3797_v51 = vpop.eup %3796  ;;  %v283_v63 = vpop.permute.xlu1 %282  ;;  %3802 = vtanh.f32 %v301_v62 }
 0x1e1   :  { %322 = vrot.lane.b32.xlu0 %v3797_v51, %s4336_s9  ;;  %v302_v6 = vadd.f32 %v283_v63, %v222_v3  ;;  %v438_v26 = vsel %vm406_vm3, %v437_v21, %v436_v24 }
 0x1e2   :  { %v440_v34 = vsel %vm409_vm4, %v439_v29, %v438_v26 }
 0x1e3   :  { %3804 = vtanh.f32 %v302_v6  ;;  %v441_v31 = vrot.slane %v302_v6, 4 }
 0x1e4   :  { %v285_v8 = vpop.permute.xlu1 %284  ;;  %v287_v9 = vpop.permute.xlu0 %286 }
 0x1e5   :  { %v3799_v10 = vpop.eup %3798  ;;  %v304_v11 = vadd.f32 %v287_v9, %v224_v4  ;;  %v303_v12 = vadd.f32 %v285_v8, %v223_v7  ;;  %v442_v37 = vsel %vm412_vm5, %v441_v31, %v440_v34 }
 0x1e6   :  { %324 = vrot.lane.b32.xlu0 %v3799_v10, %s4336_s9 }
 0x1e7   :  { %3806 = vtanh.f32 %v304_v11  ;;  %v443_v35 = vrot.slane %v303_v12, 3  ;;  %v445_v38 = vrot.slane %v304_v11, 2 }
 0x1e8   :  { %v289_v14 = vpop.permute.xlu1 %288  ;;  %3808 = vtanh.f32 %v303_v12  ;;  %v365_v44 = vpop.permute.xlu0 %364 }
 0x1e9   :  { %v3801_v15 = vpop.eup %3800  ;;  %v305_v17 = vadd.f32 %v289_v14, %v225_v13  ;;  %v444_v41 = vsel %vm415_vm6, %v443_v35, %v442_v37 }
 0x1ea   :  { %326 = vrot.lane.b32.xlu1 %v3801_v15, %s4336_s9  ;;  %v3803_v18 = vpop.eup %3802  ;;  %v446_v42 = vsel %vm418_vm7, %v445_v38, %v444_v41 }
 0x1eb   :  { %3810 = vtanh.f32 %v305_v17  ;;  %v447_v40 = vrot.slane %v305_v17, 1 }
 0x1ec   :  { %v367_v45 = vpop.permute.xlu0 %366  ;;  %v369_v46 = vpop.permute.xlu1 %368 }
 0x1ed   :  { %v3805_v22 = vpop.eup %3804  ;;  %v448_v43 = vsel %vm421_vm8, %v447_v40, %v446_v42  ;;  %v488_v40 = vld [vmem:[%s6119_s0 + $0x11] sm:$0x1] }
 0x1ee   :  { %328 = vrot.lane.b32.xlu1 %v3803_v18, %s4336_s9 }
 0x1f0   :  { %v363_v47 = vpop.permute.xlu0 %362  ;;  %v371_v48 = vpop.permute.xlu1 %370 }
 0x1f1   :  { %v3807_v25 = vpop.eup %3806 }
 0x1f2   :  { %330 = vrot.lane.b32.xlu1 %v3805_v22, %s4336_s9  ;;  %334 = vrot.lane.b32.xlu0 %v3807_v25, %s4336_s9  ;;  %v3809_v30 = vpop.eup %3808 }
 0x1f4   :  { %v373_v50 = vpop.permute.xlu1 %372 }
 0x1f5   :  { %v3811_v32 = vpop.eup %3810 }
 0x1f6   :  { %332 = vrot.lane.b32.xlu1 %v3809_v30, %s4336_s9  ;;  %336 = vrot.lane.b32.xlu0 %v3811_v32, %s4336_s9  ;;  %v486_v32 = vld [vmem:[%s6119_s0 + $0x1] sm:$0x1] }
 0x1fa   :  { %376 = vrot.lane.b32.xlu1 %v46_v36, %s4337_s16  ;;  %374 = vrot.lane.b32.xlu0 %v45_v39, %s4337_s16  ;;  %v487_v39 = vld [vmem:[%s6119_s0 + $0x9] sm:$0x1] }
 0x1fe   :  { %449 = vrot.lane.b32.xlu1 %v448_v43, %s4338_s6  ;;  %v490_v43 = vld [vmem:[%s6119_s0 + $0x21] sm:$0x1] }
 0x253   :  { %v323_v49 = vpop.permute.xlu0 %322 }
 0x254   :  { %v346_v60 = vmul.f32 %v4457_v61, %v323_v49 }
 0x258   :  { %v325_v51 = vpop.permute.xlu0 %324 }
 0x259   :  { %v347_v53 = vmul.f32 %v4465_v16, %v325_v51 }
 0x25b   :  { %v4548_v57 = vadd.f32 %v365_v44, %v347_v53  ;;  %v491_v53 = vld [vmem:[%s6119_s0 + $0x29] sm:$0x1] }
 0x25c   :  { %v327_v52 = vpop.permute.xlu1 %326 }
 0x25d   :  { %v348_v54 = vmul.f32 %v4469_v20, %v327_v52  ;;  %v402_v4 = vrot.slane %v4548_v57, 7 }
 0x25f   :  { %v4550_v58 = vadd.f32 %v367_v45, %v348_v54 }
 0x260   :  { %v329_v55 = vpop.permute.xlu1 %328 }
 0x261   :  { %v349_v56 = vmul.f32 %v4461_v5, %v329_v55  ;;  %v405_v20 = vrot.slane %v4550_v58, 6  ;;  %v4560_v5 = vadd.f32 %v363_v47, %v346_v60 }
 0x263   :  { %v4553_v62 = vadd.f32 %v369_v46, %v349_v56  ;;  %v404_v10 = vsel %vm403_vm2, %v402_v4, %v4560_v5  ;;  %v489_v46 = vld [vmem:[%s6119_s0 + $0x19] sm:$0x1] }
 0x264   :  { %v331_v59 = vpop.permute.xlu1 %330  ;;  %v335_v63 = vpop.permute.xlu0 %334  ;;  %v407_v12 = vsel %vm406_vm3, %v405_v20, %v404_v10 }
 0x265   :  { %v350_v3 = vmul.f32 %v4473_v23, %v331_v59  ;;  %v408_v7 = vrot.slane %v4553_v62, 5  ;;  %v352_v13 = vmul.f32 %v4479_v28, %v335_v63  ;;  %v493_v59 = vld [vmem:[%s6119_s0 + $0x39] sm:$0x1] }
 0x267   :  { %v4557_v16 = vadd.f32 %v371_v48, %v350_v3  ;;  %v410_v15 = vsel %vm409_vm4, %v408_v7, %v407_v12 }
 0x268   :  { %v333_v6 = vpop.permute.xlu1 %332  ;;  %v337_v8 = vpop.permute.xlu0 %336 }
 0x269   :  { %v351_v9 = vmul.f32 %v4476_v27, %v333_v6  ;;  %v411_v61 = vrot.slane %v4557_v16, 4  ;;  %v353_v23 = vmul.f32 %v4485_v33, %v337_v8 }
 0x26b   :  { %v4568_v11 = vadd.f32 %v373_v50, %v351_v9  ;;  %v413_v21 = vsel %vm412_vm5, %v411_v61, %v410_v15  ;;  %v492_v50 = vld [vmem:[%s6119_s0 + $0x31] sm:$0x1] }
 0x26c   :  { %v377_v14 = vpop.permute.xlu1 %376  ;;  %v375_v18 = vpop.permute.xlu0 %374 }
 0x26d   :  { %v414_v17 = vrot.slane %v4568_v11, 3  ;;  %v4574_v27 = vadd.f32 %v377_v14, %v353_v23  ;;  %v4576_v19 = vadd.f32 %v375_v18, %v352_v13 }
 0x26f   :  { %v420_v33 = vrot.slane %v4574_v27, 1  ;;  %v416_v22 = vsel %vm415_vm6, %v414_v17, %v413_v21  ;;  %v417_v24 = vrot.slane %v4576_v19, 2 }
 0x270   :  { %v450_v25 = vpop.permute.xlu1 %449 }
 0x271   :  { %452 = vst.msk [vmem:[#allocation3] sm:$0xff] %vm24_vm1, %v450_v25  ;;  %v419_v28 = vsel %vm418_vm7, %v417_v24, %v416_v22 }
 0x272   :  { %v422_v26 = vsel %vm421_vm8, %v420_v33, %v419_v28 }
 0x273   :  { %423 = vrot.lane.b32.xlu0 %v422_v26, %s4337_s16 }
 0x278   :  { %v503_v7 = vld [vmem:[#allocation3] sm:$0xff] }
 0x279   :  { %v629_v9 = vrot.slane %v503_v7, 1  ;;  %v630_v10 = vrot.slane %v503_v7, 2  ;;  %v634_v23 = vrot.slane %v503_v7, 6  ;;  %v631_v12 = vrot.slane %v503_v7, 3 }
 0x27a   :  { %v635_v13 = vrot.slane %v503_v7, 7  ;;  %v632_v14 = vrot.slane %v503_v7, 4  ;;  %v633_v15 = vrot.slane %v503_v7, 5 }
 0x2e5   :  { %v424_v29 = vpop.permute.xlu0 %423 }
 0x2e6   :  { %426 = vst.msk [vmem:[#allocation2] sm:$0xff] %vm24_vm1, %v424_v29 }
 0x2ed   :  { %v502_v30 = vld [vmem:[#allocation2] sm:$0xff] }
 0x2ee   :  { %v504_v31 = vpack.c.bf16 %v502_v30, %v502_v30 }
 0x2f0   :  { %3685 = vmatmul.mubr.msk.bf16.vlgmr.msra.gmra.mrb[0].mxu1 %vm24_vm1, %v504_v31 }
 0x2f1   :  { %3697 = vmatpush3.bf16.msra.mxu1 %v4377_v0  ;;  %3700 = vmatprep.mubr.msk.bf16.mxu1 %vm4335_vm0, %v6125_v1 }
 0x2f2   :  { %3698 = vmatprep.subr.bf16.mxu1 %v6125_v1 }
 0x2f5   :  { %3699 = vmatpush3.bf16.msra.mxu1 %v4385_v2 }
 0x2f6   :  { %3712 = vmatprep.subr.bf16.mxu1 %v6125_v1 }
 0x3c3   :  { %v542_v34 = vpop.f32.mrb[0].mxu1 }
 0x3c4   :  { %v3686_v35 = vpop.f32.mrb[1].mxu1  ;;  %v4597_v36 = vadd.f32 %v542_v34, %v486_v32  ;;  %v549_v0 = vrot.slane %v542_v34, 1  ;;  %v550_v2 = vrot.slane %v542_v34, 2  ;;  %v552_v41 = vrot.slane %v542_v34, 4 }
 0x3c5   :  { %v545_v37 = vpop.f32.mrb[2].mxu1  ;;  %v551_v44 = vrot.slane %v542_v34, 3  ;;  %v554_v47 = vrot.slane %v542_v34, 6  ;;  %v553_v51 = vrot.slane %v542_v34, 5  ;;  %v555_v55 = vrot.slane %v542_v34, 7 }
 0x3c6   :  { %v3687_v38 = vpop.f32.mrb[3].mxu1  ;;  %3812 = vtanh.f32 %v4597_v36  ;;  %v565_v42 = vadd.f32 %v549_v0, %v487_v39  ;;  %v566_v45 = vadd.f32 %v550_v2, %v488_v40  ;;  %v568_v48 = vadd.f32 %v552_v41, %v490_v43 }
 0x3c7   :  { %v567_v52 = vadd.f32 %v551_v44, %v489_v46  ;;  %v570_v54 = vadd.f32 %v554_v47, %v492_v50  ;;  %v569_v56 = vadd.f32 %v553_v51, %v491_v53  ;;  %v571_v60 = vadd.f32 %v555_v55, %v493_v59 }
 0x3c8   :  { %3814 = vtanh.f32 %v565_v42  ;;  %v3586_v17 = vmul.f32 -1.442695, %v4597_v36  ;;  %v3587_v18 = vmul.f32 -1.442695, %v565_v42  ;;  %v3588_v21 = vmul.f32 -1.442695, %v566_v45 }
 0x3c9   :  { %3816 = vtanh.f32 %v566_v45  ;;  %v3589_v22 = vmul.f32 -1.442695, %v567_v52  ;;  %v3592_v24 = vmul.f32 -1.442695, %v570_v54  ;;  %v3590_v28 = vmul.f32 -1.442695, %v568_v48 }
 0x3ca   :  { %3818 = vtanh.f32 %v568_v48  ;;  %v3591_v26 = vmul.f32 -1.442695, %v569_v56  ;;  %v3593_v30 = vmul.f32 -1.442695, %v571_v60 }
 0x3cb   :  { %3820 = vtanh.f32 %v567_v52 }
 0x3cc   :  { %3822 = vtanh.f32 %v570_v54 }
 0x3cd   :  { %3824 = vtanh.f32 %v569_v56 }
 0x3ce   :  { %3826 = vtanh.f32 %v571_v60 }
 0x3cf   :  { %3828 = vpow2.f32 %v3586_v17 }
 0x3d0   :  { %v3813_v49 = vpop.eup %3812  ;;  %3830 = vpow2.f32 %v3587_v18 }
 0x3d1   :  { %676 = vrot.lane.b32.xlu0 %v3813_v49, %s4336_s9  ;;  %3832 = vpow2.f32 %v3588_v21 }
 0x3d2   :  { %v3815_v63 = vpop.eup %3814  ;;  %3834 = vpow2.f32 %v3589_v22 }
 0x3d3   :  { %v3817_v3 = vpop.eup %3816  ;;  %3836 = vpow2.f32 %v3592_v24 }
 0x3d4   :  { %680 = vrot.lane.b32.xlu1 %v3817_v3, %s4336_s9  ;;  %v3819_v4 = vpop.eup %3818 }
 0x3d5   :  { %678 = vrot.lane.b32.xlu0 %v3815_v63, %s4336_s9  ;;  %v3821_v20 = vpop.eup %3820 }
 0x3d6   :  { %v3823_v6 = vpop.eup %3822 }
 0x3d7   :  { %v3825_v8 = vpop.eup %3824 }
 0x3d8   :  { %682 = vrot.lane.b32.xlu1 %v3821_v20, %s4336_s9  ;;  %v3827_v61 = vpop.eup %3826  ;;  %v495_v20 = vld [vmem:[%s6120_s1 + $0x9] sm:$0x1] }
 0x3d9   :  { %684 = vrot.lane.b32.xlu0 %v3819_v4, %s4336_s9  ;;  %v3829_v33 = vpop.eup %3828 }
 0x3da   :  { %v596_v25 = vadd.f32 1.0, %v3829_v33  ;;  %v3831_v29 = vpop.eup %3830 }
 0x3db   :  { %v597_v31 = vadd.f32 1.0, %v3831_v29  ;;  %v3833_v32 = vpop.eup %3832 }
 0x3dc   :  { %686 = vrot.lane.b32.xlu1 %v3825_v8, %s4336_s9  ;;  %3838 = vrcp.f32 %v596_v25  ;;  %v3835_v34 = vpop.eup %3834  ;;  %v598_v36 = vadd.f32 1.0, %v3833_v32 }
 0x3dd   :  { %688 = vrot.lane.b32.xlu0 %v3823_v6, %s4336_s9  ;;  %3840 = vpow2.f32 %v3590_v28  ;;  %v3837_v35 = vpop.eup %3836  ;;  %v599_v0 = vadd.f32 1.0, %v3835_v34 }
 0x3de   :  { %3842 = vpow2.f32 %v3591_v26  ;;  %v602_v40 = vadd.f32 1.0, %v3837_v35 }
 0x3df   :  { %3844 = vpow2.f32 %v3593_v30 }
 0x3e0   :  { %690 = vrot.lane.b32.xlu1 %v3827_v61, %s4336_s9  ;;  %3846 = vrcp.f32 %v597_v31 }
 0x3e1   :  { %638 = vrot.lane.b32.xlu0 %v629_v9, %s4336_s9  ;;  %3848 = vrcp.f32 %v598_v36  ;;  %v496_v9 = vld [vmem:[%s6120_s1 + $0x11] sm:$0x1] }
 0x3e2   :  { %3850 = vrcp.f32 %v599_v0 }
 0x3e3   :  { %3852 = vrcp.f32 %v602_v40 }
 0x3e4   :  { %640 = vrot.lane.b32.xlu1 %v630_v10, %s4336_s9 }
 0x3e5   :  { %636 = vrot.lane.b32.xlu0 %v503_v7, %s4336_s9 }
 0x3e6   :  { %v4638_v37 = vpop.eup %3838 }
 0x3e7   :  { %v3841_v39 = vpop.eup %3840 }
 0x3e8   :  { %642 = vrot.lane.b32.xlu1 %v631_v12, %s4336_s9  ;;  %v600_v41 = vadd.f32 1.0, %v3841_v39  ;;  %v3843_v42 = vpop.eup %3842  ;;  %v497_v12 = vld [vmem:[%s6120_s1 + $0x19] sm:$0x1] }
 0x3e9   :  { %648 = vrot.lane.b32.xlu0 %v634_v23, %s4336_s9  ;;  %v3845_v43 = vpop.eup %3844  ;;  %v601_v44 = vadd.f32 1.0, %v3843_v42  ;;  %v494_v23 = vld [vmem:[%s6120_s1 + $0x1] sm:$0x1] }
 0x3ea   :  { %3854 = vrcp.f32 %v600_v41  ;;  %v4642_v45 = vpop.eup %3846  ;;  %v603_v49 = vadd.f32 1.0, %v3845_v43 }
 0x3eb   :  { %3856 = vrcp.f32 %v601_v44  ;;  %v4646_v50 = vpop.eup %3848 }
 0x3ec   :  { %644 = vrot.lane.b32.xlu1 %v632_v14, %s4336_s9  ;;  %v4648_v52 = vpop.eup %3850  ;;  %3858 = vrcp.f32 %v603_v49  ;;  %v499_v14 = vld [vmem:[%s6120_s1 + $0x29] sm:$0x1] }
 0x3ed   :  { %650 = vrot.lane.b32.xlu0 %v635_v13, %s4336_s9  ;;  %v4653_v56 = vpop.eup %3852  ;;  %v498_v13 = vld [vmem:[%s6120_s1 + $0x21] sm:$0x1] }
 0x3f0   :  { %646 = vrot.lane.b32.xlu1 %v633_v15, %s4336_s9 }
 0x3f4   :  { %v4656_v60 = vpop.eup %3854 }
 0x3f5   :  { %v4665_v6 = vpop.eup %3856 }
 0x3f6   :  { %v4673_v61 = vpop.eup %3858 }
 0x443   :  { %v677_v38 = vpop.permute.xlu0 %676 }
 0x444   :  { %v700_v2 = vmul.f32 %v4638_v37, %v677_v38 }
 0x446   :  { %716 = vrot.lane.b32.xlu0 %v700_v2, %s4336_s9  ;;  %v681_v47 = vpop.permute.xlu1 %680 }
 0x447   :  { %v679_v46 = vpop.permute.xlu0 %678  ;;  %v702_v53 = vmul.f32 %v4646_v50, %v681_v47 }
 0x448   :  { %v701_v48 = vmul.f32 %v4642_v45, %v679_v46 }
 0x44a   :  { %718 = vrot.lane.b32.xlu0 %v701_v48, %s4336_s9  ;;  %v683_v54 = vpop.permute.xlu1 %682 }
 0x44b   :  { %v685_v51 = vpop.permute.xlu0 %684  ;;  %v703_v55 = vmul.f32 %v4648_v52, %v683_v54 }
 0x44c   :  { %v704_v4 = vmul.f32 %v4656_v60, %v685_v51 }
 0x44d   :  { %722 = vrot.lane.b32.xlu1 %v703_v55, %s4336_s9 }
 0x44e   :  { %720 = vrot.lane.b32.xlu0 %v702_v53, %s4336_s9  ;;  %v687_v63 = vpop.permute.xlu1 %686 }
 0x44f   :  { %v689_v59 = vpop.permute.xlu0 %688  ;;  %v705_v7 = vmul.f32 %v4665_v6, %v687_v63 }
 0x450   :  { %v706_v3 = vmul.f32 %v4653_v56, %v689_v59 }
 0x451   :  { %724 = vrot.lane.b32.xlu1 %v704_v4, %s4336_s9 }
 0x452   :  { %728 = vrot.lane.b32.xlu0 %v706_v3, %s4336_s9  ;;  %v691_v8 = vpop.permute.xlu1 %690 }
 0x453   :  { %v707_v10 = vmul.f32 %v4673_v61, %v691_v8  ;;  %v639_v15 = vpop.permute.xlu0 %638 }
 0x454   :  { %v661_v29 = vmul.f32 %v4642_v45, %v639_v15 }
 0x455   :  { %726 = vrot.lane.b32.xlu1 %v705_v7, %s4336_s9 }
 0x456   :  { %806 = vrot.lane.b32.xlu0 %v495_v20, %s4337_s16  ;;  %v641_v21 = vpop.permute.xlu1 %640 }
 0x457   :  { %v637_v17 = vpop.permute.xlu0 %636  ;;  %v662_v34 = vmul.f32 %v4646_v50, %v641_v21  ;;  %v500_v21 = vld [vmem:[%s6120_s1 + $0x31] sm:$0x1] }
 0x458   :  { %v660_v24 = vmul.f32 %v4638_v37, %v637_v17  ;;  %v501_v17 = vld [vmem:[%s6120_s1 + $0x39] sm:$0x1] }
 0x459   :  { %730 = vrot.lane.b32.xlu1 %v707_v10, %s4336_s9 }
 0x45a   :  { %808 = vrot.lane.b32.xlu0 %v496_v9, %s4337_s16  ;;  %v643_v22 = vpop.permute.xlu1 %642 }
 0x45b   :  { %v649_v18 = vpop.permute.xlu0 %648  ;;  %v663_v36 = vmul.f32 %v4648_v52, %v643_v22 }
 0x45c   :  { %v666_v40 = vmul.f32 %v4653_v56, %v649_v18 }
 0x45d   :  { %810 = vrot.lane.b32.xlu1 %v497_v12, %s4337_s16 }
 0x45e   :  { %804 = vrot.lane.b32.xlu0 %v494_v23, %s4337_s16  ;;  %v645_v26 = vpop.permute.xlu1 %644 }
 0x45f   :  { %v651_v33 = vpop.permute.xlu0 %650  ;;  %v664_v42 = vmul.f32 %v4656_v60, %v645_v26 }
 0x460   :  { %v667_v53 = vmul.f32 %v4673_v61, %v651_v33 }
 0x461   :  { %812 = vrot.lane.b32.xlu1 %v498_v13, %s4337_s16 }
 0x462   :  { %v647_v31 = vpop.permute.xlu1 %646 }
 0x463   :  { %v665_v48 = vmul.f32 %v4665_v6, %v647_v31 }
 0x465   :  { %814 = vrot.lane.b32.xlu1 %v499_v14, %s4337_s16 }
 0x4b8   :  { %v717_v25 = vpop.permute.xlu0 %716 }
 0x4b9   :  { %v740_v28 = vadd.f32 %v717_v25, %v660_v24 }
 0x4bb   :  { %3860 = vtanh.f32 %v740_v28 }
 0x4bc   :  { %v719_v30 = vpop.permute.xlu0 %718 }
 0x4bd   :  { %v741_v32 = vadd.f32 %v719_v30, %v661_v29 }
 0x4bf   :  { %3862 = vtanh.f32 %v741_v32  ;;  %v723_v0 = vpop.permute.xlu1 %722  ;;  %v870_v4 = vrot.slane %v741_v32, 7 }
 0x4c0   :  { %v721_v38 = vpop.permute.xlu0 %720  ;;  %v743_v2 = vadd.f32 %v723_v0, %v663_v36 }
 0x4c1   :  { %v742_v39 = vadd.f32 %v721_v38, %v662_v34  ;;  %v871_v8 = vsel %vm403_vm2, %v870_v4, %v740_v28 }
 0x4c2   :  { %v874_v10 = vrot.slane %v743_v2, 5 }
 0x4c3   :  { %3864 = vtanh.f32 %v742_v39  ;;  %v725_v43 = vpop.permute.xlu1 %724  ;;  %v872_v20 = vrot.slane %v742_v39, 6 }
 0x4c4   :  { %v729_v41 = vpop.permute.xlu0 %728  ;;  %3866 = vtanh.f32 %v743_v2  ;;  %v744_v46 = vadd.f32 %v725_v43, %v664_v42 }
 0x4c5   :  { %v3861_v35 = vpop.eup %3860  ;;  %v746_v44 = vadd.f32 %v729_v41, %v666_v40  ;;  %v873_v9 = vsel %vm406_vm3, %v872_v20, %v871_v8 }
 0x4c6   :  { %764 = vrot.lane.b32.xlu0 %v3861_v35, %s4336_s9  ;;  %v876_v23 = vrot.slane %v744_v46, 4  ;;  %v875_v13 = vsel %vm409_vm4, %v874_v10, %v873_v9 }
 0x4c7   :  { %3868 = vtanh.f32 %v746_v44  ;;  %v727_v49 = vpop.permute.xlu1 %726  ;;  %v880_v24 = vrot.slane %v746_v44, 2 }
 0x4c8   :  { %3870 = vtanh.f32 %v744_v46  ;;  %v745_v51 = vadd.f32 %v727_v49, %v665_v48  ;;  %v877_v18 = vsel %vm412_vm5, %v876_v23, %v875_v13  ;;  %v807_v26 = vpop.permute.xlu0 %806 }
 0x4c9   :  { %v3863_v47 = vpop.eup %3862 }
 0x4ca   :  { %766 = vrot.lane.b32.xlu0 %v3863_v47, %s4336_s9  ;;  %3872 = vtanh.f32 %v745_v51  ;;  %v878_v14 = vrot.slane %v745_v51, 3 }
 0x4cb   :  { %v731_v55 = vpop.permute.xlu1 %730 }
 0x4cc   :  { %v747_v59 = vadd.f32 %v731_v55, %v667_v53  ;;  %v879_v22 = vsel %vm415_vm6, %v878_v14, %v877_v18  ;;  %v809_v29 = vpop.permute.xlu0 %808 }
 0x4cd   :  { %v3865_v54 = vpop.eup %3864  ;;  %v881_v25 = vsel %vm418_vm7, %v880_v24, %v879_v22  ;;  %v4781_v22 = vld [vmem:[%s6121_s2 + $0x8] sm:$0xff]   ;;  %v920_v24 = vld [vmem:[%s6119_s0 + $0x2] sm:$0x1] }
 0x4ce   :  { %768 = vrot.lane.b32.xlu1 %v3865_v54, %s4336_s9  ;;  %v3867_v63 = vpop.eup %3866  ;;  %3874 = vtanh.f32 %v747_v59  ;;  %v882_v33 = vrot.slane %v747_v59, 1 }
 0x4cf   :  { %v811_v30 = vpop.permute.xlu1 %810 }
 0x4d0   :  { %v883_v28 = vsel %vm421_vm8, %v882_v33, %v881_v25  ;;  %v805_v31 = vpop.permute.xlu0 %804  ;;  %v4772_v33 = vld [vmem:[%s6121_s2] sm:$0xff]  }
 0x4d1   :  { %v3869_v3 = vpop.eup %3868 }
 0x4d2   :  { %770 = vrot.lane.b32.xlu1 %v3867_v63, %s4336_s9  ;;  %776 = vrot.lane.b32.xlu0 %v3869_v3, %s4336_s9  ;;  %v3871_v7 = vpop.eup %3870 }
 0x4d3   :  { %v813_v32 = vpop.permute.xlu1 %812 }
 0x4d4   :  { %v3873_v12 = vpop.eup %3872 }
 0x4d6   :  { %772 = vrot.lane.b32.xlu1 %v3871_v7, %s4336_s9 }
 0x4d7   :  { %v815_v35 = vpop.permute.xlu1 %814 }
 0x4d8   :  { %v3875_v15 = vpop.eup %3874 }
 0x4d9   :  { %778 = vrot.lane.b32.xlu0 %v3875_v15, %s4336_s9 }
 0x4da   :  { %774 = vrot.lane.b32.xlu1 %v3873_v12, %s4336_s9 }
 0x4dd   :  { %816 = vrot.lane.b32.xlu0 %v500_v21, %s4337_s16 }
 0x4de   :  { %818 = vrot.lane.b32.xlu1 %v501_v17, %s4337_s16 }
 0x4e2   :  { %884 = vrot.lane.b32.xlu1 %v883_v28, %s4338_s6 }
 0x538   :  { %v765_v34 = vpop.permute.xlu0 %764 }
 0x539   :  { %v788_v44 = vmul.f32 %v4638_v37, %v765_v34 }
 0x53c   :  { %v767_v36 = vpop.permute.xlu0 %766 }
 0x53d   :  { %v789_v0 = vmul.f32 %v4642_v45, %v767_v36 }
 0x53f   :  { %v4729_v41 = vadd.f32 %v807_v26, %v789_v0  ;;  %v924_v0 = vld [vmem:[%s6119_s0 + $0x22] sm:$0x1] }
 0x540   :  { %v769_v38 = vpop.permute.xlu1 %768 }
 0x541   :  { %v790_v39 = vmul.f32 %v4646_v50, %v769_v38  ;;  %v844_v49 = vrot.slane %v4729_v41, 7 }
 0x543   :  { %v4731_v42 = vadd.f32 %v809_v29, %v790_v39 }
 0x544   :  { %v771_v2 = vpop.permute.xlu1 %770  ;;  %v777_v47 = vpop.permute.xlu0 %776 }
 0x545   :  { %v791_v40 = vmul.f32 %v4648_v52, %v771_v2  ;;  %v846_v50 = vrot.slane %v4731_v42, 6  ;;  %v4741_v52 = vadd.f32 %v805_v31, %v788_v44  ;;  %v794_v4 = vmul.f32 %v4653_v56, %v777_v47 }
 0x547   :  { %v4734_v46 = vadd.f32 %v811_v30, %v791_v40  ;;  %v845_v59 = vsel %vm403_vm2, %v844_v49, %v4741_v52  ;;  %v923_v40 = vld [vmem:[%s6119_s0 + $0x1a] sm:$0x1] }
 0x548   :  { %v773_v43 = vpop.permute.xlu1 %772  ;;  %v847_v3 = vsel %vm406_vm3, %v846_v50, %v845_v59 }
 0x549   :  { %v792_v48 = vmul.f32 %v4656_v60, %v773_v43  ;;  %v848_v53 = vrot.slane %v4734_v46, 5 }
 0x54b   :  { %v4738_v45 = vadd.f32 %v813_v32, %v792_v48  ;;  %v779_v54 = vpop.permute.xlu0 %778  ;;  %v849_v7 = vsel %vm409_vm4, %v848_v53, %v847_v3  ;;  %v921_v32 = vld [vmem:[%s6119_s0 + $0xa] sm:$0x1]  ;;  %v926_v48 = vld [vmem:[%s6119_s0 + $0x32] sm:$0x1] }
 0x54c   :  { %v775_v51 = vpop.permute.xlu1 %774  ;;  %v795_v60 = vmul.f32 %v4673_v61, %v779_v54 }
 0x54d   :  { %v793_v55 = vmul.f32 %v4665_v6, %v775_v51  ;;  %v850_v37 = vrot.slane %v4738_v45, 4  ;;  %v925_v51 = vld [vmem:[%s6119_s0 + $0x2a] sm:$0x1] }
 0x54f   :  { %v4749_v63 = vadd.f32 %v815_v35, %v793_v55  ;;  %v817_v9 = vpop.permute.xlu0 %816  ;;  %v851_v23 = vsel %vm412_vm5, %v850_v37, %v849_v7  ;;  %v922_v35 = vld [vmem:[%s6119_s0 + $0x12] sm:$0x1]  ;;  %v927_v37 = vld [vmem:[%s6119_s0 + $0x3a] sm:$0x1] }
 0x550   :  { %v819_v20 = vpop.permute.xlu1 %818  ;;  %v4757_v10 = vadd.f32 %v817_v9, %v794_v4 }
 0x551   :  { %v852_v8 = vrot.slane %v4749_v63, 3  ;;  %v4755_v6 = vadd.f32 %v819_v20, %v795_v60 }
 0x552   :  { %v854_v13 = vrot.slane %v4757_v10, 2 }
 0x553   :  { %v856_v61 = vrot.slane %v4755_v6, 1  ;;  %v853_v12 = vsel %vm415_vm6, %v852_v8, %v851_v23 }
 0x554   :  { %v885_v14 = vpop.permute.xlu1 %884  ;;  %v855_v56 = vsel %vm418_vm7, %v854_v13, %v853_v12 }
 0x555   :  { %887 = vst.msk [vmem:[#allocation3] sm:$0xff] %vm24_vm1, %v885_v14  ;;  %v857_v15 = vsel %vm421_vm8, %v856_v61, %v855_v56 }
 0x556   :  { %858 = vrot.lane.b32.xlu0 %v857_v15, %s4337_s16 }
 0x55c   :  { %v937_v8 = vld [vmem:[#allocation3] sm:$0xff] }
 0x55d   :  { %v1063_v23 = vrot.slane %v937_v8, 1  ;;  %v1064_v12 = vrot.slane %v937_v8, 2  ;;  %v1068_v13 = vrot.slane %v937_v8, 6  ;;  %v1065_v14 = vrot.slane %v937_v8, 3 }
 0x55e   :  { %v1069_v56 = vrot.slane %v937_v8, 7  ;;  %v1066_v15 = vrot.slane %v937_v8, 4 }
 0x5c8   :  { %v859_v17 = vpop.permute.xlu0 %858 }
 0x5c9   :  { %861 = vst.msk [vmem:[#allocation2] sm:$0xff] %vm24_vm1, %v859_v17  ;;  %v1067_v17 = vrot.slane %v937_v8, 5 }
 0x5d0   :  { %v936_v18 = vld [vmem:[#allocation2] sm:$0xff] }
 0x5d1   :  { %v938_v21 = vpack.c.bf16 %v936_v18, %v936_v18 }
 0x5d3   :  { %3693 = vmatmul.mubr.msk.bf16.vlgmr.msra.gmra.mrb[4].mxu0 %vm24_vm1, %v938_v21 }
 0x5d4   :  { %3705 = vmatpush3.bf16.msra.mxu0 %v4772_v33  ;;  %3708 = vmatprep.mubr.msk.bf16.mxu0 %vm4335_vm0, %v6125_v1 }
 0x5d5   :  { %3706 = vmatprep.subr.bf16.mxu0 %v6125_v1 }
 0x5d8   :  { %3707 = vmatpush3.bf16.msra.mxu0 %v4781_v22 }
 0x5d9   :  { %3720 = vmatprep.subr.bf16.mxu0 %v6125_v1 }
 0x6a6   :  { %v976_v25 = vpop.f32.mrb[4].mxu0 }
 0x6a7   :  { %v3694_v28 = vpop.f32.mrb[5].mxu0  ;;  %v4788_v26 = vadd.f32 %v976_v25, %v920_v24  ;;  %v983_v31 = vrot.slane %v976_v25, 1  ;;  %v984_v34 = vrot.slane %v976_v25, 2  ;;  %v986_v36 = vrot.slane %v976_v25, 4 }
 0x6a8   :  { %v979_v29 = vpop.f32.mrb[6].mxu0  ;;  %v985_v39 = vrot.slane %v976_v25, 3  ;;  %v988_v43 = vrot.slane %v976_v25, 6  ;;  %v987_v49 = vrot.slane %v976_v25, 5  ;;  %v989_v54 = vrot.slane %v976_v25, 7 }
 0x6a9   :  { %v3695_v30 = vpop.f32.mrb[7].mxu0  ;;  %3876 = vtanh.f32 %v4788_v26  ;;  %v999_v38 = vadd.f32 %v983_v31, %v921_v32  ;;  %v1000_v2 = vadd.f32 %v984_v34, %v922_v35  ;;  %v1002_v44 = vadd.f32 %v986_v36, %v924_v0 }
 0x6aa   :  { %v1001_v50 = vadd.f32 %v985_v39, %v923_v40  ;;  %v1004_v53 = vadd.f32 %v988_v43, %v926_v48  ;;  %v1003_v55 = vadd.f32 %v987_v49, %v925_v51  ;;  %v1005_v59 = vadd.f32 %v989_v54, %v927_v37 }
 0x6ab   :  { %3878 = vtanh.f32 %v999_v38  ;;  %v3595_v18 = vmul.f32 -1.442695, %v4788_v26  ;;  %v3596_v21 = vmul.f32 -1.442695, %v999_v38  ;;  %v3597_v24 = vmul.f32 -1.442695, %v1000_v2 }
 0x6ac   :  { %3880 = vtanh.f32 %v1000_v2  ;;  %v3598_v28 = vmul.f32 -1.442695, %v1001_v50  ;;  %v3601_v29 = vmul.f32 -1.442695, %v1004_v53  ;;  %v3599_v31 = vmul.f32 -1.442695, %v1002_v44 }
 0x6ad   :  { %3882 = vtanh.f32 %v1002_v44  ;;  %v3600_v32 = vmul.f32 -1.442695, %v1003_v55  ;;  %v3602_v35 = vmul.f32 -1.442695, %v1005_v59 }
 0x6ae   :  { %3884 = vtanh.f32 %v1001_v50 }
 0x6af   :  { %3886 = vtanh.f32 %v1004_v53 }
 0x6b0   :  { %3888 = vtanh.f32 %v1003_v55 }
 0x6b1   :  { %3890 = vtanh.f32 %v1005_v59 }
 0x6b2   :  { %3892 = vpow2.f32 %v3595_v18 }
 0x6b3   :  { %v3877_v47 = vpop.eup %3876  ;;  %3894 = vpow2.f32 %v3596_v21 }
 0x6b4   :  { %1110 = vrot.lane.b32.xlu0 %v3877_v47, %s4336_s9  ;;  %3896 = vpow2.f32 %v3597_v24  ;;  %v930_v24 = vld [vmem:[%s6120_s1 + $0x12] sm:$0x1] }
 0x6b5   :  { %v3879_v60 = vpop.eup %3878  ;;  %3898 = vpow2.f32 %v3598_v28 }
 0x6b6   :  { %v3881_v3 = vpop.eup %3880  ;;  %3900 = vpow2.f32 %v3601_v29  ;;  %v928_v29 = vld [vmem:[%s6120_s1 + $0x2] sm:$0x1] }
 0x6b7   :  { %1114 = vrot.lane.b32.xlu1 %v3881_v3, %s4336_s9  ;;  %v3883_v4 = vpop.eup %3882 }
 0x6b8   :  { %1112 = vrot.lane.b32.xlu0 %v3879_v60, %s4336_s9  ;;  %v3885_v20 = vpop.eup %3884 }
 0x6b9   :  { %v3887_v7 = vpop.eup %3886 }
 0x6ba   :  { %v3889_v9 = vpop.eup %3888 }
 0x6bb   :  { %1116 = vrot.lane.b32.xlu1 %v3885_v20, %s4336_s9  ;;  %v3891_v61 = vpop.eup %3890 }
 0x6bc   :  { %1118 = vrot.lane.b32.xlu0 %v3883_v4, %s4336_s9  ;;  %v3893_v25 = vpop.eup %3892 }
 0x6bd   :  { %v1030_v30 = vadd.f32 1.0, %v3893_v25  ;;  %v3895_v34 = vpop.eup %3894 }
 0x6be   :  { %v1031_v36 = vadd.f32 1.0, %v3895_v34  ;;  %v3897_v26 = vpop.eup %3896 }
 0x6bf   :  { %1120 = vrot.lane.b32.xlu1 %v3889_v9, %s4336_s9  ;;  %3902 = vrcp.f32 %v1030_v30  ;;  %v3899_v0 = vpop.eup %3898  ;;  %v1032_v39 = vadd.f32 1.0, %v3897_v26  ;;  %v931_v30 = vld [vmem:[%s6120_s1 + $0x1a] sm:$0x1] }
 0x6c0   :  { %1122 = vrot.lane.b32.xlu0 %v3887_v7, %s4336_s9  ;;  %3904 = vpow2.f32 %v3599_v31  ;;  %v3901_v38 = vpop.eup %3900  ;;  %v1033_v43 = vadd.f32 1.0, %v3899_v0  ;;  %v932_v31 = vld [vmem:[%s6120_s1 + $0x22] sm:$0x1] }
 0x6c1   :  { %3906 = vpow2.f32 %v3600_v32  ;;  %v1036_v48 = vadd.f32 1.0, %v3901_v38  ;;  %v933_v32 = vld [vmem:[%s6120_s1 + $0x2a] sm:$0x1] }
 0x6c2   :  { %3908 = vpow2.f32 %v3602_v35 }
 0x6c3   :  { %1124 = vrot.lane.b32.xlu1 %v3891_v61, %s4336_s9  ;;  %3910 = vrcp.f32 %v1031_v36 }
 0x6c4   :  { %1072 = vrot.lane.b32.xlu0 %v1063_v23, %s4336_s9  ;;  %3912 = vrcp.f32 %v1032_v39 }
 0x6c5   :  { %3914 = vrcp.f32 %v1033_v43 }
 0x6c6   :  { %3916 = vrcp.f32 %v1036_v48 }
 0x6c7   :  { %1074 = vrot.lane.b32.xlu1 %v1064_v12, %s4336_s9 }
 0x6c8   :  { %1070 = vrot.lane.b32.xlu0 %v937_v8, %s4336_s9 }
 0x6c9   :  { %v4829_v2 = vpop.eup %3902 }
 0x6ca   :  { %v3905_v47 = vpop.eup %3904 }
 0x6cb   :  { %1076 = vrot.lane.b32.xlu1 %v1065_v14, %s4336_s9  ;;  %v1034_v49 = vadd.f32 1.0, %v3905_v47  ;;  %v3907_v50 = vpop.eup %3906 }
 0x6cc   :  { %1082 = vrot.lane.b32.xlu0 %v1068_v13, %s4336_s9  ;;  %v3909_v51 = vpop.eup %3908  ;;  %v1035_v53 = vadd.f32 1.0, %v3907_v50 }
 0x6cd   :  { %3918 = vrcp.f32 %v1034_v49  ;;  %v4833_v54 = vpop.eup %3910  ;;  %v1037_v60 = vadd.f32 1.0, %v3909_v51 }
 0x6ce   :  { %3920 = vrcp.f32 %v1035_v53  ;;  %v4837_v3 = vpop.eup %3912 }
 0x6cf   :  { %1078 = vrot.lane.b32.xlu1 %v1066_v15, %s4336_s9  ;;  %v4839_v20 = vpop.eup %3914  ;;  %3922 = vrcp.f32 %v1037_v60  ;;  %v929_v15 = vld [vmem:[%s6120_s1 + $0xa] sm:$0x1] }
 0x6d0   :  { %1084 = vrot.lane.b32.xlu0 %v1069_v56, %s4336_s9  ;;  %v4844_v23 = vpop.eup %3916 }
 0x6d3   :  { %1080 = vrot.lane.b32.xlu1 %v1067_v17, %s4336_s9 }
 0x6d7   :  { %v4847_v12 = vpop.eup %3918 }
 0x6d8   :  { %v4856_v17 = vpop.eup %3920 }
 0x6d9   :  { %v4864_v25 = vpop.eup %3922 }
 0x726   :  { %v1111_v40 = vpop.permute.xlu0 %1110 }
 0x727   :  { %v1134_v44 = vmul.f32 %v4829_v2, %v1111_v40 }
 0x729   :  { %1150 = vrot.lane.b32.xlu0 %v1134_v44, %s4336_s9  ;;  %v1115_v37 = vpop.permute.xlu1 %1114 }
 0x72a   :  { %v1113_v55 = vpop.permute.xlu0 %1112  ;;  %v1136_v7 = vmul.f32 %v4837_v3, %v1115_v37 }
 0x72b   :  { %v1135_v59 = vmul.f32 %v4833_v54, %v1113_v55 }
 0x72d   :  { %1152 = vrot.lane.b32.xlu0 %v1135_v59, %s4336_s9  ;;  %v1117_v8 = vpop.permute.xlu1 %1116 }
 0x72e   :  { %v1119_v4 = vpop.permute.xlu0 %1118  ;;  %v1137_v9 = vmul.f32 %v4839_v20, %v1117_v8 }
 0x72f   :  { %v1138_v56 = vmul.f32 %v4847_v12, %v1119_v4 }
 0x730   :  { %1156 = vrot.lane.b32.xlu1 %v1137_v9, %s4336_s9 }
 0x731   :  { %1154 = vrot.lane.b32.xlu0 %v1136_v7, %s4336_s9  ;;  %v1121_v13 = vpop.permute.xlu1 %1120 }
 0x732   :  { %v1123_v61 = vpop.permute.xlu0 %1122  ;;  %v1139_v18 = vmul.f32 %v4856_v17, %v1121_v13 }
 0x733   :  { %v1140_v14 = vmul.f32 %v4844_v23, %v1123_v61 }
 0x734   :  { %1158 = vrot.lane.b32.xlu1 %v1138_v56, %s4336_s9 }
 0x735   :  { %1162 = vrot.lane.b32.xlu0 %v1140_v14, %s4336_s9  ;;  %v1125_v21 = vpop.permute.xlu1 %1124 }
 0x736   :  { %v1141_v28 = vmul.f32 %v4864_v25, %v1125_v21  ;;  %v1073_v34 = vpop.permute.xlu0 %1072 }
 0x737   :  { %v1095_v44 = vmul.f32 %v4833_v54, %v1073_v34 }
 0x738   :  { %1160 = vrot.lane.b32.xlu1 %v1139_v18, %s4336_s9 }
 0x739   :  { %1240 = vrot.lane.b32.xlu0 %v929_v15, %s4337_s16  ;;  %v1075_v26 = vpop.permute.xlu1 %1074 }
 0x73a   :  { %v1071_v35 = vpop.permute.xlu0 %1070  ;;  %v1096_v51 = vmul.f32 %v4837_v3, %v1075_v26 }
 0x73b   :  { %v1094_v39 = vmul.f32 %v4829_v2, %v1071_v35 }
 0x73c   :  { %1164 = vrot.lane.b32.xlu1 %v1141_v28, %s4336_s9 }
 0x73d   :  { %1242 = vrot.lane.b32.xlu0 %v930_v24, %s4337_s16  ;;  %v1077_v38 = vpop.permute.xlu1 %1076 }
 0x73e   :  { %v1083_v36 = vpop.permute.xlu0 %1082  ;;  %v1097_v55 = vmul.f32 %v4839_v20, %v1077_v38 }
 0x73f   :  { %v1100_v7 = vmul.f32 %v4844_v23, %v1083_v36 }
 0x740   :  { %1244 = vrot.lane.b32.xlu1 %v931_v30, %s4337_s16 }
 0x741   :  { %1238 = vrot.lane.b32.xlu0 %v928_v29, %s4337_s16  ;;  %v1079_v47 = vpop.permute.xlu1 %1078 }
 0x742   :  { %v1085_v0 = vpop.permute.xlu0 %1084  ;;  %v1098_v9 = vmul.f32 %v4847_v12, %v1079_v47 }
 0x743   :  { %v1101_v24 = vmul.f32 %v4864_v25, %v1085_v0 }
 0x744   :  { %1246 = vrot.lane.b32.xlu1 %v932_v31, %s4337_s16 }
 0x745   :  { %v1081_v49 = vpop.permute.xlu1 %1080 }
 0x746   :  { %v1099_v15 = vmul.f32 %v4856_v17, %v1081_v49  ;;  %v935_v49 = vld [vmem:[%s6120_s1 + $0x3a] sm:$0x1] }
 0x748   :  { %1248 = vrot.lane.b32.xlu1 %v933_v32, %s4337_s16 }
 0x79b   :  { %v1151_v40 = vpop.permute.xlu0 %1150 }
 0x79c   :  { %v1174_v43 = vadd.f32 %v1151_v40, %v1094_v39 }
 0x79e   :  { %3924 = vtanh.f32 %v1174_v43 }
 0x79f   :  { %v1153_v48 = vpop.permute.xlu0 %1152 }
 0x7a0   :  { %v1175_v50 = vadd.f32 %v1153_v48, %v1095_v44 }
 0x7a2   :  { %3926 = vtanh.f32 %v1175_v50  ;;  %v1157_v59 = vpop.permute.xlu1 %1156  ;;  %v1304_v34 = vrot.slane %v1175_v50, 7  ;;  %v934_v50 = vld [vmem:[%s6120_s1 + $0x32] sm:$0x1] }
 0x7a3   :  { %v1155_v37 = vpop.permute.xlu0 %1154  ;;  %v1177_v4 = vadd.f32 %v1157_v59, %v1097_v55 }
 0x7a4   :  { %v1176_v60 = vadd.f32 %v1155_v37, %v1096_v51  ;;  %v1305_v26 = vsel %vm403_vm2, %v1304_v34, %v1174_v43 }
 0x7a5   :  { %v1308_v38 = vrot.slane %v1177_v4, 5 }
 0x7a6   :  { %3928 = vtanh.f32 %v1176_v60  ;;  %v1159_v61 = vpop.permute.xlu1 %1158  ;;  %v1306_v35 = vrot.slane %v1176_v60, 6 }
 0x7a7   :  { %v1163_v8 = vpop.permute.xlu0 %1162  ;;  %3930 = vtanh.f32 %v1177_v4  ;;  %v1178_v14 = vadd.f32 %v1159_v61, %v1098_v9 }
 0x7a8   :  { %v3925_v53 = vpop.eup %3924  ;;  %v1180_v13 = vadd.f32 %v1163_v8, %v1100_v7  ;;  %v1307_v0 = vsel %vm406_vm3, %v1306_v35, %v1305_v26 }
 0x7a9   :  { %1198 = vrot.lane.b32.xlu0 %v3925_v53, %s4336_s9  ;;  %v1310_v39 = vrot.slane %v1178_v14, 4  ;;  %v1309_v47 = vsel %vm409_vm4, %v1308_v38, %v1307_v0 }
 0x7aa   :  { %3932 = vtanh.f32 %v1180_v13  ;;  %v1161_v18 = vpop.permute.xlu1 %1160  ;;  %v1314_v55 = vrot.slane %v1180_v13, 2 }
 0x7ab   :  { %3934 = vtanh.f32 %v1178_v14  ;;  %v1179_v21 = vadd.f32 %v1161_v18, %v1099_v15  ;;  %v1311_v43 = vsel %vm412_vm5, %v1310_v39, %v1309_v47  ;;  %v1241_v60 = vpop.permute.xlu0 %1240 }
 0x7ac   :  { %v3927_v56 = vpop.eup %3926 }
 0x7ad   :  { %1200 = vrot.lane.b32.xlu0 %v3927_v56, %s4336_s9  ;;  %3936 = vtanh.f32 %v1179_v21  ;;  %v1312_v44 = vrot.slane %v1179_v21, 3 }
 0x7ae   :  { %v1165_v29 = vpop.permute.xlu1 %1164 }
 0x7af   :  { %v1181_v30 = vadd.f32 %v1165_v29, %v1101_v24  ;;  %v1313_v53 = vsel %vm415_vm6, %v1312_v44, %v1311_v43  ;;  %v1243_v4 = vpop.permute.xlu0 %1242 }
 0x7b0   :  { %v3929_v28 = vpop.eup %3928  ;;  %v1315_v37 = vsel %vm418_vm7, %v1314_v55, %v1313_v53 }
 0x7b1   :  { %1202 = vrot.lane.b32.xlu1 %v3929_v28, %s4336_s9  ;;  %v3931_v31 = vpop.eup %3930  ;;  %3938 = vtanh.f32 %v1181_v30  ;;  %v1316_v51 = vrot.slane %v1181_v30, 1 }
 0x7b2   :  { %v1245_v7 = vpop.permute.xlu1 %1244 }
 0x7b3   :  { %v1317_v59 = vsel %vm421_vm8, %v1316_v51, %v1315_v37  ;;  %v1239_v8 = vpop.permute.xlu0 %1238 }
 0x7b4   :  { %v3933_v32 = vpop.eup %3932 }
 0x7b5   :  { %1204 = vrot.lane.b32.xlu1 %v3931_v31, %s4336_s9  ;;  %1210 = vrot.lane.b32.xlu0 %v3933_v32, %s4336_s9  ;;  %v3935_v36 = vpop.eup %3934 }
 0x7b6   :  { %v1247_v9 = vpop.permute.xlu1 %1246 }
 0x7b7   :  { %v3937_v40 = vpop.eup %3936 }
 0x7b9   :  { %1206 = vrot.lane.b32.xlu1 %v3935_v36, %s4336_s9 }
 0x7ba   :  { %v1249_v14 = vpop.permute.xlu1 %1248 }
 0x7bb   :  { %v3939_v48 = vpop.eup %3938 }
 0x7bc   :  { %1212 = vrot.lane.b32.xlu0 %v3939_v48, %s4336_s9 }
 0x7bd   :  { %1208 = vrot.lane.b32.xlu1 %v3937_v40, %s4336_s9 }
 0x7c0   :  { %1250 = vrot.lane.b32.xlu0 %v934_v50, %s4337_s16 }
 0x7c1   :  { %1252 = vrot.lane.b32.xlu1 %v935_v49, %s4337_s16 }
 0x7c5   :  { %1318 = vrot.lane.b32.xlu1 %v1317_v59, %s4338_s6 }
 0x81b   :  { %v1199_v61 = vpop.permute.xlu0 %1198 }
 0x81c   :  { %v1222_v31 = vmul.f32 %v4829_v2, %v1199_v61  ;;  %v1354_v61 = vld [vmem:[%s6119_s0 + $0x3] sm:$0x1] }
 0x81f   :  { %v1201_v56 = vpop.permute.xlu0 %1200 }
 0x820   :  { %v1223_v13 = vmul.f32 %v4833_v54, %v1201_v56 }
 0x822   :  { %v4920_v28 = vadd.f32 %v1241_v60, %v1223_v13 }
 0x823   :  { %v1203_v15 = vpop.permute.xlu1 %1202 }
 0x824   :  { %v1224_v18 = vmul.f32 %v4837_v3, %v1203_v15  ;;  %v1278_v36 = vrot.slane %v4920_v28, 7 }
 0x826   :  { %v4922_v29 = vadd.f32 %v1243_v4, %v1224_v18 }
 0x827   :  { %v1205_v21 = vpop.permute.xlu1 %1204  ;;  %v1211_v34 = vpop.permute.xlu0 %1210 }
 0x828   :  { %v1225_v24 = vmul.f32 %v4839_v20, %v1205_v21  ;;  %v1280_v3 = vrot.slane %v4922_v29, 6  ;;  %v4932_v20 = vadd.f32 %v1239_v8, %v1222_v31  ;;  %v1228_v48 = vmul.f32 %v4844_v23, %v1211_v34  ;;  %v1355_v21 = vld [vmem:[%s6119_s0 + $0xb] sm:$0x1]  ;;  %v1358_v34 = vld [vmem:[%s6119_s0 + $0x23] sm:$0x1] }
 0x82a   :  { %v4925_v32 = vadd.f32 %v1245_v7, %v1225_v24  ;;  %v1279_v40 = vsel %vm403_vm2, %v1278_v36, %v4932_v20  ;;  %v1356_v24 = vld [vmem:[%s6119_s0 + $0x13] sm:$0x1] }
 0x82b   :  { %v1207_v30 = vpop.permute.xlu1 %1206  ;;  %v1281_v44 = vsel %vm406_vm3, %v1280_v3, %v1279_v40  ;;  %v1357_v3 = vld [vmem:[%s6119_s0 + $0x1b] sm:$0x1] }
 0x82c   :  { %v1226_v35 = vmul.f32 %v4847_v12, %v1207_v30  ;;  %v1282_v0 = vrot.slane %v4925_v32, 5 }
 0x82e   :  { %v4929_v54 = vadd.f32 %v1247_v9, %v1226_v35  ;;  %v1213_v38 = vpop.permute.xlu0 %1212  ;;  %v1283_v43 = vsel %vm409_vm4, %v1282_v0, %v1281_v44 }
 0x82f   :  { %v1209_v26 = vpop.permute.xlu1 %1208  ;;  %v1229_v12 = vmul.f32 %v4864_v25, %v1213_v38 }
 0x830   :  { %v1227_v39 = vmul.f32 %v4856_v17, %v1209_v26  ;;  %v1284_v2 = vrot.slane %v4929_v54, 4 }
 0x832   :  { %v4940_v47 = vadd.f32 %v1249_v14, %v1227_v39  ;;  %v1251_v51 = vpop.permute.xlu0 %1250  ;;  %v1285_v55 = vsel %vm412_vm5, %v1284_v2, %v1283_v43  ;;  %v1360_v39 = vld [vmem:[%s6119_s0 + $0x33] sm:$0x1]  ;;  %v1361_v43 = vld [vmem:[%s6119_s0 + $0x3b] sm:$0x1] }
 0x833   :  { %v1253_v49 = vpop.permute.xlu1 %1252  ;;  %v4948_v53 = vadd.f32 %v1251_v51, %v1228_v48 }
 0x834   :  { %v1286_v50 = vrot.slane %v4940_v47, 3  ;;  %v4946_v17 = vadd.f32 %v1253_v49, %v1229_v12  ;;  %v1359_v12 = vld [vmem:[%s6119_s0 + $0x2b] sm:$0x1] }
 0x835   :  { %v1288_v59 = vrot.slane %v4948_v53, 2 }
 0x836   :  { %v1290_v25 = vrot.slane %v4946_v17, 1  ;;  %v1287_v37 = vsel %vm415_vm6, %v1286_v50, %v1285_v55 }
 0x837   :  { %v1319_v60 = vpop.permute.xlu1 %1318  ;;  %v1289_v23 = vsel %vm418_vm7, %v1288_v59, %v1287_v37 }
 0x838   :  { %1321 = vst.msk [vmem:[#allocation3] sm:$0xff] %vm24_vm1, %v1319_v60  ;;  %v1291_v4 = vsel %vm421_vm8, %v1290_v25, %v1289_v23 }
 0x839   :  { %1292 = vrot.lane.b32.xlu0 %v1291_v4, %s4337_s16 }
 0x83f   :  { %v1371_v60 = vld [vmem:[#allocation3] sm:$0xff] }
 0x840   :  { %v1497_v4 = vrot.slane %v1371_v60, 1 }
 0x8ab   :  { %v1293_v7 = vpop.permute.xlu0 %1292 }
 0x8ac   :  { %1295 = vst.msk [vmem:[#allocation2] sm:$0xff] %vm24_vm1, %v1293_v7 }
 0x8b3   :  { %v1370_v8 = vld [vmem:[#allocation2] sm:$0xff] }
 0x8b4   :  { %v1372_v9 = vpack.c.bf16 %v1370_v8, %v1370_v8  ;;  %v1498_v8 = vrot.slane %v1371_v60, 2 }
 0x8b6   :  { %3701 = vmatmul.mubr.msk.bf16.vlgmr.msra.gmra.mrb[4].mxu1 %vm24_vm1, %v1372_v9  ;;  %v1502_v9 = vrot.slane %v1371_v60, 6 }
 0x8b7   :  { %3713 = vmatpush3.bf16.msra.mxu1 %v4772_v33  ;;  %3716 = vmatprep.mubr.msk.bf16.mxu1 %vm4335_vm0, %v6125_v1 }
 0x8b8   :  { %3714 = vmatprep.subr.bf16.mxu1 %v6125_v1 }
 0x8bb   :  { %3715 = vmatpush3.bf16.msra.mxu1 %v4781_v22 }
 0x8bc   :  { %3728 = vmatprep.subr.bf16.mxu1 %v6125_v1 }
 0x989   :  { %v1410_v14 = vpop.f32.mrb[4].mxu1 }
 0x98a   :  { %v3702_v56 = vpop.f32.mrb[5].mxu1  ;;  %v4969_v15 = vadd.f32 %v1410_v14, %v1354_v61  ;;  %v1417_v33 = vrot.slane %v1410_v14, 1  ;;  %v1418_v22 = vrot.slane %v1410_v14, 2  ;;  %v1420_v30 = vrot.slane %v1410_v14, 4 }
 0x98b   :  { %v1413_v13 = vpop.f32.mrb[6].mxu1  ;;  %v1419_v35 = vrot.slane %v1410_v14, 3  ;;  %v1422_v26 = vrot.slane %v1410_v14, 6  ;;  %v1421_v2 = vrot.slane %v1410_v14, 5  ;;  %v1423_v48 = vrot.slane %v1410_v14, 7 }
 0x98c   :  { %v3703_v18 = vpop.f32.mrb[7].mxu1  ;;  %3940 = vtanh.f32 %v4969_v15  ;;  %v1433_v31 = vadd.f32 %v1417_v33, %v1355_v21  ;;  %v1434_v36 = vadd.f32 %v1418_v22, %v1356_v24  ;;  %v1436_v0 = vadd.f32 %v1420_v30, %v1358_v34 }
 0x98d   :  { %v1435_v40 = vadd.f32 %v1419_v35, %v1357_v3  ;;  %v1438_v44 = vadd.f32 %v1422_v26, %v1360_v39  ;;  %v1437_v49 = vadd.f32 %v1421_v2, %v1359_v12  ;;  %v1439_v50 = vadd.f32 %v1423_v48, %v1361_v43 }
 0x98e   :  { %3942 = vtanh.f32 %v1433_v31  ;;  %v1499_v61 = vrot.slane %v1371_v60, 3  ;;  %v1503_v14 = vrot.slane %v1371_v60, 7  ;;  %v1500_v56 = vrot.slane %v1371_v60, 4 }
 0x98f   :  { %3944 = vtanh.f32 %v1434_v36  ;;  %v1501_v13 = vrot.slane %v1371_v60, 5  ;;  %v3604_v18 = vmul.f32 -1.442695, %v4969_v15  ;;  %v3605_v33 = vmul.f32 -1.442695, %v1433_v31 }
 0x990   :  { %3946 = vtanh.f32 %v1436_v0  ;;  %v3606_v21 = vmul.f32 -1.442695, %v1434_v36  ;;  %v3607_v24 = vmul.f32 -1.442695, %v1435_v40  ;;  %v3610_v30 = vmul.f32 -1.442695, %v1438_v44 }
 0x991   :  { %3948 = vtanh.f32 %v1435_v40  ;;  %v3608_v35 = vmul.f32 -1.442695, %v1436_v0  ;;  %v3609_v3 = vmul.f32 -1.442695, %v1437_v49 }
 0x992   :  { %3950 = vtanh.f32 %v1438_v44 }
 0x993   :  { %3952 = vtanh.f32 %v1437_v49 }
 0x994   :  { %3954 = vtanh.f32 %v1439_v50 }
 0x995   :  { %3956 = vpow2.f32 %v3604_v18 }
 0x996   :  { %v3941_v38 = vpop.eup %3940  ;;  %3958 = vpow2.f32 %v3605_v33 }
 0x997   :  { %1544 = vrot.lane.b32.xlu0 %v3941_v38, %s4336_s9  ;;  %3960 = vpow2.f32 %v3606_v21  ;;  %v3611_v38 = vmul.f32 -1.442695, %v1439_v50 }
 0x998   :  { %v3943_v51 = vpop.eup %3942  ;;  %3962 = vpow2.f32 %v3607_v24  ;;  %v1363_v24 = vld [vmem:[%s6120_s1 + $0xb] sm:$0x1] }
 0x999   :  { %v3945_v55 = vpop.eup %3944  ;;  %3964 = vpow2.f32 %v3610_v30 }
 0x99a   :  { %1548 = vrot.lane.b32.xlu1 %v3945_v55, %s4336_s9  ;;  %v3947_v25 = vpop.eup %3946 }
 0x99b   :  { %1546 = vrot.lane.b32.xlu0 %v3943_v51, %s4336_s9  ;;  %v3949_v37 = vpop.eup %3948 }
 0x99c   :  { %v3951_v59 = vpop.eup %3950 }
 0x99d   :  { %v3953_v23 = vpop.eup %3952 }
 0x99e   :  { %1550 = vrot.lane.b32.xlu1 %v3949_v37, %s4336_s9  ;;  %v3955_v7 = vpop.eup %3954 }
 0x99f   :  { %1552 = vrot.lane.b32.xlu0 %v3947_v25, %s4336_s9  ;;  %v3957_v22 = vpop.eup %3956 }
 0x9a0   :  { %v1464_v34 = vadd.f32 1.0, %v3957_v22  ;;  %v3959_v26 = vpop.eup %3958 }
 0x9a1   :  { %v1465_v39 = vadd.f32 1.0, %v3959_v26  ;;  %v3961_v15 = vpop.eup %3960 }
 0x9a2   :  { %1554 = vrot.lane.b32.xlu1 %v3953_v23, %s4336_s9  ;;  %3966 = vrcp.f32 %v1464_v34  ;;  %v3963_v2 = vpop.eup %3962  ;;  %v1466_v36 = vadd.f32 1.0, %v3961_v15  ;;  %v1365_v15 = vld [vmem:[%s6120_s1 + $0x1b] sm:$0x1] }
 0x9a3   :  { %1556 = vrot.lane.b32.xlu0 %v3951_v59, %s4336_s9  ;;  %3968 = vpow2.f32 %v3608_v35  ;;  %v3965_v31 = vpop.eup %3964  ;;  %v1467_v44 = vadd.f32 1.0, %v3963_v2  ;;  %v1366_v2 = vld [vmem:[%s6120_s1 + $0x23] sm:$0x1] }
 0x9a4   :  { %3970 = vpow2.f32 %v3609_v3  ;;  %v1470_v49 = vadd.f32 1.0, %v3965_v31  ;;  %v1364_v3 = vld [vmem:[%s6120_s1 + $0x13] sm:$0x1]  ;;  %v1367_v31 = vld [vmem:[%s6120_s1 + $0x2b] sm:$0x1] }
 0x9a5   :  { %3972 = vpow2.f32 %v3611_v38 }
 0x9a6   :  { %1558 = vrot.lane.b32.xlu1 %v3955_v7, %s4336_s9  ;;  %3974 = vrcp.f32 %v1465_v39  ;;  %v1362_v39 = vld [vmem:[%s6120_s1 + $0x3] sm:$0x1] }
 0x9a7   :  { %1506 = vrot.lane.b32.xlu0 %v1497_v4, %s4336_s9  ;;  %3976 = vrcp.f32 %v1466_v36 }
 0x9a8   :  { %3978 = vrcp.f32 %v1467_v44 }
 0x9a9   :  { %3980 = vrcp.f32 %v1470_v49 }
 0x9aa   :  { %1508 = vrot.lane.b32.xlu1 %v1498_v8, %s4336_s9 }
 0x9ab   :  { %1504 = vrot.lane.b32.xlu0 %v1371_v60, %s4336_s9 }
 0x9ac   :  { %v5010_v40 = vpop.eup %3966 }
 0x9ad   :  { %v3969_v48 = vpop.eup %3968 }
 0x9ae   :  { %1510 = vrot.lane.b32.xlu1 %v1499_v61, %s4336_s9  ;;  %v1468_v43 = vadd.f32 1.0, %v3969_v48  ;;  %v3971_v50 = vpop.eup %3970 }
 0x9af   :  { %1516 = vrot.lane.b32.xlu0 %v1502_v9, %s4336_s9  ;;  %v3973_v51 = vpop.eup %3972  ;;  %v1469_v55 = vadd.f32 1.0, %v3971_v50 }
 0x9b0   :  { %3982 = vrcp.f32 %v1468_v43  ;;  %v5014_v25 = vpop.eup %3974  ;;  %v1471_v23 = vadd.f32 1.0, %v3973_v51 }
 0x9b1   :  { %3984 = vrcp.f32 %v1469_v55  ;;  %v5018_v4 = vpop.eup %3976 }
 0x9b2   :  { %1512 = vrot.lane.b32.xlu1 %v1500_v56, %s4336_s9  ;;  %v5020_v8 = vpop.eup %3978  ;;  %3986 = vrcp.f32 %v1471_v23 }
 0x9b3   :  { %1518 = vrot.lane.b32.xlu0 %v1503_v14, %s4336_s9  ;;  %v5025_v56 = vpop.eup %3980 }
 0x9b6   :  { %1514 = vrot.lane.b32.xlu1 %v1501_v13, %s4336_s9 }
 0x9ba   :  { %v5028_v18 = vpop.eup %3982 }
 0x9bb   :  { %v5037_v30 = vpop.eup %3984 }
 0x9bc   :  { %v5045_v26 = vpop.eup %3986 }
 0xa09   :  { %v1545_v12 = vpop.permute.xlu0 %1544 }
 0xa0a   :  { %v1568_v0 = vmul.f32 %v5010_v40, %v1545_v12 }
 0xa0c   :  { %1584 = vrot.lane.b32.xlu0 %v1568_v0, %s4336_s9  ;;  %v1549_v59 = vpop.permute.xlu1 %1548 }
 0xa0d   :  { %v1547_v37 = vpop.permute.xlu0 %1546  ;;  %v1570_v9 = vmul.f32 %v5018_v4, %v1549_v59 }
 0xa0e   :  { %v1569_v60 = vmul.f32 %v5014_v25, %v1547_v37 }
 0xa10   :  { %1586 = vrot.lane.b32.xlu0 %v1569_v60, %s4336_s9  ;;  %v1551_v61 = vpop.permute.xlu1 %1550 }
 0xa11   :  { %v1553_v7 = vpop.permute.xlu0 %1552  ;;  %v1571_v14 = vmul.f32 %v5020_v8, %v1551_v61 }
 0xa12   :  { %v1572_v22 = vmul.f32 %v5028_v18, %v1553_v7 }
 0xa13   :  { %1590 = vrot.lane.b32.xlu1 %v1571_v14, %s4336_s9 }
 0xa14   :  { %1588 = vrot.lane.b32.xlu0 %v1570_v9, %s4336_s9  ;;  %v1555_v33 = vpop.permute.xlu1 %1554 }
 0xa15   :  { %v1557_v13 = vpop.permute.xlu0 %1556  ;;  %v1573_v34 = vmul.f32 %v5037_v30, %v1555_v33 }
 0xa16   :  { %v1574_v21 = vmul.f32 %v5025_v56, %v1557_v13 }
 0xa17   :  { %1592 = vrot.lane.b32.xlu1 %v1572_v22, %s4336_s9 }
 0xa18   :  { %1596 = vrot.lane.b32.xlu0 %v1574_v21, %s4336_s9  ;;  %v1559_v35 = vpop.permute.xlu1 %1558 }
 0xa19   :  { %v1575_v38 = vmul.f32 %v5045_v26, %v1559_v35  ;;  %v1507_v36 = vpop.permute.xlu0 %1506 }
 0xa1a   :  { %v1529_v37 = vmul.f32 %v5014_v25, %v1507_v36 }
 0xa1b   :  { %1594 = vrot.lane.b32.xlu1 %v1573_v34, %s4336_s9 }
 0xa1c   :  { %1674 = vrot.lane.b32.xlu0 %v1363_v24, %s4337_s16  ;;  %v1509_v48 = vpop.permute.xlu1 %1508 }
 0xa1d   :  { %v1505_v12 = vpop.permute.xlu0 %1504  ;;  %v1530_v7 = vmul.f32 %v5018_v4, %v1509_v48 }
 0xa1e   :  { %v1528_v43 = vmul.f32 %v5010_v40, %v1505_v12 }
 0xa1f   :  { %1598 = vrot.lane.b32.xlu1 %v1575_v38, %s4336_s9 }
 0xa20   :  { %1676 = vrot.lane.b32.xlu0 %v1364_v3, %s4337_s16  ;;  %v1511_v49 = vpop.permute.xlu1 %1510 }
 0xa21   :  { %v1517_v44 = vpop.permute.xlu0 %1516  ;;  %v1531_v61 = vmul.f32 %v5020_v8, %v1511_v49 }
 0xa22   :  { %v1534_v22 = vmul.f32 %v5025_v56, %v1517_v44 }
 0xa23   :  { %1678 = vrot.lane.b32.xlu1 %v1365_v15, %s4337_s16 }
 0xa24   :  { %1672 = vrot.lane.b32.xlu0 %v1362_v39, %s4337_s16  ;;  %v1513_v55 = vpop.permute.xlu1 %1512 }
 0xa25   :  { %v1519_v0 = vpop.permute.xlu0 %1518  ;;  %v1532_v34 = vmul.f32 %v5028_v18, %v1513_v55 }
 0xa26   :  { %v1535_v36 = vmul.f32 %v5045_v26, %v1519_v0 }
 0xa27   :  { %1680 = vrot.lane.b32.xlu1 %v1366_v2, %s4337_s16 }
 0xa28   :  { %v1515_v60 = vpop.permute.xlu1 %1514 }
 0xa29   :  { %v1533_v15 = vmul.f32 %v5037_v30, %v1515_v60 }
 0xa2b   :  { %1682 = vrot.lane.b32.xlu1 %v1367_v31, %s4337_s16 }
 0xa7e   :  { %v1585_v50 = vpop.permute.xlu0 %1584 }
 0xa7f   :  { %v1608_v51 = vadd.f32 %v1585_v50, %v1528_v43 }
 0xa81   :  { %3988 = vtanh.f32 %v1608_v51 }
 0xa82   :  { %v1587_v59 = vpop.permute.xlu0 %1586 }
 0xa83   :  { %v1609_v23 = vadd.f32 %v1587_v59, %v1529_v37 }
 0xa85   :  { %3990 = vtanh.f32 %v1609_v23  ;;  %v1591_v13 = vpop.permute.xlu1 %1590  ;;  %v1738_v50 = vrot.slane %v1609_v23, 7  ;;  %v1369_v23 = vld [vmem:[%s6120_s1 + $0x3b] sm:$0x1] }
 0xa86   :  { %v1589_v14 = vpop.permute.xlu0 %1588  ;;  %v1611_v21 = vadd.f32 %v1591_v13, %v1531_v61 }
 0xa87   :  { %v1610_v33 = vadd.f32 %v1589_v14, %v1530_v7  ;;  %v1739_v59 = vsel %vm403_vm2, %v1738_v50, %v1608_v51 }
 0xa88   :  { %v1742_v60 = vrot.slane %v1611_v21, 5 }
 0xa89   :  { %3992 = vtanh.f32 %v1610_v33  ;;  %v1593_v35 = vpop.permute.xlu1 %1592  ;;  %v1740_v55 = vrot.slane %v1610_v33, 6  ;;  %v1368_v33 = vld [vmem:[%s6120_s1 + $0x33] sm:$0x1] }
 0xa8a   :  { %v1597_v24 = vpop.permute.xlu0 %1596  ;;  %3994 = vtanh.f32 %v1611_v21  ;;  %v1612_v38 = vadd.f32 %v1593_v35, %v1532_v34 }
 0xa8b   :  { %v3989_v9 = vpop.eup %3988  ;;  %v1614_v3 = vadd.f32 %v1597_v24, %v1534_v22  ;;  %v1741_v0 = vsel %vm406_vm3, %v1740_v55, %v1739_v59 }
 0xa8c   :  { %1632 = vrot.lane.b32.xlu0 %v3989_v9, %s4336_s9  ;;  %v1744_v7 = vrot.slane %v1612_v38, 4  ;;  %v1743_v61 = vsel %vm409_vm4, %v1742_v60, %v1741_v0 }
 0xa8d   :  { %3996 = vtanh.f32 %v1614_v3  ;;  %v1595_v2 = vpop.permute.xlu1 %1594  ;;  %v1748_v24 = vrot.slane %v1614_v3, 2 }
 0xa8e   :  { %3998 = vtanh.f32 %v1612_v38  ;;  %v1613_v31 = vadd.f32 %v1595_v2, %v1533_v15  ;;  %v1745_v51 = vsel %vm412_vm5, %v1744_v7, %v1743_v61  ;;  %v1675_v38 = vpop.permute.xlu0 %1674 }
 0xa8f   :  { %v3991_v39 = vpop.eup %3990 }
 0xa90   :  { %1634 = vrot.lane.b32.xlu0 %v3991_v39, %s4336_s9  ;;  %4000 = vtanh.f32 %v1613_v31  ;;  %v1746_v14 = vrot.slane %v1613_v31, 3 }
 0xa91   :  { %v1599_v44 = vpop.permute.xlu1 %1598 }
 0xa92   :  { %v1615_v48 = vadd.f32 %v1599_v44, %v1535_v36  ;;  %v1747_v22 = vsel %vm415_vm6, %v1746_v14, %v1745_v51  ;;  %v1677_v39 = vpop.permute.xlu0 %1676 }
 0xa93   :  { %v3993_v12 = vpop.eup %3992  ;;  %v1749_v34 = vsel %vm418_vm7, %v1748_v24, %v1747_v22 }
 0xa94   :  { %1636 = vrot.lane.b32.xlu1 %v3993_v12, %s4336_s9  ;;  %v3995_v49 = vpop.eup %3994  ;;  %4002 = vtanh.f32 %v1615_v48  ;;  %v1750_v21 = vrot.slane %v1615_v48, 1 }
 0xa95   :  { %v1679_v15 = vpop.permute.xlu1 %1678 }
 0xa96   :  { %v1751_v35 = vsel %vm421_vm8, %v1750_v21, %v1749_v34  ;;  %v1673_v2 = vpop.permute.xlu0 %1672 }
 0xa97   :  { %v3997_v43 = vpop.eup %3996 }
 0xa98   :  { %1638 = vrot.lane.b32.xlu1 %v3995_v49, %s4336_s9  ;;  %1644 = vrot.lane.b32.xlu0 %v3997_v43, %s4336_s9  ;;  %v3999_v37 = vpop.eup %3998 }
 0xa99   :  { %v1681_v31 = vpop.permute.xlu1 %1680 }
 0xa9a   :  { %v4001_v9 = vpop.eup %4000 }
 0xa9c   :  { %1640 = vrot.lane.b32.xlu1 %v3999_v37, %s4336_s9 }
 0xa9d   :  { %v1683_v12 = vpop.permute.xlu1 %1682 }
 0xa9e   :  { %v4003_v13 = vpop.eup %4002 }
 0xa9f   :  { %1646 = vrot.lane.b32.xlu0 %v4003_v13, %s4336_s9 }
 0xaa0   :  { %1642 = vrot.lane.b32.xlu1 %v4001_v9, %s4336_s9 }
 0xaa3   :  { %1684 = vrot.lane.b32.xlu0 %v1368_v33, %s4337_s16 }
 0xaa4   :  { %1686 = vrot.lane.b32.xlu1 %v1369_v23, %s4337_s16 }
 0xaa8   :  { %1752 = vrot.lane.b32.xlu1 %v1751_v35, %s4338_s6 }
 0xafe   :  { %v1633_v36 = vpop.permute.xlu0 %1632 }
 0xaff   :  { %v1656_v0 = vmul.f32 %v5010_v40, %v1633_v36 }
 0xb02   :  { %v1635_v44 = vpop.permute.xlu0 %1634 }
 0xb03   :  { %v1657_v3 = vmul.f32 %v5014_v25, %v1635_v44 }
 0xb05   :  { %v5101_v55 = vadd.f32 %v1675_v38, %v1657_v3 }
 0xb06   :  { %v1637_v48 = vpop.permute.xlu1 %1636 }
 0xb07   :  { %v1658_v49 = vmul.f32 %v5018_v4, %v1637_v48  ;;  %v1712_v61 = vrot.slane %v5101_v55, 7 }
 0xb09   :  { %v5103_v37 = vadd.f32 %v1677_v39, %v1658_v49 }
 0xb0a   :  { %v1639_v43 = vpop.permute.xlu1 %1638  ;;  %v1645_v7 = vpop.permute.xlu0 %1644 }
 0xb0b   :  { %v1659_v50 = vmul.f32 %v5020_v8, %v1639_v43  ;;  %v1714_v4 = vrot.slane %v5103_v37, 6  ;;  %v5113_v8 = vadd.f32 %v1673_v2, %v1656_v0  ;;  %v1662_v24 = vmul.f32 %v5025_v56, %v1645_v7  ;;  %v5144_v43 = vld [vmem:[%s6121_s2] sm:$0xff]  }
 0xb0d   :  { %v5106_v60 = vadd.f32 %v1679_v15, %v1659_v50  ;;  %v1713_v33 = vsel %vm403_vm2, %v1712_v61, %v5113_v8  ;;  %v5153_v50 = vld [vmem:[%s6121_s2 + $0x8] sm:$0xff]  }
 0xb0e   :  { %v1641_v59 = vpop.permute.xlu1 %1640  ;;  %v1715_v22 = vsel %vm406_vm3, %v1714_v4, %v1713_v33 }
 0xb0f   :  { %v1660_v9 = vmul.f32 %v5028_v18, %v1641_v59  ;;  %v1716_v13 = vrot.slane %v5106_v60, 5  ;;  %v1788_v59 = vld [vmem:[%s6119_s0 + $0x4] sm:$0x1] }
 0xb11   :  { %v5110_v25 = vadd.f32 %v1681_v31, %v1660_v9  ;;  %v1647_v23 = vpop.permute.xlu0 %1646  ;;  %v1717_v35 = vsel %vm409_vm4, %v1716_v13, %v1715_v22  ;;  %v1789_v13 = vld [vmem:[%s6119_s0 + $0xc] sm:$0x1] }
 0xb12   :  { %v1643_v14 = vpop.permute.xlu1 %1642  ;;  %v1663_v18 = vmul.f32 %v5045_v26, %v1647_v23 }
 0xb13   :  { %v1661_v51 = vmul.f32 %v5037_v30, %v1643_v14  ;;  %v1718_v40 = vrot.slane %v5110_v25, 4 }
 0xb15   :  { %v5121_v21 = vadd.f32 %v1683_v12, %v1661_v51  ;;  %v1685_v39 = vpop.permute.xlu0 %1684  ;;  %v1719_v2 = vsel %vm412_vm5, %v1718_v40, %v1717_v35  ;;  %v1790_v51 = vld [vmem:[%s6119_s0 + $0x14] sm:$0x1] }
 0xb16   :  { %v1687_v34 = vpop.permute.xlu1 %1686  ;;  %v5129_v15 = vadd.f32 %v1685_v39, %v1662_v24 }
 0xb17   :  { %v1720_v38 = vrot.slane %v5121_v21, 3  ;;  %v5127_v30 = vadd.f32 %v1687_v34, %v1663_v18  ;;  %v1792_v18 = vld [vmem:[%s6119_s0 + $0x24] sm:$0x1]  ;;  %v1791_v34 = vld [vmem:[%s6119_s0 + $0x1c] sm:$0x1] }
 0xb18   :  { %v1722_v36 = vrot.slane %v5129_v15, 2 }
 0xb19   :  { %v1724_v26 = vrot.slane %v5127_v30, 1  ;;  %v1721_v31 = vsel %vm415_vm6, %v1720_v38, %v1719_v2  ;;  %v1794_v2 = vld [vmem:[%s6119_s0 + $0x34] sm:$0x1] }
 0xb1a   :  { %v1753_v12 = vpop.permute.xlu1 %1752  ;;  %v1723_v56 = vsel %vm418_vm7, %v1722_v36, %v1721_v31  ;;  %v1793_v36 = vld [vmem:[%s6119_s0 + $0x2c] sm:$0x1] }
 0xb1b   :  { %1755 = vst.msk [vmem:[#allocation3] sm:$0xff] %vm24_vm1, %v1753_v12  ;;  %v1725_v44 = vsel %vm421_vm8, %v1724_v26, %v1723_v56 }
 0xb1c   :  { %1726 = vrot.lane.b32.xlu0 %v1725_v44, %s4337_s16 }
 0xb8e   :  { %v1727_v48 = vpop.permute.xlu0 %1726 }
 0xb8f   :  { %1729 = vst.msk [vmem:[#allocation2] sm:$0xff] %vm24_vm1, %v1727_v48  ;;  %v1795_v48 = vld [vmem:[%s6119_s0 + $0x3c] sm:$0x1] }
 0xb96   :  { %v1804_v3 = vld [vmem:[#allocation2] sm:$0xff] }
 0xb97   :  { %v1806_v49 = vpack.c.bf16 %v1804_v3, %v1804_v3 }
 0xb99   :  { %3709 = vmatmul.mubr.msk.bf16.vlgmr.msra.gmra.mrb[8].mxu0 %vm24_vm1, %v1806_v49 }
 0xb9a   :  { %3721 = vmatpush3.bf16.msra.mxu0 %v5144_v43  ;;  %3724 = vmatprep.mubr.msk.bf16.mxu0 %vm4335_vm0, %v6125_v1 }
 0xb9b   :  { %3722 = vmatprep.subr.bf16.mxu0 %v6125_v1 }
 0xb9e   :  { %3723 = vmatpush3.bf16.msra.mxu0 %v5153_v50 }
 0xc6c   :  { %v1844_v0 = vpop.f32.mrb[8].mxu0 }
 0xc6d   :  { %v3710_v7 = vpop.f32.mrb[9].mxu0  ;;  %v5159_v9 = vadd.f32 %v1844_v0, %v1788_v59  ;;  %v1851_v14 = vrot.slane %v1844_v0, 1  ;;  %v1852_v23 = vrot.slane %v1844_v0, 2  ;;  %v1854_v40 = vrot.slane %v1844_v0, 4 }
 0xc6e   :  { %v1847_v61 = vpop.f32.mrb[10].mxu0  ;;  %v1853_v22 = vrot.slane %v1844_v0, 3  ;;  %v1856_v35 = vrot.slane %v1844_v0, 6  ;;  %v1855_v26 = vrot.slane %v1844_v0, 5  ;;  %v1857_v56 = vrot.slane %v1844_v0, 7 }
 0xc6f   :  { %v3711_v4 = vpop.f32.mrb[11].mxu0  ;;  %4004 = vtanh.f32 %v5159_v9  ;;  %v1867_v33 = vadd.f32 %v1851_v14, %v1789_v13  ;;  %v1868_v24 = vadd.f32 %v1852_v23, %v1790_v51  ;;  %v1870_v38 = vadd.f32 %v1854_v40, %v1792_v18 }
 0xc70   :  { %v1869_v31 = vadd.f32 %v1853_v22, %v1791_v34  ;;  %v1872_v12 = vadd.f32 %v1856_v35, %v1794_v2  ;;  %v1871_v44 = vadd.f32 %v1855_v26, %v1793_v36  ;;  %v1873_v3 = vadd.f32 %v1857_v56, %v1795_v48  ;;  %v1805_v4 = vld [vmem:[#allocation3] sm:$0xff] }
 0xc71   :  { %4006 = vtanh.f32 %v1867_v33  ;;  %v1931_v13 = vrot.slane %v1805_v4, 1  ;;  %v1932_v51 = vrot.slane %v1805_v4, 2  ;;  %v1936_v40 = vrot.slane %v1805_v4, 6 }
 0xc72   :  { %4008 = vtanh.f32 %v1868_v24  ;;  %v1933_v18 = vrot.slane %v1805_v4, 3  ;;  %v1937_v22 = vrot.slane %v1805_v4, 7  ;;  %v1934_v34 = vrot.slane %v1805_v4, 4 }
 0xc73   :  { %4010 = vtanh.f32 %v1870_v38  ;;  %v1935_v35 = vrot.slane %v1805_v4, 5  ;;  %v3614_v2 = vmul.f32 -1.442695, %v1867_v33  ;;  %v3615_v26 = vmul.f32 -1.442695, %v1868_v24 }
 0xc74   :  { %4012 = vtanh.f32 %v1869_v31  ;;  %v3616_v56 = vmul.f32 -1.442695, %v1869_v31  ;;  %v3619_v48 = vmul.f32 -1.442695, %v1872_v12 }
 0xc75   :  { %4014 = vtanh.f32 %v1872_v12 }
 0xc76   :  { %4016 = vtanh.f32 %v1871_v44 }
 0xc77   :  { %4018 = vtanh.f32 %v1873_v3 }
 0xc79   :  { %v4005_v39 = vpop.eup %4004 }
 0xc7a   :  { %1978 = vrot.lane.b32.xlu0 %v4005_v39, %s4336_s9  ;;  %v3613_v39 = vmul.f32 -1.442695, %v5159_v9 }
 0xc7b   :  { %v4007_v49 = vpop.eup %4006 }
 0xc7c   :  { %v4009_v59 = vpop.eup %4008  ;;  %4020 = vpow2.f32 %v3613_v39 }
 0xc7d   :  { %1982 = vrot.lane.b32.xlu1 %v4009_v59, %s4336_s9  ;;  %v4011_v7 = vpop.eup %4010  ;;  %4022 = vpow2.f32 %v3614_v2  ;;  %v3617_v59 = vmul.f32 -1.442695, %v1870_v38 }
 0xc7e   :  { %1980 = vrot.lane.b32.xlu0 %v4007_v49, %s4336_s9  ;;  %v4013_v61 = vpop.eup %4012  ;;  %4024 = vpow2.f32 %v3615_v26 }
 0xc7f   :  { %v4015_v0 = vpop.eup %4014  ;;  %4026 = vpow2.f32 %v3616_v56 }
 0xc80   :  { %v4017_v14 = vpop.eup %4016  ;;  %4028 = vpow2.f32 %v3619_v48 }
 0xc81   :  { %1984 = vrot.lane.b32.xlu1 %v4013_v61, %s4336_s9  ;;  %v4019_v23 = vpop.eup %4018 }
 0xc82   :  { %1986 = vrot.lane.b32.xlu0 %v4011_v7, %s4336_s9  ;;  %v3618_v7 = vmul.f32 -1.442695, %v1871_v44 }
 0xc85   :  { %1988 = vrot.lane.b32.xlu1 %v4017_v14, %s4336_s9 }
 0xc86   :  { %1990 = vrot.lane.b32.xlu0 %v4015_v0, %s4336_s9  ;;  %v4021_v36 = vpop.eup %4020  ;;  %v3620_v0 = vmul.f32 -1.442695, %v1873_v3 }
 0xc87   :  { %v1898_v49 = vadd.f32 1.0, %v4021_v36  ;;  %v4023_v61 = vpop.eup %4022 }
 0xc88   :  { %v4025_v9 = vpop.eup %4024 }
 0xc89   :  { %1992 = vrot.lane.b32.xlu1 %v4019_v23, %s4336_s9  ;;  %4030 = vrcp.f32 %v1898_v49  ;;  %v4027_v14 = vpop.eup %4026  ;;  %v1900_v24 = vadd.f32 1.0, %v4025_v9 }
 0xc8a   :  { %1940 = vrot.lane.b32.xlu0 %v1931_v13, %s4336_s9  ;;  %4032 = vpow2.f32 %v3617_v59  ;;  %v4029_v33 = vpop.eup %4028  ;;  %v1901_v13 = vadd.f32 1.0, %v4027_v14 }
 0xc8b   :  { %4034 = vpow2.f32 %v3618_v7  ;;  %v1904_v44 = vadd.f32 1.0, %v4029_v33  ;;  %v1797_v33 = vld [vmem:[%s6120_s1 + $0xc] sm:$0x1] }
 0xc8c   :  { %4036 = vpow2.f32 %v3620_v0 }
 0xc8d   :  { %1942 = vrot.lane.b32.xlu1 %v1932_v51, %s4336_s9 }
 0xc8e   :  { %1938 = vrot.lane.b32.xlu0 %v1805_v4, %s4336_s9  ;;  %v1899_v4 = vadd.f32 1.0, %v4023_v61 }
 0xc90   :  { %4038 = vrcp.f32 %v1899_v4 }
 0xc91   :  { %1944 = vrot.lane.b32.xlu1 %v1933_v18, %s4336_s9  ;;  %4040 = vrcp.f32 %v1900_v24 }
 0xc92   :  { %1950 = vrot.lane.b32.xlu0 %v1936_v40, %s4336_s9  ;;  %4042 = vrcp.f32 %v1901_v13 }
 0xc93   :  { %v5200_v31 = vpop.eup %4030  ;;  %4044 = vrcp.f32 %v1904_v44 }
 0xc94   :  { %v4033_v23 = vpop.eup %4032 }
 0xc95   :  { %1946 = vrot.lane.b32.xlu1 %v1934_v34, %s4336_s9  ;;  %v1902_v3 = vadd.f32 1.0, %v4033_v23  ;;  %v4035_v51 = vpop.eup %4034  ;;  %v1798_v23 = vld [vmem:[%s6120_s1 + $0x14] sm:$0x1] }
 0xc96   :  { %1952 = vrot.lane.b32.xlu0 %v1937_v22, %s4336_s9  ;;  %v4037_v40 = vpop.eup %4036  ;;  %v1903_v18 = vadd.f32 1.0, %v4035_v51  ;;  %v1799_v51 = vld [vmem:[%s6120_s1 + $0x1c] sm:$0x1] }
 0xc97   :  { %4046 = vrcp.f32 %v1902_v3  ;;  %v1905_v2 = vadd.f32 1.0, %v4037_v40  ;;  %v1796_v3 = vld [vmem:[%s6120_s1 + $0x4] sm:$0x1] }
 0xc98   :  { %4048 = vrcp.f32 %v1903_v18  ;;  %v1800_v40 = vld [vmem:[%s6120_s1 + $0x24] sm:$0x1]  ;;  %v1801_v18 = vld [vmem:[%s6120_s1 + $0x2c] sm:$0x1] }
 0xc99   :  { %1948 = vrot.lane.b32.xlu1 %v1935_v35, %s4336_s9  ;;  %4050 = vrcp.f32 %v1905_v2 }
 0xc9a   :  { %v5204_v22 = vpop.eup %4038 }
 0xc9b   :  { %v5208_v26 = vpop.eup %4040 }
 0xc9c   :  { %v5210_v56 = vpop.eup %4042 }
 0xc9d   :  { %v5215_v7 = vpop.eup %4044 }
 0xca1   :  { %v5218_v0 = vpop.eup %4046 }
 0xca2   :  { %v5227_v24 = vpop.eup %4048 }
 0xcec   :  { %v1979_v12 = vpop.permute.xlu0 %1978 }
 0xced   :  { %v2002_v38 = vmul.f32 %v5200_v31, %v1979_v12 }
 0xcef   :  { %2018 = vrot.lane.b32.xlu0 %v2002_v38, %s4336_s9  ;;  %v1983_v35 = vpop.permute.xlu1 %1982  ;;  %v5235_v38 = vpop.eup %4050 }
 0xcf0   :  { %v1981_v34 = vpop.permute.xlu0 %1980  ;;  %v2004_v48 = vmul.f32 %v5208_v26, %v1983_v35 }
 0xcf1   :  { %v2003_v39 = vmul.f32 %v5204_v22, %v1981_v34 }
 0xcf3   :  { %2020 = vrot.lane.b32.xlu0 %v2003_v39, %s4336_s9  ;;  %v1985_v49 = vpop.permute.xlu1 %1984 }
 0xcf4   :  { %v1987_v36 = vpop.permute.xlu0 %1986  ;;  %v2005_v59 = vmul.f32 %v5210_v56, %v1985_v49 }
 0xcf5   :  { %v2006_v14 = vmul.f32 %v5218_v0, %v1987_v36 }
 0xcf6   :  { %2024 = vrot.lane.b32.xlu1 %v2005_v59, %s4336_s9 }
 0xcf7   :  { %2022 = vrot.lane.b32.xlu0 %v2004_v48, %s4336_s9  ;;  %v1989_v4 = vpop.permute.xlu1 %1988 }
 0xcf8   :  { %v1991_v61 = vpop.permute.xlu0 %1990  ;;  %v2007_v12 = vmul.f32 %v5227_v24, %v1989_v4 }
 0xcf9   :  { %v2008_v9 = vmul.f32 %v5215_v7, %v1991_v61 }
 0xcfa   :  { %2026 = vrot.lane.b32.xlu1 %v2006_v14, %s4336_s9 }
 0xcfb   :  { %2030 = vrot.lane.b32.xlu0 %v2008_v9, %s4336_s9  ;;  %v1993_v13 = vpop.permute.xlu1 %1992 }
 0xcfc   :  { %v2009_v44 = vmul.f32 %v5235_v38, %v1993_v13  ;;  %v1941_v34 = vpop.permute.xlu0 %1940 }
 0xcfd   :  { %v1963_v9 = vmul.f32 %v5204_v22, %v1941_v34 }
 0xcfe   :  { %2028 = vrot.lane.b32.xlu1 %v2007_v12, %s4336_s9 }
 0xcff   :  { %2108 = vrot.lane.b32.xlu0 %v1797_v33, %s4337_s16  ;;  %v1943_v2 = vpop.permute.xlu1 %1942 }
 0xd00   :  { %v1939_v35 = vpop.permute.xlu0 %1938  ;;  %v1964_v13 = vmul.f32 %v5208_v26, %v1943_v2 }
 0xd01   :  { %v1962_v49 = vmul.f32 %v5200_v31, %v1939_v35 }
 0xd02   :  { %2032 = vrot.lane.b32.xlu1 %v2009_v44, %s4336_s9 }
 0xd03   :  { %2110 = vrot.lane.b32.xlu0 %v1798_v23, %s4337_s16  ;;  %v1945_v48 = vpop.permute.xlu1 %1944 }
 0xd04   :  { %v1951_v39 = vpop.permute.xlu0 %1950  ;;  %v1965_v44 = vmul.f32 %v5210_v56, %v1945_v48 }
 0xd05   :  { %v1968_v35 = vmul.f32 %v5215_v7, %v1951_v39 }
 0xd06   :  { %2112 = vrot.lane.b32.xlu1 %v1799_v51, %s4337_s16 }
 0xd07   :  { %2106 = vrot.lane.b32.xlu0 %v1796_v3, %s4337_s16  ;;  %v1947_v4 = vpop.permute.xlu1 %1946 }
 0xd08   :  { %v1953_v36 = vpop.permute.xlu0 %1952  ;;  %v1966_v34 = vmul.f32 %v5218_v0, %v1947_v4 }
 0xd0a   :  { %2114 = vrot.lane.b32.xlu1 %v1800_v40, %s4337_s16 }
 0xd0b   :  { %v1949_v33 = vpop.permute.xlu1 %1948 }
 0xd0c   :  { %v1967_v48 = vmul.f32 %v5227_v24, %v1949_v33 }
 0xd0e   :  { %2116 = vrot.lane.b32.xlu1 %v1801_v18, %s4337_s16 }
 0xd61   :  { %v2019_v59 = vpop.permute.xlu0 %2018 }
 0xd62   :  { %v2042_v61 = vadd.f32 %v2019_v59, %v1962_v49 }
 0xd64   :  { %4052 = vtanh.f32 %v2042_v61 }
 0xd65   :  { %v2021_v14 = vpop.permute.xlu0 %2020 }
 0xd66   :  { %v2043_v12 = vadd.f32 %v2021_v14, %v1963_v9 }
 0xd68   :  { %4054 = vtanh.f32 %v2043_v12  ;;  %v2025_v51 = vpop.permute.xlu1 %2024 }
 0xd69   :  { %v2023_v3 = vpop.permute.xlu0 %2022  ;;  %v2045_v18 = vadd.f32 %v2025_v51, %v1965_v44 }
 0xd6a   :  { %v2044_v40 = vadd.f32 %v2023_v3, %v1964_v13 }
 0xd6c   :  { %4056 = vtanh.f32 %v2044_v40  ;;  %v2027_v59 = vpop.permute.xlu1 %2026 }
 0xd6d   :  { %v2031_v49 = vpop.permute.xlu0 %2030  ;;  %4058 = vtanh.f32 %v2045_v18  ;;  %v2046_v2 = vadd.f32 %v2027_v59, %v1966_v34  ;;  %v2176_v34 = vrot.slane %v2045_v18, 5 }
 0xd6e   :  { %v4053_v23 = vpop.eup %4052  ;;  %v2048_v9 = vadd.f32 %v2031_v49, %v1968_v35  ;;  %v2172_v35 = vrot.slane %v2043_v12, 7  ;;  %v2174_v49 = vrot.slane %v2044_v40, 6  ;;  %v1803_v12 = vld [vmem:[%s6120_s1 + $0x3c] sm:$0x1]  ;;  %v1802_v40 = vld [vmem:[%s6120_s1 + $0x34] sm:$0x1] }
 0xd6f   :  { %2066 = vrot.lane.b32.xlu0 %v4053_v23, %s4336_s9  ;;  %v1969_v23 = vmul.f32 %v5235_v38, %v1953_v36  ;;  %v2178_v59 = vrot.slane %v2046_v2, 4 }
 0xd70   :  { %4060 = vtanh.f32 %v2048_v9  ;;  %v2029_v1 = vpop.permute.xlu1 %2028 }
 0xd71   :  { %4062 = vtanh.f32 %v2046_v2  ;;  %v2047_v13 = vadd.f32 %v2029_v1, %v1967_v48  ;;  %v2173_v1 = vsel %vm403_vm2, %v2172_v35, %v2042_v61 }
 0xd72   :  { %v4055_v14 = vpop.eup %4054  ;;  %v2175_v36 = vsel %vm406_vm3, %v2174_v49, %v2173_v1 }
 0xd73   :  { %2068 = vrot.lane.b32.xlu0 %v4055_v14, %s4336_s9  ;;  %4064 = vtanh.f32 %v2047_v13  ;;  %v2177_v48 = vsel %vm409_vm4, %v2176_v34, %v2175_v36 }
 0xd74   :  { %v2033_v44 = vpop.permute.xlu1 %2032  ;;  %v2179_v61 = vsel %vm412_vm5, %v2178_v59, %v2177_v48 }
 0xd75   :  { %v2049_v3 = vadd.f32 %v2033_v44, %v1969_v23  ;;  %v2180_v23 = vrot.slane %v2047_v13, 3  ;;  %v2182_v44 = vrot.slane %v2048_v9, 2 }
 0xd76   :  { %v4057_v39 = vpop.eup %4056 }
 0xd77   :  { %2070 = vrot.lane.b32.xlu1 %v4057_v39, %s4336_s9  ;;  %v4059_v4 = vpop.eup %4058  ;;  %4066 = vtanh.f32 %v2049_v3  ;;  %v2184_v18 = vrot.slane %v2049_v3, 1  ;;  %v2181_v2 = vsel %vm415_vm6, %v2180_v23, %v2179_v61 }
 0xd78   :  { %v2183_v13 = vsel %vm418_vm7, %v2182_v44, %v2181_v2  ;;  %v2113_v49 = vpop.permute.xlu1 %2112 }
 0xd7a   :  { %v4061_v51 = vpop.eup %4060 }
 0xd7b   :  { %2072 = vrot.lane.b32.xlu1 %v4059_v4, %s4336_s9  ;;  %2078 = vrot.lane.b32.xlu0 %v4061_v51, %s4336_s9  ;;  %v4063_v33 = vpop.eup %4062  ;;  %v2185_v4 = vsel %vm421_vm8, %v2184_v18, %v2183_v13  ;;  %v2109_v51 = vpop.permute.xlu0 %2108 }
 0xd7c   :  { %v2115_v1 = vpop.permute.xlu1 %2114 }
 0xd7d   :  { %v4065_v14 = vpop.eup %4064 }
 0xd7f   :  { %2074 = vrot.lane.b32.xlu1 %v4063_v33, %s4336_s9  ;;  %v2111_v35 = vpop.permute.xlu0 %2110 }
 0xd80   :  { %v2117_v3 = vpop.permute.xlu1 %2116 }
 0xd81   :  { %v4067_v39 = vpop.eup %4066 }
 0xd82   :  { %2080 = vrot.lane.b32.xlu0 %v4067_v39, %s4336_s9 }
 0xd83   :  { %2076 = vrot.lane.b32.xlu1 %v4065_v14, %s4336_s9  ;;  %v2107_v33 = vpop.permute.xlu0 %2106 }
 0xd86   :  { %2118 = vrot.lane.b32.xlu0 %v1802_v40, %s4337_s16 }
 0xd87   :  { %2120 = vrot.lane.b32.xlu1 %v1803_v12, %s4337_s16 }
 0xd8b   :  { %2186 = vrot.lane.b32.xlu1 %v2185_v4, %s4338_s6 }
 0xde1   :  { %v2067_v36 = vpop.permute.xlu0 %2066 }
 0xde2   :  { %v2090_v40 = vmul.f32 %v5200_v31, %v2067_v36 }
 0xde5   :  { %v2069_v34 = vpop.permute.xlu0 %2068 }
 0xde6   :  { %v2091_v9 = vmul.f32 %v5204_v22, %v2069_v34 }
 0xde8   :  { %v5291_v39 = vadd.f32 %v2109_v51, %v2091_v9 }
 0xde9   :  { %v2071_v59 = vpop.permute.xlu1 %2070 }
 0xdea   :  { %v2092_v14 = vmul.f32 %v5208_v26, %v2071_v59  ;;  %6141 = vst [vmem:[#allocation11_spill] sm:$0xff] %v5291_v39  ;;  %v2146_v13 = vrot.slane %v5291_v39, 7 }
 0xdec   :  { %v5293_v12 = vadd.f32 %v2111_v35, %v2092_v14 }
 0xded   :  { %v2073_v48 = vpop.permute.xlu1 %2072  ;;  %v2079_v2 = vpop.permute.xlu0 %2078 }
 0xdee   :  { %v2093_v23 = vmul.f32 %v5210_v56, %v2073_v48  ;;  %v2148_v26 = vrot.slane %v5293_v12, 6  ;;  %v5303_v56 = vadd.f32 %v2107_v33, %v2090_v40  ;;  %v2096_v59 = vmul.f32 %v5215_v7, %v2079_v2 }
 0xdf0   :  { %v5296_v18 = vadd.f32 %v2113_v49, %v2093_v23  ;;  %v2147_v49 = vsel %vm403_vm2, %v2146_v13, %v5303_v56 }
 0xdf1   :  { %v2075_v61 = vpop.permute.xlu1 %2074 }
 0xdf2   :  { %6142 = vst [vmem:[#allocation12_spill] sm:$0xff] %v5296_v18  ;;  %v2094_v44 = vmul.f32 %v5218_v0, %v2075_v61  ;;  %v2150_v51 = vrot.slane %v5296_v18, 5 }
 0xdf4   :  { %v5300_v22 = vadd.f32 %v2115_v1, %v2094_v44  ;;  %v2081_v35 = vpop.permute.xlu0 %2080  ;;  %v2149_v1 = vsel %vm406_vm3, %v2148_v26, %v2147_v49 }
 0xdf5   :  { %v2077_v4 = vpop.permute.xlu1 %2076  ;;  %v2097_v0 = vmul.f32 %v5235_v38, %v2081_v35  ;;  %v2151_v9 = vsel %vm409_vm4, %v2150_v51, %v2149_v1  ;;  %v6147_v51 = vmov 0.0   ;;  %v2222_v35 = vld [vmem:[%s6119_s0 + $0x5] sm:$0x1] }
 0xdf6   :  { %6143 = vst [vmem:[#allocation13_spill] sm:$0xff] %v5300_v22  ;;  %v2095_v34 = vmul.f32 %v5227_v24, %v2077_v4  ;;  %v2152_v31 = vrot.slane %v5300_v22, 4 }
 0xdf8   :  { %v5311_v36 = vadd.f32 %v2117_v3, %v2095_v34  ;;  %v2119_v48 = vpop.permute.xlu0 %2118  ;;  %v2153_v61 = vsel %vm412_vm5, %v2152_v31, %v2151_v9 }
 0xdf9   :  { %v2121_v33 = vpop.permute.xlu1 %2120  ;;  %v5319_v23 = vadd.f32 %v2119_v48, %v2096_v59  ;;  %v2223_v59 = vld [vmem:[%s6119_s0 + $0xd] sm:$0x1]  ;;  %v2226_v48 = vld [vmem:[%s6119_s0 + $0x25] sm:$0x1] }
 0xdfa   :  { %6144 = vst [vmem:[#allocation14_spill] sm:$0xff] %v5311_v36  ;;  %v2154_v14 = vrot.slane %v5311_v36, 3  ;;  %v5317_v24 = vadd.f32 %v2121_v33, %v2097_v0 }
 0xdfb   :  { %6146 = vst [vmem:[#allocation16_spill] sm:$0xff] %v5319_v23  ;;  %v2156_v40 = vrot.slane %v5319_v23, 2 }
 0xdfc   :  { %6145 = vst [vmem:[#allocation15_spill] sm:$0xff] %v5317_v24  ;;  %v2158_v38 = vrot.slane %v5317_v24, 1  ;;  %v2155_v3 = vsel %vm415_vm6, %v2154_v14, %v2153_v61 }
 0xdfd   :  { %v2187_v44 = vpop.permute.xlu1 %2186  ;;  %v2157_v7 = vsel %vm418_vm7, %v2156_v40, %v2155_v3  ;;  %v2225_v3 = vld [vmem:[%s6119_s0 + $0x1d] sm:$0x1] }
 0xdfe   :  { %2189 = vst.msk [vmem:[#allocation3] sm:$0xff] %vm24_vm1, %v2187_v44  ;;  %v2159_v2 = vsel %vm421_vm8, %v2158_v38, %v2157_v7 }
 0xdff   :  { %2160 = vrot.lane.b32.xlu0 %v2159_v2, %s4337_s16  ;;  %v2228_v2 = vld [vmem:[%s6119_s0 + $0x35] sm:$0x1] }
 0xe71   :  { %v2161_v13 = vpop.permute.xlu0 %2160 }
 0xe72   :  { %2163 = vst.msk [vmem:[#allocation2] sm:$0xff] %vm24_vm1, %v2161_v13 }
 0xe79   :  { %v2238_v26 = vld [vmem:[#allocation2] sm:$0xff] }
 0xe7a   :  { %v2240_v4 = vpack.c.bf16 %v2238_v26, %v2238_v26 }
 0xe7c   :  { %3717 = vmatmul.mubr.msk.bf16.vlgmr.msra.gmra.mrb[8].mxu1 %vm24_vm1, %v2240_v4  ;;  %v2227_v4 = vld [vmem:[%s6119_s0 + $0x2d] sm:$0x1] }
 0xe7d   :  { %3729 = vmatpush3.bf16.msra.mxu1 %v5144_v43  ;;  %3732 = vmatprep.mubr.msk.bf16.mxu1 %vm4335_vm0, %v6147_v51 }
 0xe7e   :  { %3730 = vmatprep.subr.bf16.mxu1 %v6147_v51 }
 0xe81   :  { %3731 = vmatpush3.bf16.msra.mxu1 %v5153_v50  ;;  %v2224_v50 = vld [vmem:[%s6119_s0 + $0x15] sm:$0x1] }
 0xf4f   :  { %v2278_v34 = vpop.f32.mrb[8].mxu1 }
 0xf50   :  { %v3718_v31 = vpop.f32.mrb[9].mxu1  ;;  %v5339_v49 = vadd.f32 %v2278_v34, %v2222_v35  ;;  %v2285_v43 = vrot.slane %v2278_v34, 1  ;;  %v2286_v33 = vrot.slane %v2278_v34, 2  ;;  %v2288_v9 = vrot.slane %v2278_v34, 4 }
 0xf51   :  { %v2281_v0 = vpop.f32.mrb[10].mxu1  ;;  %v2287_v61 = vrot.slane %v2278_v34, 3  ;;  %v2290_v40 = vrot.slane %v2278_v34, 6  ;;  %v2289_v13 = vrot.slane %v2278_v34, 5  ;;  %v2291_v35 = vrot.slane %v2278_v34, 7 }
 0xf52   :  { %v3719_v1 = vpop.f32.mrb[11].mxu1  ;;  %4068 = vtanh.f32 %v5339_v49  ;;  %v2301_v14 = vadd.f32 %v2285_v43, %v2223_v59  ;;  %v2302_v38 = vadd.f32 %v2286_v33, %v2224_v50  ;;  %v2304_v44 = vadd.f32 %v2288_v9, %v2226_v48  ;;  %v2229_v0 = vld [vmem:[%s6119_s0 + $0x3d] sm:$0x1]  ;;  %v2239_v9 = vld [vmem:[#allocation3] sm:$0xff] }
 0xf53   :  { %v2303_v26 = vadd.f32 %v2287_v61, %v2225_v3  ;;  %v2306_v51 = vadd.f32 %v2290_v40, %v2228_v2  ;;  %v2305_v31 = vadd.f32 %v2289_v13, %v2227_v4  ;;  %v2307_v1 = vadd.f32 %v2291_v35, %v2229_v0 }
 0xf54   :  { %4070 = vtanh.f32 %v2301_v14  ;;  %v2365_v61 = vrot.slane %v2239_v9, 1  ;;  %v2366_v40 = vrot.slane %v2239_v9, 2  ;;  %v2367_v2 = vrot.slane %v2239_v9, 3 }
 0xf55   :  { %4072 = vtanh.f32 %v2302_v38  ;;  %v2371_v13 = vrot.slane %v2239_v9, 7  ;;  %v2368_v4 = vrot.slane %v2239_v9, 4  ;;  %v2369_v35 = vrot.slane %v2239_v9, 5 }
 0xf56   :  { %4074 = vtanh.f32 %v2304_v44  ;;  %v3622_v0 = vmul.f32 -1.442695, %v5339_v49 }
 0xf57   :  { %4076 = vtanh.f32 %v2303_v26 }
 0xf58   :  { %4078 = vtanh.f32 %v2306_v51 }
 0xf59   :  { %4080 = vtanh.f32 %v2305_v31 }
 0xf5a   :  { %4082 = vtanh.f32 %v2307_v1 }
 0xf5b   :  { %4084 = vpow2.f32 %v3622_v0 }
 0xf5c   :  { %v4069_v7 = vpop.eup %4068 }
 0xf5d   :  { %2412 = vrot.lane.b32.xlu0 %v4069_v7, %s4336_s9  ;;  %v2370_v7 = vrot.slane %v2239_v9, 6 }
 0xf5e   :  { %v4071_v43 = vpop.eup %4070 }
 0xf5f   :  { %v4073_v59 = vpop.eup %4072 }
 0xf60   :  { %2416 = vrot.lane.b32.xlu1 %v4073_v59, %s4336_s9  ;;  %v4075_v33 = vpop.eup %4074  ;;  %v3624_v59 = vmul.f32 -1.442695, %v2302_v38 }
 0xf61   :  { %2414 = vrot.lane.b32.xlu0 %v4071_v43, %s4336_s9  ;;  %v4077_v50 = vpop.eup %4076  ;;  %v3623_v43 = vmul.f32 -1.442695, %v2301_v14 }
 0xf62   :  { %v4079_v34 = vpop.eup %4078 }
 0xf63   :  { %v4081_v48 = vpop.eup %4080  ;;  %4086 = vpow2.f32 %v3623_v43 }
 0xf64   :  { %2418 = vrot.lane.b32.xlu1 %v4077_v50, %s4336_s9  ;;  %v4083_v3 = vpop.eup %4082  ;;  %v3625_v50 = vmul.f32 -1.442695, %v2303_v26  ;;  %4088 = vpow2.f32 %v3624_v59 }
 0xf65   :  { %2420 = vrot.lane.b32.xlu0 %v4075_v33, %s4336_s9  ;;  %v4085_v33 = vpop.eup %4084 }
 0xf66   :  { %4090 = vpow2.f32 %v3625_v50 }
 0xf68   :  { %2422 = vrot.lane.b32.xlu1 %v4081_v48, %s4336_s9  ;;  %v2332_v48 = vadd.f32 1.0, %v4085_v33 }
 0xf69   :  { %2424 = vrot.lane.b32.xlu0 %v4079_v34, %s4336_s9  ;;  %v3628_v34 = vmul.f32 -1.442695, %v2306_v51 }
 0xf6b   :  { %4092 = vpow2.f32 %v3628_v34 }
 0xf6c   :  { %2426 = vrot.lane.b32.xlu1 %v4083_v3, %s4336_s9  ;;  %4094 = vrcp.f32 %v2332_v48  ;;  %v3627_v3 = vmul.f32 -1.442695, %v2305_v31 }
 0xf6d   :  { %2374 = vrot.lane.b32.xlu0 %v2365_v61, %s4336_s9  ;;  %v3626_v61 = vmul.f32 -1.442695, %v2304_v44 }
 0xf6f   :  { %4096 = vpow2.f32 %v3626_v61 }
 0xf70   :  { %2376 = vrot.lane.b32.xlu1 %v2366_v40, %s4336_s9  ;;  %v3629_v40 = vmul.f32 -1.442695, %v2307_v1  ;;  %4098 = vpow2.f32 %v3627_v3 }
 0xf71   :  { %2372 = vrot.lane.b32.xlu0 %v2239_v9, %s4336_s9  ;;  %v4087_v9 = vpop.eup %4086 }
 0xf72   :  { %v4089_v49 = vpop.eup %4088  ;;  %4100 = vpow2.f32 %v3629_v40 }
 0xf73   :  { %v2334_v38 = vadd.f32 1.0, %v4089_v49 }
 0xf74   :  { %2378 = vrot.lane.b32.xlu1 %v2367_v2, %s4336_s9  ;;  %v4091_v2 = vpop.eup %4090 }
 0xf75   :  { %2384 = vrot.lane.b32.xlu0 %v2370_v7, %s4336_s9  ;;  %v2333_v7 = vadd.f32 1.0, %v4087_v9  ;;  %v4093_v14 = vpop.eup %4092 }
 0xf76   :  { %v5380_v26 = vpop.eup %4094  ;;  %v2338_v31 = vadd.f32 1.0, %v4093_v14 }
 0xf77   :  { %4102 = vrcp.f32 %v2333_v7 }
 0xf78   :  { %2380 = vrot.lane.b32.xlu1 %v2368_v4, %s4336_s9  ;;  %4104 = vrcp.f32 %v2334_v38 }
 0xf79   :  { %2386 = vrot.lane.b32.xlu0 %v2371_v13, %s4336_s9  ;;  %v2335_v13 = vadd.f32 1.0, %v4091_v2  ;;  %v4097_v4 = vpop.eup %4096 }
 0xf7a   :  { %v2336_v1 = vadd.f32 1.0, %v4097_v4 }
 0xf7b   :  { %4106 = vrcp.f32 %v2335_v13 }
 0xf7c   :  { %2382 = vrot.lane.b32.xlu1 %v2369_v35, %s4336_s9  ;;  %v4099_v35 = vpop.eup %4098  ;;  %4108 = vrcp.f32 %v2338_v31 }
 0xf7d   :  { %v4101_v0 = vpop.eup %4100  ;;  %4110 = vrcp.f32 %v2336_v1  ;;  %v2337_v43 = vadd.f32 1.0, %v4099_v35 }
 0xf7e   :  { %v2339_v48 = vadd.f32 1.0, %v4101_v0  ;;  %v2232_v0 = vld [vmem:[%s6120_s1 + $0x15] sm:$0x1] }
 0xf7f   :  { %4112 = vrcp.f32 %v2337_v43 }
 0xf80   :  { %4114 = vrcp.f32 %v2339_v48  ;;  %v2234_v48 = vld [vmem:[%s6120_s1 + $0x25] sm:$0x1] }
 0xf81   :  { %v5384_v59 = vpop.eup %4102 }
 0xf82   :  { %v5388_v61 = vpop.eup %4104 }
 0xf85   :  { %v5390_v9 = vpop.eup %4106 }
 0xf86   :  { %v5395_v2 = vpop.eup %4108 }
 0xf87   :  { %v5398_v38 = vpop.eup %4110 }
 0xf89   :  { %v5407_v31 = vpop.eup %4112 }
 0xf8a   :  { %v5415_v43 = vpop.eup %4114 }
 0xfcf   :  { %v2413_v51 = vpop.permute.xlu0 %2412 }
 0xfd0   :  { %v2436_v44 = vmul.f32 %v5380_v26, %v2413_v51 }
 0xfd2   :  { %2452 = vrot.lane.b32.xlu0 %v2436_v44, %s4336_s9  ;;  %v2417_v50 = vpop.permute.xlu1 %2416  ;;  %v2231_v44 = vld [vmem:[%s6120_s1 + $0xd] sm:$0x1] }
 0xfd3   :  { %v2415_v33 = vpop.permute.xlu0 %2414  ;;  %v2438_v40 = vmul.f32 %v5388_v61, %v2417_v50  ;;  %v2230_v50 = vld [vmem:[%s6120_s1 + $0x5] sm:$0x1] }
 0xfd4   :  { %v2437_v34 = vmul.f32 %v5384_v59, %v2415_v33 }
 0xfd6   :  { %2454 = vrot.lane.b32.xlu0 %v2437_v34, %s4336_s9  ;;  %v2419_v7 = vpop.permute.xlu1 %2418  ;;  %v2233_v34 = vld [vmem:[%s6120_s1 + $0x1d] sm:$0x1] }
 0xfd7   :  { %v2421_v3 = vpop.permute.xlu0 %2420  ;;  %v2439_v49 = vmul.f32 %v5390_v9, %v2419_v7 }
 0xfd8   :  { %v2440_v4 = vmul.f32 %v5398_v38, %v2421_v3  ;;  %v2235_v3 = vld [vmem:[%s6120_s1 + $0x2d] sm:$0x1] }
 0xfd9   :  { %2458 = vrot.lane.b32.xlu1 %v2439_v49, %s4336_s9 }
 0xfda   :  { %2456 = vrot.lane.b32.xlu0 %v2438_v40, %s4336_s9  ;;  %v2423_v51 = vpop.permute.xlu1 %2422 }
 0xfdb   :  { %v2425_v14 = vpop.permute.xlu0 %2424  ;;  %v2441_v1 = vmul.f32 %v5407_v31, %v2423_v51 }
 0xfdc   :  { %v2442_v13 = vmul.f32 %v5395_v2, %v2425_v14 }
 0xfdd   :  { %2460 = vrot.lane.b32.xlu1 %v2440_v4, %s4336_s9 }
 0xfde   :  { %2464 = vrot.lane.b32.xlu0 %v2442_v13, %s4336_s9  ;;  %v2427_v35 = vpop.permute.xlu1 %2426 }
 0xfdf   :  { %v2443_v33 = vmul.f32 %v5415_v43, %v2427_v35  ;;  %v2375_v40 = vpop.permute.xlu0 %2374 }
 0xfe1   :  { %2462 = vrot.lane.b32.xlu1 %v2441_v1, %s4336_s9 }
 0xfe2   :  { %2542 = vrot.lane.b32.xlu0 %v2231_v44, %s4337_s16  ;;  %v2377_v14 = vpop.permute.xlu1 %2376 }
 0xfe3   :  { %v2373_v7 = vpop.permute.xlu0 %2372 }
 0xfe4   :  { %v2396_v4 = vmul.f32 %v5380_v26, %v2373_v7 }
 0xfe5   :  { %2466 = vrot.lane.b32.xlu1 %v2443_v33, %s4336_s9 }
 0xfe6   :  { %2544 = vrot.lane.b32.xlu0 %v2232_v0, %s4337_s16  ;;  %v2379_v13 = vpop.permute.xlu1 %2378  ;;  %v2397_v0 = vmul.f32 %v5384_v59, %v2375_v40 }
 0xfe7   :  { %v2385_v49 = vpop.permute.xlu0 %2384  ;;  %v2399_v24 = vmul.f32 %v5390_v9, %v2379_v13 }
 0xfe9   :  { %2546 = vrot.lane.b32.xlu1 %v2233_v34, %s4337_s16 }
 0xfea   :  { %2540 = vrot.lane.b32.xlu0 %v2230_v50, %s4337_s16  ;;  %v2381_v35 = vpop.permute.xlu1 %2380 }
 0xfeb   :  { %v2387_v51 = vpop.permute.xlu0 %2386  ;;  %v2400_v40 = vmul.f32 %v5398_v38, %v2381_v35 }
 0xfed   :  { %2548 = vrot.lane.b32.xlu1 %v2234_v48, %s4337_s16  ;;  %v2398_v48 = vmul.f32 %v5388_v61, %v2377_v14 }
 0xfee   :  { %v2383_v50 = vpop.permute.xlu1 %2382 }
 0xfef   :  { %v2401_v13 = vmul.f32 %v5407_v31, %v2383_v50 }
 0xff1   :  { %2550 = vrot.lane.b32.xlu1 %v2235_v3, %s4337_s16 }
0x1044   :  { %v2453_v44 = vpop.permute.xlu0 %2452 }
0x1045   :  { %v2476_v1 = vadd.f32 %v2453_v44, %v2396_v4  ;;  %v2402_v4 = vmul.f32 %v5395_v2, %v2385_v49 }
0x1047   :  { %4116 = vtanh.f32 %v2476_v1 }
0x1048   :  { %v2455_v33 = vpop.permute.xlu0 %2454 }
0x1049   :  { %v2477_v34 = vadd.f32 %v2455_v33, %v2397_v0 }
0x104b   :  { %4118 = vtanh.f32 %v2477_v34  ;;  %v2459_v23 = vpop.permute.xlu1 %2458 }
0x104c   :  { %v2457_v36 = vpop.permute.xlu0 %2456  ;;  %v2479_v7 = vadd.f32 %v2459_v23, %v2399_v24  ;;  %v2403_v24 = vmul.f32 %v5415_v43, %v2387_v51 }
0x104d   :  { %v2478_v18 = vadd.f32 %v2457_v36, %v2398_v48 }
0x104f   :  { %4120 = vtanh.f32 %v2478_v18  ;;  %v2461_v22 = vpop.permute.xlu1 %2460 }
0x1050   :  { %v2465_v44 = vpop.permute.xlu0 %2464  ;;  %4122 = vtanh.f32 %v2479_v7  ;;  %v2480_v14 = vadd.f32 %v2461_v22, %v2400_v40 }
0x1051   :  { %v4117_v3 = vpop.eup %4116  ;;  %v2482_v0 = vadd.f32 %v2465_v44, %v2402_v4  ;;  %v2608_v4 = vrot.slane %v2478_v18, 6  ;;  %v2610_v44 = vrot.slane %v2479_v7, 5  ;;  %v2237_v18 = vld [vmem:[%s6120_s1 + $0x3d] sm:$0x1] }
0x1052   :  { %2500 = vrot.lane.b32.xlu0 %v4117_v3, %s4336_s9  ;;  %v2606_v3 = vrot.slane %v2477_v34, 7  ;;  %v2612_v40 = vrot.slane %v2480_v14, 4  ;;  %v2236_v34 = vld [vmem:[%s6120_s1 + $0x35] sm:$0x1] }
0x1053   :  { %4124 = vtanh.f32 %v2482_v0  ;;  %v2463_v39 = vpop.permute.xlu1 %2462 }
0x1054   :  { %4126 = vtanh.f32 %v2480_v14  ;;  %v2481_v36 = vadd.f32 %v2463_v39, %v2401_v13  ;;  %v2607_v39 = vsel %vm403_vm2, %v2606_v3, %v2476_v1 }
0x1055   :  { %v4119_v33 = vpop.eup %4118  ;;  %v2609_v51 = vsel %vm406_vm3, %v2608_v4, %v2607_v39 }
0x1056   :  { %2502 = vrot.lane.b32.xlu0 %v4119_v33, %s4336_s9  ;;  %4128 = vtanh.f32 %v2481_v36  ;;  %v2611_v13 = vsel %vm409_vm4, %v2610_v44, %v2609_v51 }
0x1057   :  { %v2467_v49 = vpop.permute.xlu1 %2466  ;;  %v2613_v1 = vsel %vm412_vm5, %v2612_v40, %v2611_v13 }
0x1058   :  { %v2483_v48 = vadd.f32 %v2467_v49, %v2403_v24  ;;  %v2614_v24 = vrot.slane %v2481_v36, 3  ;;  %v2616_v49 = vrot.slane %v2482_v0, 2 }
0x1059   :  { %v4121_v23 = vpop.eup %4120 }
0x105a   :  { %2504 = vrot.lane.b32.xlu1 %v4121_v23, %s4336_s9  ;;  %v4123_v35 = vpop.eup %4122  ;;  %4130 = vtanh.f32 %v2483_v48  ;;  %v2618_v7 = vrot.slane %v2483_v48, 1  ;;  %v2615_v14 = vsel %vm415_vm6, %v2614_v24, %v2613_v1 }
0x105b   :  { %v2617_v36 = vsel %vm418_vm7, %v2616_v49, %v2615_v14  ;;  %v2547_v4 = vpop.permute.xlu1 %2546 }
0x105d   :  { %v4125_v22 = vpop.eup %4124 }
0x105e   :  { %2506 = vrot.lane.b32.xlu1 %v4123_v35, %s4336_s9  ;;  %2512 = vrot.lane.b32.xlu0 %v4125_v22, %s4336_s9  ;;  %v4127_v50 = vpop.eup %4126  ;;  %v2619_v35 = vsel %vm421_vm8, %v2618_v7, %v2617_v36  ;;  %v2543_v22 = vpop.permute.xlu0 %2542 }
0x105f   :  { %v2549_v39 = vpop.permute.xlu1 %2548 }
0x1060   :  { %v4129_v33 = vpop.eup %4128 }
0x1062   :  { %2508 = vrot.lane.b32.xlu1 %v4127_v50, %s4336_s9  ;;  %v2545_v3 = vpop.permute.xlu0 %2544 }
0x1063   :  { %v2551_v48 = vpop.permute.xlu1 %2550 }
0x1064   :  { %v4131_v23 = vpop.eup %4130 }
0x1065   :  { %2514 = vrot.lane.b32.xlu0 %v4131_v23, %s4336_s9 }
0x1066   :  { %2510 = vrot.lane.b32.xlu1 %v4129_v33, %s4336_s9  ;;  %v2541_v50 = vpop.permute.xlu0 %2540 }
0x1069   :  { %2552 = vrot.lane.b32.xlu0 %v2236_v34, %s4337_s16 }
0x106a   :  { %2554 = vrot.lane.b32.xlu1 %v2237_v18, %s4337_s16 }
0x106e   :  { %2620 = vrot.lane.b32.xlu1 %v2619_v35, %s4338_s6 }
0x10c4   :  { %v2501_v51 = vpop.permute.xlu0 %2500 }
0x10c5   :  { %v2524_v34 = vmul.f32 %v5380_v26, %v2501_v51 }
0x10c8   :  { %v2503_v44 = vpop.permute.xlu0 %2502 }
0x10c9   :  { %v2525_v0 = vmul.f32 %v5384_v59, %v2503_v44 }
0x10cb   :  { %v5471_v23 = vadd.f32 %v2543_v22, %v2525_v0 }
0x10cc   :  { %v2505_v40 = vpop.permute.xlu1 %2504 }
0x10cd   :  { %v2526_v33 = vmul.f32 %v5388_v61, %v2505_v40  ;;  %6148 = vst [vmem:[#allocation17_spill] sm:$0xff] %v5471_v23  ;;  %v2580_v36 = vrot.slane %v5471_v23, 7 }
0x10cf   :  { %v5473_v18 = vadd.f32 %v2545_v3, %v2526_v33 }
0x10d0   :  { %v2507_v13 = vpop.permute.xlu1 %2506  ;;  %v2513_v14 = vpop.permute.xlu0 %2512 }
0x10d1   :  { %v2527_v24 = vmul.f32 %v5390_v9, %v2507_v13  ;;  %6149 = vst [vmem:[#allocation18_spill] sm:$0xff] %v5473_v18  ;;  %v2582_v61 = vrot.slane %v5473_v18, 6  ;;  %v5483_v9 = vadd.f32 %v2541_v50, %v2524_v34  ;;  %v2530_v40 = vmul.f32 %v5395_v2, %v2513_v14 }
0x10d3   :  { %v5476_v7 = vadd.f32 %v2547_v4, %v2527_v24  ;;  %6152 = vst [vmem:[#allocation21_spill] sm:$0xff] %v5483_v9  ;;  %v2581_v4 = vsel %vm403_vm2, %v2580_v36, %v5483_v9 }
0x10d4   :  { %v2509_v1 = vpop.permute.xlu1 %2508 }
0x10d5   :  { %6150 = vst [vmem:[#allocation19_spill] sm:$0xff] %v5476_v7  ;;  %v2528_v49 = vmul.f32 %v5398_v38, %v2509_v1  ;;  %v2584_v22 = vrot.slane %v5476_v7, 5 }
0x10d7   :  { %v5480_v59 = vadd.f32 %v2549_v39, %v2528_v49  ;;  %v2515_v3 = vpop.permute.xlu0 %2514  ;;  %v2583_v39 = vsel %vm406_vm3, %v2582_v61, %v2581_v4 }
0x10d8   :  { %v2511_v35 = vpop.permute.xlu1 %2510  ;;  %v2531_v38 = vmul.f32 %v5415_v43, %v2515_v3  ;;  %v2585_v0 = vsel %vm409_vm4, %v2584_v22, %v2583_v39  ;;  %v2656_v22 = vld [vmem:[%s6119_s0 + $0x6] sm:$0x1] }
0x10d9   :  { %6151 = vst [vmem:[#allocation20_spill] sm:$0xff] %v5480_v59  ;;  %v2529_v44 = vmul.f32 %v5407_v31, %v2511_v35  ;;  %v2586_v26 = vrot.slane %v5480_v59, 4 }
0x10db   :  { %v5491_v51 = vadd.f32 %v2551_v48, %v2529_v44  ;;  %v2553_v13 = vpop.permute.xlu0 %2552  ;;  %v2587_v1 = vsel %vm412_vm5, %v2586_v26, %v2585_v0  ;;  %v2658_v0 = vld [vmem:[%s6119_s0 + $0x16] sm:$0x1] }
0x10dc   :  { %v2555_v50 = vpop.permute.xlu1 %2554  ;;  %v5499_v24 = vadd.f32 %v2553_v13, %v2530_v40  ;;  %v2657_v40 = vld [vmem:[%s6119_s0 + $0xe] sm:$0x1] }
0x10dd   :  { %6153 = vst [vmem:[#allocation22_spill] sm:$0xff] %v5491_v51  ;;  %v2588_v33 = vrot.slane %v5491_v51, 3  ;;  %v5497_v31 = vadd.f32 %v2555_v50, %v2531_v38 }
0x10de   :  { %6155 = vst [vmem:[#allocation24_spill] sm:$0xff] %v5499_v24  ;;  %v2590_v34 = vrot.slane %v5499_v24, 2 }
0x10df   :  { %6154 = vst [vmem:[#allocation23_spill] sm:$0xff] %v5497_v31  ;;  %v2592_v43 = vrot.slane %v5497_v31, 1  ;;  %v2589_v48 = vsel %vm415_vm6, %v2588_v33, %v2587_v1  ;;  %v2660_v1 = vld [vmem:[%s6119_s0 + $0x26] sm:$0x1] }
0x10e0   :  { %v2621_v49 = vpop.permute.xlu1 %2620  ;;  %v2591_v2 = vsel %vm418_vm7, %v2590_v34, %v2589_v48  ;;  %v2659_v34 = vld [vmem:[%s6119_s0 + $0x1e] sm:$0x1] }
0x10e1   :  { %2623 = vst.msk [vmem:[#allocation3] sm:$0xff] %vm24_vm1, %v2621_v49  ;;  %v2593_v14 = vsel %vm421_vm8, %v2592_v43, %v2591_v2 }
0x10e2   :  { %2594 = vrot.lane.b32.xlu0 %v2593_v14, %s4337_s16 }
0x1154   :  { %v2595_v36 = vpop.permute.xlu0 %2594 }
0x1155   :  { %2597 = vst.msk [vmem:[#allocation2] sm:$0xff] %vm24_vm1, %v2595_v36  ;;  %v2662_v36 = vld [vmem:[%s6119_s0 + $0x36] sm:$0x1] }
0x115c   :  { %v2672_v61 = vld [vmem:[#allocation2] sm:$0xff] }
0x115d   :  { %v2674_v35 = vpack.c.bf16 %v2672_v61, %v2672_v61 }
0x115f   :  { %3725 = vmatmul.mubr.msk.bf16.vlgmr.msra.gmra.mrb[12].mxu0 %vm24_vm1, %v2674_v35 }
0x1232   :  { %v2712_v3 = vpop.f32.mrb[12].mxu0 }
0x1233   :  { %v3726_v44 = vpop.f32.mrb[13].mxu0  ;;  %v5514_v26 = vadd.f32 %v2712_v3, %v2656_v22  ;;  %v2719_v39 = vrot.slane %v2712_v3, 1  ;;  %v2720_v50 = vrot.slane %v2712_v3, 2  ;;  %v2722_v33 = vrot.slane %v2712_v3, 4  ;;  %v2661_v22 = vld [vmem:[%s6119_s0 + $0x2e] sm:$0x1] }
0x1234   :  { %v2715_v4 = vpop.f32.mrb[14].mxu0  ;;  %v2721_v43 = vrot.slane %v2712_v3, 3  ;;  %v2724_v49 = vrot.slane %v2712_v3, 6  ;;  %v2723_v61 = vrot.slane %v2712_v3, 5 }
0x1235   :  { %v3727_v38 = vpop.f32.mrb[15].mxu0  ;;  %4132 = vtanh.f32 %v5514_v26  ;;  %v2735_v13 = vadd.f32 %v2719_v39, %v2657_v40  ;;  %v2736_v48 = vadd.f32 %v2720_v50, %v2658_v0  ;;  %v2738_v2 = vadd.f32 %v2722_v33, %v2660_v1  ;;  %v2663_v39 = vld [vmem:[%s6119_s0 + $0x3e] sm:$0x1] }
0x1236   :  { %v2737_v35 = vadd.f32 %v2721_v43, %v2659_v34  ;;  %v2740_v44 = vadd.f32 %v2724_v49, %v2662_v36  ;;  %v2725_v4 = vrot.slane %v2712_v3, 7  ;;  %v2739_v38 = vadd.f32 %v2723_v61, %v2661_v22  ;;  %v2673_v43 = vld [vmem:[#allocation3] sm:$0xff] }
0x1237   :  { %4134 = vtanh.f32 %v2735_v13  ;;  %v2799_v49 = vrot.slane %v2673_v43, 1  ;;  %v2800_v36 = vrot.slane %v2673_v43, 2  ;;  %v2804_v61 = vrot.slane %v2673_v43, 6 }
0x1238   :  { %4136 = vtanh.f32 %v2736_v48  ;;  %v2741_v40 = vadd.f32 %v2725_v4, %v2663_v39  ;;  %v2801_v22 = vrot.slane %v2673_v43, 3  ;;  %v2805_v4 = vrot.slane %v2673_v43, 7 }
0x1239   :  { %4138 = vtanh.f32 %v2738_v2  ;;  %v2802_v39 = vrot.slane %v2673_v43, 4 }
0x123a   :  { %4140 = vtanh.f32 %v2737_v35 }
0x123b   :  { %4142 = vtanh.f32 %v2740_v44 }
0x123c   :  { %4144 = vtanh.f32 %v2739_v38 }
0x123d   :  { %4146 = vtanh.f32 %v2741_v40 }
0x123f   :  { %v4133_v14 = vpop.eup %4132 }
0x1240   :  { %2846 = vrot.lane.b32.xlu0 %v4133_v14, %s4336_s9 }
0x1241   :  { %v4135_v50 = vpop.eup %4134 }
0x1242   :  { %v4137_v0 = vpop.eup %4136 }
0x1243   :  { %2850 = vrot.lane.b32.xlu1 %v4137_v0, %s4336_s9  ;;  %v4139_v33 = vpop.eup %4138  ;;  %v3631_v0 = vmul.f32 -1.442695, %v5514_v26 }
0x1244   :  { %2848 = vrot.lane.b32.xlu0 %v4135_v50, %s4336_s9  ;;  %v4141_v1 = vpop.eup %4140  ;;  %v2803_v50 = vrot.slane %v2673_v43, 5 }
0x1245   :  { %v4143_v3 = vpop.eup %4142  ;;  %4148 = vpow2.f32 %v3631_v0 }
0x1246   :  { %v4145_v34 = vpop.eup %4144 }
0x1247   :  { %2852 = vrot.lane.b32.xlu1 %v4141_v1, %s4336_s9  ;;  %v4147_v14 = vpop.eup %4146  ;;  %v3633_v1 = vmul.f32 -1.442695, %v2736_v48 }
0x1248   :  { %2854 = vrot.lane.b32.xlu0 %v4139_v33, %s4336_s9  ;;  %v3632_v33 = vmul.f32 -1.442695, %v2735_v13 }
0x124a   :  { %4150 = vpow2.f32 %v3632_v33 }
0x124b   :  { %2856 = vrot.lane.b32.xlu1 %v4145_v34, %s4336_s9  ;;  %v3634_v34 = vmul.f32 -1.442695, %v2737_v35  ;;  %4152 = vpow2.f32 %v3633_v1 }
0x124c   :  { %2858 = vrot.lane.b32.xlu0 %v4143_v3, %s4336_s9 }
0x124d   :  { %4154 = vpow2.f32 %v3634_v34 }
0x124f   :  { %2860 = vrot.lane.b32.xlu1 %v4147_v14, %s4336_s9  ;;  %v4149_v3 = vpop.eup %4148 }
0x1250   :  { %2808 = vrot.lane.b32.xlu0 %v2799_v49, %s4336_s9  ;;  %v3637_v49 = vmul.f32 -1.442695, %v2740_v44  ;;  %v2766_v14 = vadd.f32 1.0, %v4149_v3 }
0x1252   :  { %4156 = vpow2.f32 %v3637_v49 }
0x1253   :  { %2810 = vrot.lane.b32.xlu1 %v2800_v36, %s4336_s9  ;;  %v3635_v36 = vmul.f32 -1.442695, %v2738_v2  ;;  %4158 = vrcp.f32 %v2766_v14 }
0x1254   :  { %2806 = vrot.lane.b32.xlu0 %v2673_v43, %s4336_s9  ;;  %v4151_v43 = vpop.eup %4150 }
0x1255   :  { %4160 = vpow2.f32 %v3635_v36  ;;  %v4153_v26 = vpop.eup %4152 }
0x1256   :  { %v2768_v48 = vadd.f32 1.0, %v4153_v26 }
0x1257   :  { %2812 = vrot.lane.b32.xlu1 %v2801_v22, %s4336_s9  ;;  %v3638_v22 = vmul.f32 -1.442695, %v2741_v40 }
0x1258   :  { %2818 = vrot.lane.b32.xlu0 %v2804_v61, %s4336_s9  ;;  %v3636_v61 = vmul.f32 -1.442695, %v2739_v38 }
0x125a   :  { %4162 = vpow2.f32 %v3636_v61 }
0x125b   :  { %2814 = vrot.lane.b32.xlu1 %v2802_v39, %s4336_s9  ;;  %v4155_v39 = vpop.eup %4154  ;;  %4164 = vpow2.f32 %v3638_v22 }
0x125c   :  { %2820 = vrot.lane.b32.xlu0 %v2805_v4, %s4336_s9  ;;  %v2767_v4 = vadd.f32 1.0, %v4151_v43  ;;  %v4157_v13 = vpop.eup %4156 }
0x125d   :  { %v5555_v35 = vpop.eup %4158  ;;  %v2772_v38 = vadd.f32 1.0, %v4157_v13 }
0x125e   :  { %4166 = vrcp.f32 %v2767_v4 }
0x125f   :  { %2816 = vrot.lane.b32.xlu1 %v2803_v50, %s4336_s9  ;;  %v2769_v50 = vadd.f32 1.0, %v4155_v39  ;;  %v4161_v0 = vpop.eup %4160  ;;  %4168 = vrcp.f32 %v2768_v48 }
0x1260   :  { %v2770_v40 = vadd.f32 1.0, %v4161_v0 }
0x1261   :  { %4170 = vrcp.f32 %v2769_v50 }
0x1262   :  { %4172 = vrcp.f32 %v2772_v38 }
0x1263   :  { %4174 = vrcp.f32 %v2770_v40  ;;  %v2665_v40 = vld [vmem:[%s6120_s1 + $0xe] sm:$0x1] }
0x1264   :  { %v4163_v33 = vpop.eup %4162 }
0x1265   :  { %v4165_v1 = vpop.eup %4164  ;;  %v2771_v3 = vadd.f32 1.0, %v4163_v33 }
0x1266   :  { %v2773_v61 = vadd.f32 1.0, %v4165_v1 }
0x1267   :  { %4176 = vrcp.f32 %v2771_v3 }
0x1268   :  { %v5559_v34 = vpop.eup %4166  ;;  %4178 = vrcp.f32 %v2773_v61  ;;  %v2664_v61 = vld [vmem:[%s6120_s1 + $0x6] sm:$0x1] }
0x1269   :  { %v5563_v43 = vpop.eup %4168 }
0x126b   :  { %v5565_v4 = vpop.eup %4170 }
0x126c   :  { %v5570_v48 = vpop.eup %4172 }
0x126d   :  { %v5573_v50 = vpop.eup %4174 }
0x1271   :  { %v5582_v33 = vpop.eup %4176 }
0x12b2   :  { %v2847_v44 = vpop.permute.xlu0 %2846 }
0x12b3   :  { %v2870_v2 = vmul.f32 %v5555_v35, %v2847_v44 }
0x12b5   :  { %2886 = vrot.lane.b32.xlu0 %v2870_v2, %s4336_s9  ;;  %v2851_v14 = vpop.permute.xlu1 %2850 }
0x12b6   :  { %v2849_v49 = vpop.permute.xlu0 %2848  ;;  %v2872_v26 = vmul.f32 %v5563_v43, %v2851_v14  ;;  %v5590_v14 = vpop.eup %4178 }
0x12b7   :  { %v2871_v36 = vmul.f32 %v5559_v34, %v2849_v49  ;;  %v2666_v49 = vld [vmem:[%s6120_s1 + $0x16] sm:$0x1] }
0x12b9   :  { %2888 = vrot.lane.b32.xlu0 %v2871_v36, %s4336_s9  ;;  %v2853_v39 = vpop.permute.xlu1 %2852 }
0x12ba   :  { %v2855_v22 = vpop.permute.xlu0 %2854  ;;  %v2873_v13 = vmul.f32 %v5565_v4, %v2853_v39  ;;  %v2669_v39 = vld [vmem:[%s6120_s1 + $0x2e] sm:$0x1] }
0x12bb   :  { %v2874_v38 = vmul.f32 %v5573_v50, %v2855_v22  ;;  %v2667_v22 = vld [vmem:[%s6120_s1 + $0x1e] sm:$0x1] }
0x12bc   :  { %2892 = vrot.lane.b32.xlu1 %v2873_v13, %s4336_s9 }
0x12bd   :  { %2890 = vrot.lane.b32.xlu0 %v2872_v26, %s4336_s9  ;;  %v2857_v0 = vpop.permute.xlu1 %2856  ;;  %v2668_v26 = vld [vmem:[%s6120_s1 + $0x26] sm:$0x1] }
0x12be   :  { %v2859_v44 = vpop.permute.xlu0 %2858  ;;  %v2875_v1 = vmul.f32 %v5582_v33, %v2857_v0 }
0x12bf   :  { %v2876_v2 = vmul.f32 %v5570_v48, %v2859_v44 }
0x12c0   :  { %2894 = vrot.lane.b32.xlu1 %v2874_v38, %s4336_s9 }
0x12c1   :  { %2898 = vrot.lane.b32.xlu0 %v2876_v2, %s4336_s9  ;;  %v2861_v3 = vpop.permute.xlu1 %2860 }
0x12c2   :  { %v2877_v36 = vmul.f32 %v5590_v14, %v2861_v3  ;;  %v2809_v13 = vpop.permute.xlu0 %2808 }
0x12c4   :  { %2896 = vrot.lane.b32.xlu1 %v2875_v1, %s4336_s9 }
0x12c5   :  { %2976 = vrot.lane.b32.xlu0 %v2665_v40, %s4337_s16  ;;  %v2811_v2 = vpop.permute.xlu1 %2810 }
0x12c6   :  { %v2807_v44 = vpop.permute.xlu0 %2806  ;;  %v2832_v51 = vmul.f32 %v5563_v43, %v2811_v2 }
0x12c7   :  { %v2830_v1 = vmul.f32 %v5555_v35, %v2807_v44 }
0x12c8   :  { %2900 = vrot.lane.b32.xlu1 %v2877_v36, %s4336_s9 }
0x12c9   :  { %2978 = vrot.lane.b32.xlu0 %v2666_v49, %s4337_s16  ;;  %v2813_v40 = vpop.permute.xlu1 %2812 }
0x12ca   :  { %v2819_v0 = vpop.permute.xlu0 %2818  ;;  %v2833_v24 = vmul.f32 %v5565_v4, %v2813_v40 }
0x12cc   :  { %2980 = vrot.lane.b32.xlu1 %v2667_v22, %s4337_s16 }
0x12cd   :  { %2974 = vrot.lane.b32.xlu0 %v2664_v61, %s4337_s16  ;;  %v2815_v36 = vpop.permute.xlu1 %2814  ;;  %v2831_v61 = vmul.f32 %v5559_v34, %v2809_v13 }
0x12ce   :  { %v2821_v38 = vpop.permute.xlu0 %2820  ;;  %v2834_v13 = vmul.f32 %v5573_v50, %v2815_v36 }
0x12d0   :  { %2982 = vrot.lane.b32.xlu1 %v2668_v26, %s4337_s16 }
0x12d1   :  { %v2817_v26 = vpop.permute.xlu1 %2816 }
0x12d2   :  { %v2835_v40 = vmul.f32 %v5582_v33, %v2817_v26 }
0x12d4   :  { %2984 = vrot.lane.b32.xlu1 %v2669_v39, %s4337_s16 }
0x1327   :  { %v2887_v3 = vpop.permute.xlu0 %2886 }
0x1328   :  { %v2910_v49 = vadd.f32 %v2887_v3, %v2830_v1  ;;  %v2836_v1 = vmul.f32 %v5570_v48, %v2819_v0 }
0x132a   :  { %4180 = vtanh.f32 %v2910_v49 }
0x132b   :  { %v2889_v22 = vpop.permute.xlu0 %2888 }
0x132c   :  { %v2911_v31 = vadd.f32 %v2889_v22, %v2831_v61 }
0x132e   :  { %4182 = vtanh.f32 %v2911_v31  ;;  %v2893_v59 = vpop.permute.xlu1 %2892 }
0x132f   :  { %v2891_v7 = vpop.permute.xlu0 %2890  ;;  %v2913_v44 = vadd.f32 %v2893_v59, %v2833_v24  ;;  %v2837_v59 = vmul.f32 %v5590_v14, %v2821_v38 }
0x1330   :  { %v2912_v23 = vadd.f32 %v2891_v7, %v2832_v51 }
0x1332   :  { %4184 = vtanh.f32 %v2912_v23  ;;  %v2895_v18 = vpop.permute.xlu1 %2894 }
0x1333   :  { %v2899_v3 = vpop.permute.xlu0 %2898  ;;  %4186 = vtanh.f32 %v2913_v44  ;;  %v2914_v2 = vadd.f32 %v2895_v18, %v2834_v13 }
0x1334   :  { %v4181_v39 = vpop.eup %4180  ;;  %v2916_v61 = vadd.f32 %v2899_v3, %v2836_v1  ;;  %v3042_v1 = vrot.slane %v2912_v23, 6  ;;  %v3044_v3 = vrot.slane %v2913_v44, 5  ;;  %v2671_v23 = vld [vmem:[%s6120_s1 + $0x3e] sm:$0x1] }
0x1335   :  { %2934 = vrot.lane.b32.xlu0 %v4181_v39, %s4336_s9  ;;  %v3040_v39 = vrot.slane %v2911_v31, 7  ;;  %v3046_v13 = vrot.slane %v2914_v2, 4 }
0x1336   :  { %4188 = vtanh.f32 %v2916_v61  ;;  %v2897_v9 = vpop.permute.xlu1 %2896 }
0x1337   :  { %4190 = vtanh.f32 %v2914_v2  ;;  %v2915_v7 = vadd.f32 %v2897_v9, %v2835_v40  ;;  %v3041_v9 = vsel %vm403_vm2, %v3040_v39, %v2910_v49  ;;  %v2670_v49 = vld [vmem:[%s6120_s1 + $0x36] sm:$0x1] }
0x1338   :  { %v4183_v22 = vpop.eup %4182  ;;  %v3043_v38 = vsel %vm406_vm3, %v3042_v1, %v3041_v9 }
0x1339   :  { %2936 = vrot.lane.b32.xlu0 %v4183_v22, %s4336_s9  ;;  %4192 = vtanh.f32 %v2915_v7  ;;  %v3045_v40 = vsel %vm409_vm4, %v3044_v3, %v3043_v38 }
0x133a   :  { %v2901_v24 = vpop.permute.xlu1 %2900  ;;  %v3047_v31 = vsel %vm412_vm5, %v3046_v13, %v3045_v40 }
0x133b   :  { %v2917_v0 = vadd.f32 %v2901_v24, %v2837_v59  ;;  %v3048_v59 = vrot.slane %v2915_v7, 3  ;;  %v3050_v24 = vrot.slane %v2916_v61, 2 }
0x133c   :  { %v4185_v51 = vpop.eup %4184 }
0x133d   :  { %2938 = vrot.lane.b32.xlu1 %v4185_v51, %s4336_s9  ;;  %v4187_v36 = vpop.eup %4186  ;;  %4194 = vtanh.f32 %v2917_v0  ;;  %v3052_v44 = vrot.slane %v2917_v0, 1  ;;  %v3049_v2 = vsel %vm415_vm6, %v3048_v59, %v3047_v31 }
0x133e   :  { %v3051_v7 = vsel %vm418_vm7, %v3050_v24, %v3049_v2  ;;  %v2981_v1 = vpop.permute.xlu1 %2980 }
0x1340   :  { %v4189_v18 = vpop.eup %4188 }
0x1341   :  { %2940 = vrot.lane.b32.xlu1 %v4187_v36, %s4336_s9  ;;  %2946 = vrot.lane.b32.xlu0 %v4189_v18, %s4336_s9  ;;  %v4191_v26 = vpop.eup %4190  ;;  %v3053_v36 = vsel %vm421_vm8, %v3052_v44, %v3051_v7  ;;  %v2977_v18 = vpop.permute.xlu0 %2976 }
0x1342   :  { %v2983_v9 = vpop.permute.xlu1 %2982 }
0x1343   :  { %v4193_v22 = vpop.eup %4192 }
0x1345   :  { %2942 = vrot.lane.b32.xlu1 %v4191_v26, %s4336_s9  ;;  %v2979_v39 = vpop.permute.xlu0 %2978 }
0x1346   :  { %v2985_v0 = vpop.permute.xlu1 %2984 }
0x1347   :  { %v4195_v51 = vpop.eup %4194 }
0x1348   :  { %2948 = vrot.lane.b32.xlu0 %v4195_v51, %s4336_s9 }
0x1349   :  { %2944 = vrot.lane.b32.xlu1 %v4193_v22, %s4336_s9  ;;  %v2975_v26 = vpop.permute.xlu0 %2974 }
0x134c   :  { %2986 = vrot.lane.b32.xlu0 %v2670_v49, %s4337_s16 }
0x134d   :  { %2988 = vrot.lane.b32.xlu1 %v2671_v23, %s4337_s16 }
0x1351   :  { %3054 = vrot.lane.b32.xlu1 %v3053_v36, %s4338_s6 }
0x13a7   :  { %v2935_v38 = vpop.permute.xlu0 %2934 }
0x13a8   :  { %v2958_v49 = vmul.f32 %v5555_v35, %v2935_v38 }
0x13ab   :  { %v2937_v3 = vpop.permute.xlu0 %2936 }
0x13ac   :  { %v2959_v61 = vmul.f32 %v5559_v34, %v2937_v3 }
0x13ae   :  { %v5646_v51 = vadd.f32 %v2977_v18, %v2959_v61 }
0x13af   :  { %v2939_v13 = vpop.permute.xlu1 %2938 }
0x13b0   :  { %v2960_v22 = vmul.f32 %v5563_v43, %v2939_v13  ;;  %v3014_v7 = vrot.slane %v5646_v51, 7 }
0x13b2   :  { %v5648_v23 = vadd.f32 %v2979_v39, %v2960_v22 }
0x13b3   :  { %v2941_v40 = vpop.permute.xlu1 %2940  ;;  %v2947_v2 = vpop.permute.xlu0 %2946 }
0x13b4   :  { %v2961_v59 = vmul.f32 %v5565_v4, %v2941_v40  ;;  %v3016_v43 = vrot.slane %v5648_v23, 6  ;;  %v5658_v4 = vadd.f32 %v2975_v26, %v2958_v49  ;;  %v2964_v13 = vmul.f32 %v5570_v48, %v2947_v2 }
0x13b6   :  { %v5651_v44 = vadd.f32 %v2981_v1, %v2961_v59  ;;  %v3015_v1 = vsel %vm403_vm2, %v3014_v7, %v5658_v4 }
0x13b7   :  { %v2943_v31 = vpop.permute.xlu1 %2942 }
0x13b8   :  { %v2962_v24 = vmul.f32 %v5573_v50, %v2943_v31  ;;  %v3018_v18 = vrot.slane %v5651_v44, 5 }
0x13ba   :  { %v5655_v34 = vadd.f32 %v2983_v9, %v2962_v24  ;;  %v2949_v39 = vpop.permute.xlu0 %2948  ;;  %v3017_v9 = vsel %vm406_vm3, %v3016_v43, %v3015_v1 }
0x13bb   :  { %v2945_v36 = vpop.permute.xlu1 %2944  ;;  %v2965_v50 = vmul.f32 %v5590_v14, %v2949_v39  ;;  %v3019_v61 = vsel %vm409_vm4, %v3018_v18, %v3017_v9  ;;  %v3090_v18 = vld [vmem:[%s6119_s0 + $0x7] sm:$0x1] }
0x13bc   :  { %v2963_v3 = vmul.f32 %v5582_v33, %v2945_v36  ;;  %v3020_v35 = vrot.slane %v5655_v34, 4 }
0x13be   :  { %v5666_v38 = vadd.f32 %v2985_v0, %v2963_v3  ;;  %v2987_v40 = vpop.permute.xlu0 %2986  ;;  %v3021_v31 = vsel %vm412_vm5, %v3020_v35, %v3019_v61  ;;  %v3092_v61 = vld [vmem:[%s6119_s0 + $0x17] sm:$0x1] }
0x13bf   :  { %v2989_v26 = vpop.permute.xlu1 %2988  ;;  %v5674_v59 = vadd.f32 %v2987_v40, %v2964_v13  ;;  %v3091_v13 = vld [vmem:[%s6119_s0 + $0xf] sm:$0x1] }
0x13c0   :  { %v3022_v22 = vrot.slane %v5666_v38, 3  ;;  %v5672_v33 = vadd.f32 %v2989_v26, %v2965_v50 }
0x13c1   :  { %v3024_v49 = vrot.slane %v5674_v59, 2 }
0x13c2   :  { %v3026_v14 = vrot.slane %v5672_v33, 1  ;;  %v3023_v0 = vsel %vm415_vm6, %v3022_v22, %v3021_v31  ;;  %v3094_v31 = vld [vmem:[%s6119_s0 + $0x27] sm:$0x1] }
0x13c3   :  { %v3055_v24 = vpop.permute.xlu1 %3054  ;;  %v3025_v48 = vsel %vm418_vm7, %v3024_v49, %v3023_v0  ;;  %v3093_v49 = vld [vmem:[%s6119_s0 + $0x1f] sm:$0x1] }
0x13c4   :  { %3057 = vst.msk [vmem:[#allocation3] sm:$0xff] %vm24_vm1, %v3055_v24  ;;  %v3027_v2 = vsel %vm421_vm8, %v3026_v14, %v3025_v48 }
0x13c5   :  { %3028 = vrot.lane.b32.xlu0 %v3027_v2, %s4337_s16 }
0x1437   :  { %v3029_v7 = vpop.permute.xlu0 %3028 }
0x1438   :  { %3031 = vst.msk [vmem:[#allocation2] sm:$0xff] %vm24_vm1, %v3029_v7  ;;  %v3096_v7 = vld [vmem:[%s6119_s0 + $0x37] sm:$0x1] }
0x143f   :  { %v3106_v43 = vld [vmem:[#allocation2] sm:$0xff] }
0x1440   :  { %v3108_v36 = vpack.c.bf16 %v3106_v43, %v3106_v43 }
0x1442   :  { %3733 = vmatmul.mubr.msk.bf16.vlgmr.msra.gmra.mrb[12].mxu1 %vm24_vm1, %v3108_v36 }
0x1515   :  { %v3146_v39 = vpop.f32.mrb[12].mxu1 }
0x1516   :  { %v3734_v3 = vpop.f32.mrb[13].mxu1  ;;  %v5689_v35 = vadd.f32 %v3146_v39, %v3090_v18  ;;  %v3153_v9 = vrot.slane %v3146_v39, 1  ;;  %v3154_v26 = vrot.slane %v3146_v39, 2  ;;  %v3156_v22 = vrot.slane %v3146_v39, 4  ;;  %v3095_v18 = vld [vmem:[%s6119_s0 + $0x2f] sm:$0x1] }
0x1517   :  { %v3149_v1 = vpop.f32.mrb[14].mxu1  ;;  %v3155_v14 = vrot.slane %v3146_v39, 3  ;;  %v3158_v24 = vrot.slane %v3146_v39, 6  ;;  %v3157_v43 = vrot.slane %v3146_v39, 5 }
0x1518   :  { %v3735_v50 = vpop.f32.mrb[15].mxu1  ;;  %4196 = vtanh.f32 %v5689_v35  ;;  %v5698_v40 = vadd.f32 %v3153_v9, %v3091_v13  ;;  %v5703_v0 = vadd.f32 %v3154_v26, %v3092_v61  ;;  %v5708_v48 = vadd.f32 %v3156_v22, %v3094_v31  ;;  %v3097_v9 = vld [vmem:[%s6119_s0 + $0x3f] sm:$0x1] }
0x1519   :  { %v3171_v36 = vadd.f32 %v3155_v14, %v3093_v49  ;;  %v3174_v3 = vadd.f32 %v3158_v24, %v3096_v7  ;;  %v3159_v1 = vrot.slane %v3146_v39, 7  ;;  %v3173_v50 = vadd.f32 %v3157_v43, %v3095_v18  ;;  %v3107_v14 = vld [vmem:[#allocation3] sm:$0xff] }
0x151a   :  { %4198 = vtanh.f32 %v5698_v40  ;;  %v3233_v24 = vrot.slane %v3107_v14, 1  ;;  %v3234_v7 = vrot.slane %v3107_v14, 2  ;;  %v3238_v43 = vrot.slane %v3107_v14, 6 }
0x151b   :  { %4200 = vtanh.f32 %v5703_v0  ;;  %v3175_v13 = vadd.f32 %v3159_v1, %v3097_v9  ;;  %v3235_v18 = vrot.slane %v3107_v14, 3  ;;  %v3239_v1 = vrot.slane %v3107_v14, 7 }
0x151c   :  { %4202 = vtanh.f32 %v5708_v48  ;;  %v3236_v9 = vrot.slane %v3107_v14, 4 }
0x151d   :  { %4204 = vtanh.f32 %v3171_v36 }
0x151e   :  { %4206 = vtanh.f32 %v3174_v3 }
0x151f   :  { %4208 = vtanh.f32 %v3173_v50 }
0x1520   :  { %4210 = vtanh.f32 %v3175_v13 }
0x1522   :  { %v4197_v2 = vpop.eup %4196 }
0x1523   :  { %3280 = vrot.lane.b32.xlu0 %v4197_v2, %s4336_s9 }
0x1524   :  { %v4199_v26 = vpop.eup %4198 }
0x1525   :  { %v4201_v61 = vpop.eup %4200 }
0x1526   :  { %3284 = vrot.lane.b32.xlu1 %v4201_v61, %s4336_s9  ;;  %v4203_v22 = vpop.eup %4202  ;;  %v3643_v61 = vmul.f32 -1.442695, %v3171_v36 }
0x1527   :  { %3282 = vrot.lane.b32.xlu0 %v4199_v26, %s4336_s9  ;;  %v4205_v31 = vpop.eup %4204  ;;  %v3237_v26 = vrot.slane %v3107_v14, 5 }
0x1528   :  { %v4207_v39 = vpop.eup %4206 }
0x1529   :  { %v4209_v49 = vpop.eup %4208 }
0x152a   :  { %3286 = vrot.lane.b32.xlu1 %v4205_v31, %s4336_s9  ;;  %v4211_v2 = vpop.eup %4210 }
0x152b   :  { %3288 = vrot.lane.b32.xlu0 %v4203_v22, %s4336_s9 }
0x152e   :  { %3290 = vrot.lane.b32.xlu1 %v4209_v49, %s4336_s9 }
0x152f   :  { %3292 = vrot.lane.b32.xlu0 %v4207_v39, %s4336_s9 }
0x1532   :  { %3294 = vrot.lane.b32.xlu1 %v4211_v2, %s4336_s9 }
0x1533   :  { %3242 = vrot.lane.b32.xlu0 %v3233_v24, %s4336_s9 }
0x1536   :  { %3244 = vrot.lane.b32.xlu1 %v3234_v7, %s4336_s9 }
0x1537   :  { %3240 = vrot.lane.b32.xlu0 %v3107_v14, %s4336_s9 }
0x153a   :  { %3246 = vrot.lane.b32.xlu1 %v3235_v18, %s4336_s9 }
0x153b   :  { %3252 = vrot.lane.b32.xlu0 %v3238_v43, %s4336_s9 }
0x153e   :  { %3248 = vrot.lane.b32.xlu1 %v3236_v9, %s4336_s9 }
0x153f   :  { %3254 = vrot.lane.b32.xlu0 %v3239_v1, %s4336_s9 }
0x1542   :  { %3250 = vrot.lane.b32.xlu1 %v3237_v26, %s4336_s9 }
0x1543   :  { %453 = vrot.lane.b32.xlu0 %v4560_v5, %s4337_s16 }
0x1546   :  { %455 = vrot.lane.b32.xlu1 %v4548_v57, %s4337_s16  ;;  %v3641_v57 = vmul.f32 -1.442695, %v5698_v40 }
0x1547   :  { %457 = vrot.lane.b32.xlu0 %v4550_v58, %s4337_s16  ;;  %v3640_v58 = vmul.f32 -1.442695, %v5689_v35  ;;  %v3647_v35 = vmul.f32 -1.442695, %v3175_v13 }
0x1549   :  { %4212 = vpow2.f32 %v3640_v58 }
0x154a   :  { %459 = vrot.lane.b32.xlu1 %v4553_v62, %s4337_s16  ;;  %4214 = vpow2.f32 %v3641_v57  ;;  %v3646_v62 = vmul.f32 -1.442695, %v3174_v3 }
0x154b   :  { %461 = vrot.lane.b32.xlu0 %v4557_v16, %s4337_s16  ;;  %v3642_v16 = vmul.f32 -1.442695, %v5703_v0 }
0x154d   :  { %4216 = vpow2.f32 %v3642_v16 }
0x154e   :  { %463 = vrot.lane.b32.xlu1 %v4568_v11, %s4337_s16  ;;  %4218 = vpow2.f32 %v3643_v61  ;;  %v3645_v11 = vmul.f32 -1.442695, %v3173_v50 }
0x154f   :  { %465 = vrot.lane.b32.xlu0 %v4576_v19, %s4337_s16  ;;  %v3644_v19 = vmul.f32 -1.442695, %v5708_v48  ;;  %4220 = vpow2.f32 %v3646_v62 }
0x1552   :  { %467 = vrot.lane.b32.xlu1 %v4574_v27, %s4337_s16 }
0x1553   :  { %v4213_v5 = vpop.eup %4212 }
0x1554   :  { %v3200_v22 = vadd.f32 1.0, %v4213_v5  ;;  %v4215_v27 = vpop.eup %4214 }
0x1555   :  { %v3201_v31 = vadd.f32 1.0, %v4215_v27 }
0x1556   :  { %4222 = vrcp.f32 %v3200_v22 }
0x1557   :  { %4224 = vpow2.f32 %v3644_v19  ;;  %v4217_v40 = vpop.eup %4216 }
0x1558   :  { %4226 = vpow2.f32 %v3645_v11  ;;  %v4219_v39 = vpop.eup %4218  ;;  %v3202_v14 = vadd.f32 1.0, %v4217_v40 }
0x1559   :  { %4228 = vpow2.f32 %v3647_v35  ;;  %v4221_v0 = vpop.eup %4220  ;;  %v3203_v49 = vadd.f32 1.0, %v4219_v39 }
0x155a   :  { %4230 = vrcp.f32 %v3201_v31  ;;  %v3206_v50 = vadd.f32 1.0, %v4221_v0 }
0x155b   :  { %4232 = vrcp.f32 %v3202_v14 }
0x155c   :  { %4234 = vrcp.f32 %v3203_v49 }
0x155d   :  { %4236 = vrcp.f32 %v3206_v50 }
0x1560   :  { %v5758_v36 = vpop.eup %4222 }
0x1561   :  { %v4225_v24 = vpop.eup %4224 }
0x1562   :  { %v3204_v13 = vadd.f32 1.0, %v4225_v24  ;;  %v4227_v2 = vpop.eup %4226 }
0x1563   :  { %v4229_v7 = vpop.eup %4228  ;;  %v3205_v43 = vadd.f32 1.0, %v4227_v2 }
0x1564   :  { %4238 = vrcp.f32 %v3204_v13  ;;  %v5762_v18 = vpop.eup %4230  ;;  %v3207_v58 = vadd.f32 1.0, %v4229_v7  ;;  %v3101_v7 = vld [vmem:[%s6120_s1 + $0x1f] sm:$0x1] }
0x1565   :  { %4240 = vrcp.f32 %v3205_v43  ;;  %v5766_v57 = vpop.eup %4232 }
0x1566   :  { %v5768_v5 = vpop.eup %4234  ;;  %4242 = vrcp.f32 %v3207_v58  ;;  %v3100_v58 = vld [vmem:[%s6120_s1 + $0x17] sm:$0x1] }
0x1567   :  { %v5773_v19 = vpop.eup %4236 }
0x156e   :  { %v5776_v27 = vpop.eup %4238 }
0x156f   :  { %v5784_v0 = vpop.eup %4240 }
0x1570   :  { %v5790_v24 = vpop.eup %4242 }
0x1595   :  { %v3281_v3 = vpop.permute.xlu0 %3280 }
0x1596   :  { %v3304_v48 = vmul.f32 %v5758_v36, %v3281_v3 }
0x1598   :  { %3320 = vrot.lane.b32.xlu0 %v3304_v48, %s4336_s9  ;;  %v3285_v9 = vpop.permute.xlu1 %3284 }
0x1599   :  { %v3283_v1 = vpop.permute.xlu0 %3282  ;;  %v3306_v61 = vmul.f32 %v5766_v57, %v3285_v9 }
0x159a   :  { %v3305_v26 = vmul.f32 %v5762_v18, %v3283_v1  ;;  %v3099_v1 = vld [vmem:[%s6120_s1 + $0xf] sm:$0x1] }
0x159c   :  { %3322 = vrot.lane.b32.xlu0 %v3305_v26, %s4336_s9  ;;  %v3287_v62 = vpop.permute.xlu1 %3286 }
0x159d   :  { %v3289_v16 = vpop.permute.xlu0 %3288  ;;  %v3307_v22 = vmul.f32 %v5768_v5, %v3287_v62 }
0x159e   :  { %v3308_v40 = vmul.f32 %v5776_v27, %v3289_v16 }
0x159f   :  { %3326 = vrot.lane.b32.xlu1 %v3307_v22, %s4336_s9  ;;  %v3098_v22 = vld [vmem:[%s6120_s1 + $0x7] sm:$0x1] }
0x15a0   :  { %3324 = vrot.lane.b32.xlu0 %v3306_v61, %s4336_s9  ;;  %v3291_v35 = vpop.permute.xlu1 %3290  ;;  %v3105_v61 = vld [vmem:[%s6120_s1 + $0x3f] sm:$0x1] }
0x15a1   :  { %v3293_v11 = vpop.permute.xlu0 %3292  ;;  %v3309_v3 = vmul.f32 %v5784_v0, %v3291_v35 }
0x15a2   :  { %v3310_v31 = vmul.f32 %v5773_v19, %v3293_v11 }
0x15a3   :  { %3328 = vrot.lane.b32.xlu1 %v3308_v40, %s4336_s9 }
0x15a4   :  { %3332 = vrot.lane.b32.xlu0 %v3310_v31, %s4336_s9  ;;  %v3295_v14 = vpop.permute.xlu1 %3294  ;;  %v3104_v31 = vld [vmem:[%s6120_s1 + $0x37] sm:$0x1] }
0x15a5   :  { %v5782_v39 = vpop.permute.xlu0 %3242  ;;  %v3311_v50 = vmul.f32 %v5790_v24, %v3295_v14 }
0x15a7   :  { %3330 = vrot.lane.b32.xlu1 %v3309_v3, %s4336_s9 }
0x15a8   :  { %888 = vrot.lane.b32.xlu0 %v4741_v52, %s4337_s16  ;;  %v5792_v48 = vpop.permute.xlu1 %3244 }
0x15a9   :  { %v3241_v49 = vpop.permute.xlu0 %3240 }
0x15ab   :  { %3334 = vrot.lane.b32.xlu1 %v3311_v50, %s4336_s9 }
0x15ac   :  { %892 = vrot.lane.b32.xlu0 %v4731_v42, %s4337_s16  ;;  %v5800_v2 = vpop.permute.xlu1 %3246 }
0x15ad   :  { %v5798_v13 = vpop.permute.xlu0 %3252 }
0x15af   :  { %890 = vrot.lane.b32.xlu1 %v4729_v41, %s4337_s16 }
0x15b0   :  { %896 = vrot.lane.b32.xlu0 %v4738_v45, %s4337_s16  ;;  %v5811_v43 = vpop.permute.xlu1 %3248  ;;  %v3102_v45 = vld [vmem:[%s6120_s1 + $0x27] sm:$0x1] }
0x15b1   :  { %v5806_v52 = vpop.permute.xlu0 %3254  ;;  %v3268_v3 = vmul.f32 %v5776_v27, %v5811_v43 }
0x15b3   :  { %894 = vrot.lane.b32.xlu1 %v4734_v46, %s4337_s16  ;;  %v3103_v46 = vld [vmem:[%s6120_s1 + $0x2f] sm:$0x1]  ;;  %s4339_s1 = smov [#allocation6]  }
0x15b4   :  { %3414 = vrot.lane.b32.xlu0 %v3101_v7, %s4337_s16  ;;  %v5819_v41 = vpop.permute.xlu1 %3250 }
0x15b5   :  { %v454_v42 = vpop.permute.xlu0 %453 }
0x15b6   :  { %478 = vst.msk [vmem:[#allocation4] sm:$0x1] %vm477_vm9, %v454_v42 }
0x15b7   :  { %3410 = vrot.lane.b32.xlu1 %v3099_v1, %s4337_s16  ;;  %v3269_v1 = vmul.f32 %v5784_v0, %v5819_v41 }
0x15b8   :  { %3416 = vrot.lane.b32.xlu0 %v3102_v45, %s4337_s16  ;;  %v456_v26 = vpop.permute.xlu1 %455 }
0x15b9   :  { %v458_v9 = vpop.permute.xlu0 %457  ;;  %479 = vst.msk [vmem:[#allocation4 + $0x8] sm:$0x1] %vm477_vm9, %v456_v26 }
0x15ba   :  { %480 = vst.msk [vmem:[#allocation4 + $0x10] sm:$0x1] %vm477_vm9, %v458_v9 }
0x15bb   :  { %3412 = vrot.lane.b32.xlu1 %v3100_v58, %s4337_s16 }
0x15bc   :  { %3418 = vrot.lane.b32.xlu0 %v3103_v46, %s4337_s16  ;;  %v460_v62 = vpop.permute.xlu1 %459 }
0x15bd   :  { %v462_v16 = vpop.permute.xlu0 %461  ;;  %481 = vst.msk [vmem:[#allocation4 + $0x18] sm:$0x1] %vm477_vm9, %v460_v62 }
0x15be   :  { %482 = vst.msk [vmem:[#allocation4 + $0x20] sm:$0x1] %vm477_vm9, %v462_v16  ;;  %v3271_v16 = vmul.f32 %v5790_v24, %v5806_v52 }
0x15bf   :  { %3408 = vrot.lane.b32.xlu1 %v3098_v22, %s4337_s16 }
0x15c0   :  { %3422 = vrot.lane.b32.xlu0 %v3105_v61, %s4337_s16  ;;  %v464_v35 = vpop.permute.xlu1 %463 }
0x15c1   :  { %v466_v11 = vpop.permute.xlu0 %465  ;;  %483 = vst.msk [vmem:[#allocation4 + $0x28] sm:$0x1] %vm477_vm9, %v464_v35 }
0x15c2   :  { %484 = vst.msk [vmem:[#allocation4 + $0x30] sm:$0x1] %vm477_vm9, %v466_v11 }
0x15c3   :  { %3420 = vrot.lane.b32.xlu1 %v3104_v31, %s4337_s16 }
0x15c4   :  { %900 = vrot.lane.b32.xlu0 %v4757_v10, %s4337_s16  ;;  %v468_v40 = vpop.permute.xlu1 %467 }
0x15c5   :  { %485 = vst.msk [vmem:[#allocation4 + $0x38] sm:$0x1] %vm477_vm9, %v468_v40 }
0x15c7   :  { %898 = vrot.lane.b32.xlu1 %v4749_v63, %s4337_s16  ;;  %v3264_v63 = vmul.f32 %v5758_v36, %v3241_v49 }
0x15c8   :  { %1322 = vrot.lane.b32.xlu0 %v4932_v20, %s4337_s16 }
0x15cb   :  { %902 = vrot.lane.b32.xlu1 %v4755_v6, %s4337_s16 }
0x15cc   :  { %1326 = vrot.lane.b32.xlu0 %v4922_v29, %s4337_s16 }
0x15cf   :  { %1324 = vrot.lane.b32.xlu1 %v4920_v28, %s4337_s16  ;;  %v3265_v28 = vmul.f32 %v5762_v18, %v5782_v39  ;;  %v3270_v39 = vmul.f32 %v5773_v19, %v5798_v13 }
0x15d0   :  { %1330 = vrot.lane.b32.xlu0 %v4929_v54, %s4337_s16  ;;  %v3266_v54 = vmul.f32 %v5766_v57, %v5792_v48 }
0x15d3   :  { %1328 = vrot.lane.b32.xlu1 %v4925_v32, %s4337_s16 }
0x15d4   :  { %1334 = vrot.lane.b32.xlu0 %v4948_v53, %s4337_s16 }
0x15d7   :  { %1332 = vrot.lane.b32.xlu1 %v4940_v47, %s4337_s16 }
0x15d8   :  { %1756 = vrot.lane.b32.xlu0 %v5113_v8, %s4337_s16 }
0x15db   :  { %1336 = vrot.lane.b32.xlu1 %v4946_v17, %s4337_s16  ;;  %v3267_v17 = vmul.f32 %v5768_v5, %v5800_v2 }
0x15dc   :  { %1760 = vrot.lane.b32.xlu0 %v5103_v37, %s4337_s16 }
0x15df   :  { %1758 = vrot.lane.b32.xlu1 %v5101_v55, %s4337_s16 }
0x15e3   :  { %1762 = vrot.lane.b32.xlu1 %v5106_v60, %s4337_s16 }
0x160a   :  { %v3321_v6 = vpop.permute.xlu0 %3320 }
0x160b   :  { %v3344_v10 = vadd.f32 %v3321_v6, %v3264_v63 }
0x160d   :  { %4244 = vtanh.f32 %v3344_v10 }
0x160e   :  { %v3323_v29 = vpop.permute.xlu0 %3322 }
0x160f   :  { %v3345_v32 = vadd.f32 %v3323_v29, %v3265_v28 }
0x1611   :  { %4246 = vtanh.f32 %v3345_v32  ;;  %v3474_v20 = vrot.slane %v3345_v32, 7  ;;  %v3327_v37 = vpop.permute.xlu1 %3326 }
0x1612   :  { %v3325_v53 = vpop.permute.xlu0 %3324  ;;  %v3347_v8 = vadd.f32 %v3327_v37, %v3267_v17 }
0x1613   :  { %v3475_v55 = vsel %vm403_vm2, %v3474_v20, %v3344_v10  ;;  %v3346_v60 = vadd.f32 %v3325_v53, %v3266_v54 }
0x1614   :  { %v3478_v49 = vrot.slane %v3347_v8, 5 }
0x1615   :  { %4248 = vtanh.f32 %v3346_v60  ;;  %v3476_v14 = vrot.slane %v3346_v60, 6  ;;  %v3329_v2 = vpop.permute.xlu1 %3328 }
0x1616   :  { %v3333_v48 = vpop.permute.xlu0 %3332  ;;  %4250 = vtanh.f32 %v3347_v8  ;;  %v3348_v42 = vadd.f32 %v3329_v2, %v3268_v3 }
0x1617   :  { %v4245_v47 = vpop.eup %4244  ;;  %v3477_v50 = vsel %vm406_vm3, %v3476_v14, %v3475_v55  ;;  %v3350_v7 = vadd.f32 %v3333_v48, %v3270_v39  ;;  %v6158_v48 = vld [vmem:[#allocation12_spill] sm:$0xff] }
0x1618   :  { %3368 = vrot.lane.b32.xlu1 %v4245_v47, %s4336_s9  ;;  %v3479_v45 = vsel %vm409_vm4, %v3478_v49, %v3477_v50  ;;  %v3480_v13 = vrot.slane %v3348_v42, 4 }
0x1619   :  { %4252 = vtanh.f32 %v3350_v7  ;;  %v3331_v26 = vpop.permute.xlu1 %3330  ;;  %v3484_v11 = vrot.slane %v3350_v7, 2  ;;  %v6160_v7 = vld [vmem:[#allocation14_spill] sm:$0xff] }
0x161a   :  { %v889_v9 = vpop.permute.xlu0 %888  ;;  %v3481_v43 = vsel %vm412_vm5, %v3480_v13, %v3479_v45  ;;  %v3349_v58 = vadd.f32 %v3331_v26, %v3269_v1  ;;  %4254 = vtanh.f32 %v3348_v42  ;;  %v6161_v1 = vld [vmem:[#allocation21_spill] sm:$0xff]  ;;  %v6162_v13 = vld [vmem:[#allocation15_spill] sm:$0xff]  ;;  %v6163_v26 = vld [vmem:[#allocation18_spill] sm:$0xff] }
0x161b   :  { %v4247_v46 = vpop.eup %4246  ;;  %912 = vst.msk [vmem:[#allocation4 + $0x1] sm:$0x1] %vm477_vm9, %v889_v9 }
0x161c   :  { %3370 = vrot.lane.b32.xlu1 %v4247_v46, %s4336_s9  ;;  %v3482_v61 = vrot.slane %v3349_v58, 3  ;;  %4256 = vtanh.f32 %v3349_v58 }
0x161d   :  { %v3335_v41 = vpop.permute.xlu1 %3334 }
0x161e   :  { %v893_v62 = vpop.permute.xlu0 %892  ;;  %v3483_v35 = vsel %vm415_vm6, %v3482_v61, %v3481_v43  ;;  %v3351_v31 = vadd.f32 %v3335_v41, %v3271_v16  ;;  %v6164_v43 = vld [vmem:[#allocation17_spill] sm:$0xff]  ;;  %v6165_v61 = vld [vmem:[#allocation20_spill] sm:$0xff]  ;;  %v6168_v41 = vld [vmem:[#allocation22_spill] sm:$0xff] }
0x161f   :  { %v4249_v22 = vpop.eup %4248  ;;  %914 = vst.msk [vmem:[#allocation4 + $0x11] sm:$0x1] %vm477_vm9, %v893_v62  ;;  %v3485_v40 = vsel %vm418_vm7, %v3484_v11, %v3483_v35  ;;  %v6166_v62 = vld [vmem:[#allocation19_spill] sm:$0xff]  ;;  %v6167_v11 = vld [vmem:[#allocation24_spill] sm:$0xff] }
0x1620   :  { %3372 = vrot.lane.b32.xlu0 %v4249_v22, %s4336_s9  ;;  %v4251_v63 = vpop.eup %4250  ;;  %4258 = vtanh.f32 %v3351_v31  ;;  %v3486_v6 = vrot.slane %v3351_v31, 1  ;;  %v6169_v31 = vld [vmem:[#allocation23_spill] sm:$0xff] }
0x1621   :  { %v891_v28 = vpop.permute.xlu1 %890 }
0x1622   :  { %v897_v10 = vpop.permute.xlu0 %896  ;;  %913 = vst.msk [vmem:[#allocation4 + $0x9] sm:$0x1] %vm477_vm9, %v891_v28  ;;  %v3487_v29 = vsel %vm421_vm8, %v3486_v6, %v3485_v40 }
0x1623   :  { %v4253_v52 = vpop.eup %4252  ;;  %916 = vst.msk [vmem:[#allocation4 + $0x21] sm:$0x1] %vm477_vm9, %v897_v10 }
0x1624   :  { %3374 = vrot.lane.b32.xlu0 %v4251_v63, %s4336_s9  ;;  %3380 = vrot.lane.b32.xlu1 %v4253_v52, %s4336_s9  ;;  %v4255_v54 = vpop.eup %4254 }
0x1625   :  { %v895_v20 = vpop.permute.xlu1 %894 }
0x1626   :  { %v5915_v32 = vpop.permute.xlu0 %3414  ;;  %915 = vst.msk [vmem:[#allocation4 + $0x19] sm:$0x1] %vm477_vm9, %v895_v20  ;;  %v4257_v17 = vpop.eup %4256 }
0x1628   :  { %3376 = vrot.lane.b32.xlu0 %v4255_v54, %s4336_s9 }
0x1629   :  { %v5921_v53 = vpop.permute.xlu1 %3410 }
0x162a   :  { %v5919_v47 = vpop.permute.xlu0 %3416  ;;  %v4259_v55 = vpop.eup %4258 }
0x162b   :  { %3382 = vrot.lane.b32.xlu1 %v4259_v55, %s4336_s9 }
0x162c   :  { %3378 = vrot.lane.b32.xlu0 %v4257_v17, %s4336_s9  ;;  %s3549_s9 = sshll.u32 %s4339_s1, 4  ;;  %s3550_s9 = int_to_ptr.vmem [resolvable:$true] %s3549_s9 }
0x162d   :  { %v5927_v60 = vpop.permute.xlu1 %3412  ;;  %s4264_s15 = scalar_lea.vmem %s3550_s9, 128  ;;  %p4269_p1 = scmp.lt.s32.totalorder %s3550_s9, %s3550_s9 }
0x162e   :  { %v5925_v37 = vpop.permute.xlu0 %3418  ;;  %p4265_p0 = scmp.ne.s32.totalorder %s3550_s9, %s4264_s15  ;;  %p4270_p2 = scmp.lt.s32.totalorder %s4264_s15, %s4264_s15 }
0x162f   :  { %1766 = vrot.lane.b32.xlu1 %v5121_v21, %s4337_s16 }
0x1630   :  { %1764 = vrot.lane.b32.xlu0 %v5110_v25, %s4337_s16  ;;  %p4271_p3 = por %p4270_p2, %p4269_p1 }
0x1631   :  { %v3409_v39 = vpop.permute.xlu1 %3408 }
0x1632   :  { %v5933_v8 = vpop.permute.xlu0 %3422  ;;  %p4272_p4 = pnand %p4271_p3, %p4265_p0 }
0x1633   :  { %1770 = vrot.lane.b32.xlu1 %v5127_v30, %s4337_s16  ;;  %v6156_v30 = vld [vmem:[#allocation11_spill] sm:$0xff] }
0x1634   :  { %1768 = vrot.lane.b32.xlu0 %v5129_v15, %s4337_s16 }
0x1635   :  { %v5939_v3 = vpop.permute.xlu1 %3420 }
0x1636   :  { %v901_v14 = vpop.permute.xlu0 %900 }
0x1637   :  { %918 = vst.msk [vmem:[#allocation4 + $0x31] sm:$0x1] %vm477_vm9, %v901_v14  ;;  %3488 = vrot.lane.b32.xlu1 %v3487_v29, %s4338_s6 }
0x1638   :  { %2190 = vrot.lane.b32.xlu0 %v5303_v56, %s4337_s16  ;;  %v6157_v56 = vld [vmem:[#allocation13_spill] sm:$0xff] }
0x1639   :  { %v899_v21 = vpop.permute.xlu1 %898 }
0x163a   :  { %v1323_v25 = vpop.permute.xlu0 %1322  ;;  %917 = vst.msk [vmem:[#allocation4 + $0x29] sm:$0x1] %vm477_vm9, %v899_v21 }
0x163b   :  { %1346 = vst.msk [vmem:[#allocation4 + $0x2] sm:$0x1] %vm477_vm9, %v1323_v25  ;;  %2192 = vrot.lane.b32.xlu1 %v6156_v30, %s4337_s16 }
0x163c   :  { %2194 = vrot.lane.b32.xlu0 %v5293_v12, %s4337_s16  ;;  %v6159_v12 = vld [vmem:[#allocation16_spill] sm:$0xff] }
0x163d   :  { %v903_v49 = vpop.permute.xlu1 %902 }
0x163e   :  { %v1327_v15 = vpop.permute.xlu0 %1326  ;;  %919 = vst.msk [vmem:[#allocation4 + $0x39] sm:$0x1] %vm477_vm9, %v903_v49 }
0x163f   :  { %1348 = vst.msk [vmem:[#allocation4 + $0x12] sm:$0x1] %vm477_vm9, %v1327_v15  ;;  %2196 = vrot.lane.b32.xlu1 %v6158_v48, %s4337_s16 }
0x1640   :  { %2198 = vrot.lane.b32.xlu0 %v6157_v56, %s4337_s16 }
0x1641   :  { %v1325_v2 = vpop.permute.xlu1 %1324 }
0x1642   :  { %v1331_v50 = vpop.permute.xlu0 %1330  ;;  %1347 = vst.msk [vmem:[#allocation4 + $0xa] sm:$0x1] %vm477_vm9, %v1325_v2 }
0x1643   :  { %1350 = vst.msk [vmem:[#allocation4 + $0x22] sm:$0x1] %vm477_vm9, %v1331_v50  ;;  %2200 = vrot.lane.b32.xlu1 %v6160_v7, %s4337_s16 }
0x1644   :  { %2202 = vrot.lane.b32.xlu0 %v6159_v12, %s4337_s16 }
0x1645   :  { %v1329_v45 = vpop.permute.xlu1 %1328 }
0x1646   :  { %v1335_v42 = vpop.permute.xlu0 %1334  ;;  %1349 = vst.msk [vmem:[#allocation4 + $0x1a] sm:$0x1] %vm477_vm9, %v1329_v45 }
0x1647   :  { %1352 = vst.msk [vmem:[#allocation4 + $0x32] sm:$0x1] %vm477_vm9, %v1335_v42  ;;  %2204 = vrot.lane.b32.xlu1 %v6162_v13, %s4337_s16 }
0x1648   :  { %2624 = vrot.lane.b32.xlu0 %v6161_v1, %s4337_s16 }
0x1649   :  { %v1333_v46 = vpop.permute.xlu1 %1332 }
0x164a   :  { %v1757_v9 = vpop.permute.xlu0 %1756  ;;  %1351 = vst.msk [vmem:[#allocation4 + $0x2a] sm:$0x1] %vm477_vm9, %v1333_v46 }
0x164b   :  { %1780 = vst.msk [vmem:[#allocation4 + $0x3] sm:$0x1] %vm477_vm9, %v1757_v9  ;;  %2626 = vrot.lane.b32.xlu1 %v6164_v43, %s4337_s16 }
0x164c   :  { %2628 = vrot.lane.b32.xlu0 %v6163_v26, %s4337_s16 }
0x164d   :  { %v1337_v16 = vpop.permute.xlu1 %1336 }
0x164e   :  { %v1761_v58 = vpop.permute.xlu0 %1760  ;;  %1353 = vst.msk [vmem:[#allocation4 + $0x3a] sm:$0x1] %vm477_vm9, %v1337_v16 }
0x164f   :  { %1782 = vst.msk [vmem:[#allocation4 + $0x13] sm:$0x1] %vm477_vm9, %v1761_v58  ;;  %2630 = vrot.lane.b32.xlu1 %v6166_v62, %s4337_s16 }
0x1650   :  { %2632 = vrot.lane.b32.xlu0 %v6165_v61, %s4337_s16 }
0x1651   :  { %v1759_v22 = vpop.permute.xlu1 %1758 }
0x1652   :  { %1781 = vst.msk [vmem:[#allocation4 + $0xb] sm:$0x1] %vm477_vm9, %v1759_v22 }
0x1653   :  { %2634 = vrot.lane.b32.xlu1 %v6168_v41, %s4337_s16 }
0x1654   :  { %2636 = vrot.lane.b32.xlu0 %v6167_v11, %s4337_s16 }
0x1655   :  { %v1763_v35 = vpop.permute.xlu1 %1762 }
0x1656   :  { %1783 = vst.msk [vmem:[#allocation4 + $0x1b] sm:$0x1] %vm477_vm9, %v1763_v35 }
0x1657   :  { %2638 = vrot.lane.b32.xlu1 %v6169_v31, %s4337_s16 }
0x1658   :  { %3058 = vrot.lane.b32.xlu0 %v5658_v4, %s4337_s16 }
0x165b   :  { %3060 = vrot.lane.b32.xlu1 %v5646_v51, %s4337_s16 }
0x165c   :  { %3062 = vrot.lane.b32.xlu0 %v5648_v23, %s4337_s16 }
0x165f   :  { %3064 = vrot.lane.b32.xlu1 %v5651_v44, %s4337_s16 }
0x1660   :  { %3066 = vrot.lane.b32.xlu0 %v5655_v34, %s4337_s16 }
0x1663   :  { %3068 = vrot.lane.b32.xlu1 %v5666_v38, %s4337_s16 }
0x1664   :  { %3070 = vrot.lane.b32.xlu0 %v5674_v59, %s4337_s16 }
0x1667   :  { %3072 = vrot.lane.b32.xlu1 %v5672_v33, %s4337_s16 }
0x168a   :  { %v3369_v4 = vpop.permute.xlu1 %3368 }
0x168b   :  { %v3392_v23 = vmul.f32 %v5758_v36, %v3369_v4 }
0x168d   :  { %v3432_v40 = vadd.f32 %v3409_v39, %v3392_v23 }
0x168e   :  { %v3371_v51 = vpop.permute.xlu1 %3370 }
0x168f   :  { %3492 = vrot.lane.b32.xlu0 %v3432_v40, %s4337_s16  ;;  %v3393_v34 = vmul.f32 %v5762_v18, %v3371_v51 }
0x1691   :  { %v3433_v44 = vadd.f32 %v5921_v53, %v3393_v34 }
0x1692   :  { %v3373_v63 = vpop.permute.xlu0 %3372 }
0x1693   :  { %3494 = vrot.lane.b32.xlu1 %v3433_v44, %s4337_s16  ;;  %v3394_v59 = vmul.f32 %v5766_v57, %v3373_v63  ;;  %v3448_v29 = vrot.slane %v3433_v44, 7 }
0x1695   :  { %v3434_v36 = vadd.f32 %v5927_v60, %v3394_v59 }
0x1696   :  { %v3375_v38 = vpop.permute.xlu0 %3374  ;;  %v3381_v10 = vpop.permute.xlu1 %3380 }
0x1697   :  { %v3395_v6 = vmul.f32 %v5768_v5, %v3375_v38  ;;  %v3398_v18 = vmul.f32 %v5773_v19, %v3381_v10  ;;  %v3450_v20 = vrot.slane %v3434_v36, 6 }
0x1699   :  { %v3435_v33 = vadd.f32 %v5915_v32, %v3395_v6  ;;  %v3438_v32 = vadd.f32 %v5939_v3, %v3398_v18 }
0x169a   :  { %v3377_v52 = vpop.permute.xlu0 %3376 }
0x169b   :  { %v3396_v28 = vmul.f32 %v5776_v27, %v3377_v52  ;;  %3498 = vrot.lane.b32.xlu1 %v3435_v33, %s4337_s16  ;;  %v3452_v17 = vrot.slane %v3435_v33, 5  ;;  %v3449_v27 = vsel %vm403_vm2, %v3448_v29, %v3432_v40 }
0x169c   :  { %v3451_v19 = vsel %vm406_vm3, %v3450_v20, %v3449_v27 }
0x169d   :  { %v3436_v54 = vadd.f32 %v5919_v47, %v3396_v28  ;;  %v3383_v53 = vpop.permute.xlu1 %3382  ;;  %v3453_v25 = vsel %vm409_vm4, %v3452_v17, %v3451_v19 }
0x169e   :  { %v3379_v57 = vpop.permute.xlu0 %3378  ;;  %v3399_v60 = vmul.f32 %v5790_v24, %v3383_v53 }
0x169f   :  { %v3397_v5 = vmul.f32 %v5784_v0, %v3379_v57  ;;  %v3454_v55 = vrot.slane %v3436_v54, 4  ;;  %v3458_v0 = vrot.slane %v3438_v32, 2 }
0x16a0   :  { %v3439_v14 = vadd.f32 %v5933_v8, %v3399_v60 }
0x16a1   :  { %v3437_v39 = vadd.f32 %v5925_v37, %v3397_v5  ;;  %v1767_v30 = vpop.permute.xlu1 %1766  ;;  %v3455_v24 = vsel %vm412_vm5, %v3454_v55, %v3453_v25 }
0x16a2   :  { %v1765_v47 = vpop.permute.xlu0 %1764  ;;  %1785 = vst.msk [vmem:[#allocation4 + $0x2b] sm:$0x1] %vm477_vm9, %v1767_v30  ;;  %v3460_v3 = vrot.slane %v3439_v14, 1 }
0x16a3   :  { %v3456_v21 = vrot.slane %v3437_v39, 3  ;;  %1784 = vst.msk [vmem:[#allocation4 + $0x23] sm:$0x1] %vm477_vm9, %v1765_v47  ;;  %3502 = vrot.lane.b32.xlu1 %v3437_v39, %s4337_s16 }
0x16a5   :  { %v3457_v37 = vsel %vm415_vm6, %v3456_v21, %v3455_v24  ;;  %v1771_v49 = vpop.permute.xlu1 %1770 }
0x16a6   :  { %v1769_v15 = vpop.permute.xlu0 %1768  ;;  %v3459_v8 = vsel %vm418_vm7, %v3458_v0, %v3457_v37  ;;  %1787 = vst.msk [vmem:[#allocation4 + $0x3b] sm:$0x1] %vm477_vm9, %v1771_v49 }
0x16a7   :  { %1786 = vst.msk [vmem:[#allocation4 + $0x33] sm:$0x1] %vm477_vm9, %v1769_v15  ;;  %3506 = vrot.lane.b32.xlu1 %v3439_v14, %s4337_s16  ;;  %v3461_v56 = vsel %vm421_vm8, %v3460_v3, %v3459_v8 }
0x16a8   :  { %3462 = vrot.lane.b32.xlu0 %v3461_v56, %s4337_s16 }
0x16a9   :  { %v3489_v50 = vpop.permute.xlu1 %3488 }
0x16aa   :  { %v2191_v48 = vpop.permute.xlu0 %2190  ;;  %3491 = vst.msk [vmem:[#allocation3] sm:$0xff] %vm24_vm1, %v3489_v50 }
0x16ab   :  { %2214 = vst.msk [vmem:[#allocation4 + $0x4] sm:$0x1] %vm477_vm9, %v2191_v48 }
0x16ac   :  { %3496 = vrot.lane.b32.xlu0 %v3434_v36, %s4337_s16 }
0x16ad   :  { %v2193_v12 = vpop.permute.xlu1 %2192 }
0x16ae   :  { %v2195_v2 = vpop.permute.xlu0 %2194  ;;  %2215 = vst.msk [vmem:[#allocation4 + $0xc] sm:$0x1] %vm477_vm9, %v2193_v12 }
0x16af   :  { %2216 = vst.msk [vmem:[#allocation4 + $0x14] sm:$0x1] %vm477_vm9, %v2195_v2 }
0x16b0   :  { %3500 = vrot.lane.b32.xlu0 %v3436_v54, %s4337_s16 }
0x16b1   :  { %v2197_v42 = vpop.permute.xlu1 %2196  ;;  %v3529_v45 = vld [vmem:[#allocation3] sm:$0xff] }
0x16b2   :  { %v2199_v7 = vpop.permute.xlu0 %2198  ;;  %2217 = vst.msk [vmem:[#allocation4 + $0x1c] sm:$0x1] %vm477_vm9, %v2197_v42 }
0x16b3   :  { %2218 = vst.msk [vmem:[#allocation4 + $0x24] sm:$0x1] %vm477_vm9, %v2199_v7 }
0x16b4   :  { %3504 = vrot.lane.b32.xlu0 %v3438_v32, %s4337_s16  ;;  %3530 = vst.msk [vmem:[#allocation8] sm:$0xff] %vm24_vm1, %v3529_v45  ;;  %s4340_s16 = smov [#allocation4]  }
0x16b5   :  { %v2201_v13 = vpop.permute.xlu1 %2200  ;;  %s3536_s6 = sshll.u32 %s4340_s16, 4  ;;  %s6073_s6 = int_to_ptr.vmem [resolvable:$true] %s3536_s6 }
0x16b6   :  { %v2203_v1 = vpop.permute.xlu0 %2202  ;;  %2219 = vst.msk [vmem:[#allocation4 + $0x2c] sm:$0x1] %vm477_vm9, %v2201_v13 }
0x16b7   :  { %2220 = vst.msk [vmem:[#allocation4 + $0x34] sm:$0x1] %vm477_vm9, %v2203_v1 }
0x16b9   :  { %v2205_v46 = vpop.permute.xlu1 %2204 }
0x16ba   :  { %v2625_v9 = vpop.permute.xlu0 %2624  ;;  %2221 = vst.msk [vmem:[#allocation4 + $0x3c] sm:$0x1] %vm477_vm9, %v2205_v46 }
0x16bb   :  { %2648 = vst.msk [vmem:[#allocation4 + $0x5] sm:$0x1] %vm477_vm9, %v2625_v9 }
0x16bd   :  { %v2627_v43 = vpop.permute.xlu1 %2626 }
0x16be   :  { %v2629_v26 = vpop.permute.xlu0 %2628  ;;  %2649 = vst.msk [vmem:[#allocation4 + $0xd] sm:$0x1] %vm477_vm9, %v2627_v43 }
0x16bf   :  { %2650 = vst.msk [vmem:[#allocation4 + $0x15] sm:$0x1] %vm477_vm9, %v2629_v26 }
0x16c1   :  { %v2631_v16 = vpop.permute.xlu1 %2630 }
0x16c2   :  { %v2633_v58 = vpop.permute.xlu0 %2632  ;;  %2651 = vst.msk [vmem:[#allocation4 + $0x1d] sm:$0x1] %vm477_vm9, %v2631_v16 }
0x16c3   :  { %2652 = vst.msk [vmem:[#allocation4 + $0x25] sm:$0x1] %vm477_vm9, %v2633_v58 }
0x16c5   :  { %v2635_v62 = vpop.permute.xlu1 %2634 }
0x16c6   :  { %v2637_v61 = vpop.permute.xlu0 %2636  ;;  %2653 = vst.msk [vmem:[#allocation4 + $0x2d] sm:$0x1] %vm477_vm9, %v2635_v62 }
0x16c7   :  { %2654 = vst.msk [vmem:[#allocation4 + $0x35] sm:$0x1] %vm477_vm9, %v2637_v61 }
0x16c9   :  { %v2639_v11 = vpop.permute.xlu1 %2638 }
0x16ca   :  { %v3059_v22 = vpop.permute.xlu0 %3058  ;;  %2655 = vst.msk [vmem:[#allocation4 + $0x3d] sm:$0x1] %vm477_vm9, %v2639_v11 }
0x16cb   :  { %3082 = vst.msk [vmem:[#allocation4 + $0x6] sm:$0x1] %vm477_vm9, %v3059_v22 }
0x16cd   :  { %v3061_v35 = vpop.permute.xlu1 %3060 }
0x16ce   :  { %v3063_v41 = vpop.permute.xlu0 %3062  ;;  %3083 = vst.msk [vmem:[#allocation4 + $0xe] sm:$0x1] %vm477_vm9, %v3061_v35 }
0x16cf   :  { %3084 = vst.msk [vmem:[#allocation4 + $0x16] sm:$0x1] %vm477_vm9, %v3063_v41 }
0x16d1   :  { %v3065_v4 = vpop.permute.xlu1 %3064 }
0x16d2   :  { %v3067_v31 = vpop.permute.xlu0 %3066  ;;  %3085 = vst.msk [vmem:[#allocation4 + $0x1e] sm:$0x1] %vm477_vm9, %v3065_v4 }
0x16d3   :  { %3086 = vst.msk [vmem:[#allocation4 + $0x26] sm:$0x1] %vm477_vm9, %v3067_v31 }
0x16d5   :  { %v3069_v40 = vpop.permute.xlu1 %3068 }
0x16d6   :  { %v3071_v23 = vpop.permute.xlu0 %3070  ;;  %3087 = vst.msk [vmem:[#allocation4 + $0x2e] sm:$0x1] %vm477_vm9, %v3069_v40 }
0x16d7   :  { %3088 = vst.msk [vmem:[#allocation4 + $0x36] sm:$0x1] %vm477_vm9, %v3071_v23 }
0x16d9   :  { %v3073_v51 = vpop.permute.xlu1 %3072 }
0x16da   :  { %3089 = vst.msk [vmem:[#allocation4 + $0x3e] sm:$0x1] %vm477_vm9, %v3073_v51 }
0x1701   :  { %v3493_v34 = vpop.permute.xlu0 %3492 }
0x1702   :  { %3516 = vst.msk [vmem:[#allocation4 + $0x7] sm:$0x1] %vm477_vm9, %v3493_v34 }
0x1705   :  { %v3495_v44 = vpop.permute.xlu1 %3494 }
0x1706   :  { %3517 = vst.msk [vmem:[#allocation4 + $0xf] sm:$0x1] %vm477_vm9, %v3495_v44 }
0x170d   :  { %v3499_v63 = vpop.permute.xlu1 %3498 }
0x170e   :  { %3519 = vst.msk [vmem:[#allocation4 + $0x1f] sm:$0x1] %vm477_vm9, %v3499_v63 }
0x1715   :  { %v3503_v59 = vpop.permute.xlu1 %3502 }
0x1716   :  { %3521 = vst.msk [vmem:[#allocation4 + $0x2f] sm:$0x1] %vm477_vm9, %v3503_v59 }
0x1719   :  { %v3507_v38 = vpop.permute.xlu1 %3506 }
0x171a   :  { %3523 = vst.msk [vmem:[#allocation4 + $0x3f] sm:$0x1] %vm477_vm9, %v3507_v38  ;;  %v3463_v6 = vpop.permute.xlu0 %3462 }
0x171b   :  { %3465 = vst.msk [vmem:[#allocation2] sm:$0xff] %vm24_vm1, %v3463_v6 }
0x171e   :  { %v3497_v33 = vpop.permute.xlu0 %3496 }
0x171f   :  { %3518 = vst.msk [vmem:[#allocation4 + $0x17] sm:$0x1] %vm477_vm9, %v3497_v33 }
0x1722   :  { %v3501_v10 = vpop.permute.xlu0 %3500  ;;  %v3527_v36 = vld [vmem:[#allocation2] sm:$0xff] }
0x1723   :  { %3520 = vst.msk [vmem:[#allocation4 + $0x27] sm:$0x1] %vm477_vm9, %v3501_v10 }
0x1724   :  { %3528 = vst.msk [vmem:[#allocation6] sm:$0xff] %vm24_vm1, %v3527_v36 }
0x1725   :  { %4275 = shalt.err (!%p4272_p4)
}
0x1726   :  { %s4276_s19 = scalar_lea.hbm %s6123_s4, 128 }
0x1727   :  { %p4277_p5 = scmp.ne.s32.totalorder %s6123_s4, %s4276_s19  ;;  %p4280_p6 = scmp.lt.u32.totalorder %s4276_s19, %s6123_s4 }
0x1729   :  { %p4282_p7 = pnand %p4280_p6, %p4277_p5 }
0x172b   :  { %4285 = shalt.err (!%p4282_p7)
}
0x172c   :  { %3552 = dma.vmem_to_hbm [thread:$0]  %s3550_s9, 128, %s6123_s4, [#allocation7]  }
0x172d   :  { %s4286_s25 = scalar_lea.vmem %s3560_s14, 128  ;;  %p4291_p9 = scmp.lt.s32.totalorder %s3560_s14, %s3560_s14 }
0x172e   :  { %p4287_p8 = scmp.ne.s32.totalorder %s3560_s14, %s4286_s25  ;;  %p4292_p10 = scmp.lt.s32.totalorder %s4286_s25, %s4286_s25 }
0x1730   :  { %p4293_p11 = por %p4292_p10, %p4291_p9 }
0x1732   :  { %p4294_p12 = pnand %p4293_p11, %p4287_p8 }
0x1734   :  { %4297 = shalt.err (!%p4294_p12)
}
0x1735   :  { %s4298_s28 = scalar_lea.hbm %s6124_s5, 128 }
0x1736   :  { %p4299_p13 = scmp.ne.s32.totalorder %s6124_s5, %s4298_s28  ;;  %p4302_p0 = scmp.lt.u32.totalorder %s4298_s28, %s6124_s5 }
0x1738   :  { %p4304_p1 = pnand %p4302_p0, %p4299_p13 }
0x173a   :  { %4307 = shalt.err (!%p4304_p1)
}
0x173b   :  { %3562 = dma.vmem_to_hbm [thread:$0]  %s3560_s14, 128, %s6124_s5, [#allocation7]   ;;  %v3505_v52 = vpop.permute.xlu0 %3504 }
0x173c   :  { %3522 = vst.msk [vmem:[#allocation4 + $0x37] sm:$0x1] %vm477_vm9, %v3505_v52  ;;  %s4308_s10 = scalar_lea.vmem %s6073_s6, 1024  ;;  %p4313_p3 = scmp.lt.s32.totalorder %s6073_s6, %s6073_s6 }
0x173d   :  { %p4309_p2 = scmp.ne.s32.totalorder %s6073_s6, %s4308_s10  ;;  %p4314_p4 = scmp.lt.s32.totalorder %s4308_s10, %s4308_s10 }
0x173f   :  { %p4315_p5 = por %p4314_p4, %p4313_p3 }
0x1741   :  { %p4316_p6 = pnand %p4315_p5, %p4309_p2 }
0x1743   :  { %4319 = shalt.err (!%p4316_p6)
}
0x1744   :  { %s4320_s1 = scalar_lea.hbm %s6122_s3, 1024 }
0x1745   :  { %p4321_p7 = scmp.ne.s32.totalorder %s6122_s3, %s4320_s1  ;;  %p4324_p8 = scmp.lt.u32.totalorder %s4320_s1, %s6122_s3 }
0x1747   :  { %p4326_p9 = pnand %p4324_p8, %p4321_p7 }
0x1749   :  { %4329 = shalt.err (!%p4326_p9)
}
0x174a   :  { %s4342_s14 = smov 128   ;;  %s4343_s15 = smov 8  }
0x174b   :  { %3542 = dma.vmem_to_hbm [thread:$0]  %s6073_s6, 1024, %s6122_s3, [#allocation5], %s4342_s14, %s4342_s14, %s4343_s15  }
0x174c   :  { %4330 = dma.done.wait [#allocation5], 1024  }
0x174d   :  { %4331 = vsyncadd [#allocation5], 4294966272 }
0x174e   :  { %4332 = dma.done.wait [#allocation7], 256  }
0x174f   :  { %4333 = vsyncadd [#allocation7], 4294967040 }
0x1750   :  { %3572 = vsyncpa [#allocation5], 1 }
0x1751   :  { %3573 = vsyncpa [#allocation7], 1 }

</bundles_post_ra>
